<compile_context>
chip_gen: v5e
topology: v5e:2x2
jax: 0.10.0
libtpu: 0.0.40
codegen_flags: <defaults>
</compile_context>

<pallas_src>
from functools import partial

import jax
import jax.numpy as jnp
from jax import lax
from jax.experimental import pallas as pl
from jax.experimental.pallas import tpu as pltpu


# --------------------------------- kernel ---------------------------------

def _conv3x3_taps(flat, wp, n_rows):
    """9 shifted full-width views of a flat (rows, C) slab.

    Tap k = 3*dy + dx reads flat[r + dy*wp + dx] for r in [0, n_rows).
    The dx in {1,2} shifts are built ONCE as whole-slab sublane shifts and then
    re-sliced at the sublane-aligned dy*wp offsets (wp % 8 == 0), so there are no
    lane-offset stores and no per-tap reshape copies.
    """
    shifted = (flat, flat[1:], flat[2:])
    taps = []
    for dy in range(3):
        base = dy * wp
        for dx in range(3):
            taps.append(shifted[dx][base:base + n_rows])
    return taps


def _conv_stage(flat, w_ref, b_ref, wp, n_rows):
    """3x3 'valid' conv on a full-width flat slab: 9 accumulating MXU matmuls (K=C),
    fp32 accumulation, folded bias + ReLU epilogue in fp32."""
    taps = _conv3x3_taps(flat, wp, n_rows)
    acc = jnp.dot(taps[0], w_ref[0], preferred_element_type=jnp.float32)
    for k in range(1, 9):
        acc = acc + jnp.dot(taps[k], w_ref[k], preferred_element_type=jnp.float32)
    return jnp.maximum(acc + b_ref[...], 0.0)


def unet_conv2_kernel(x_ref, w1_ref, b1_ref, w2_ref, b2_ref, o_ref, *,
                      wp, n_rows1, n_rows2):
    # x_ref : (1, (t_h+6)*Wp, Cin)  halo'd, W-flattened input rows (compute dtype)
    # w*_ref: (9, Cin|Cout, Cout)   per-tap folded weights (compute dtype)
    # b*_ref: (1, Cout)             folded bias (fp32)
    # o_ref : (t_h*Wp, Cout)        full-width fp32 output (cols >= wout cropped in wrapper)
    xf = x_ref[0]                                                  # (rows, Cin)
    h1 = _conv_stage(xf, w1_ref, b1_ref, wp, n_rows1)              # conv1 + BN + ReLU (fp32)
    h1 = h1.astype(w2_ref.dtype)                                   # bf16 cast for MXU path
    h2 = _conv_stage(h1, w2_ref, b2_ref, wp, n_rows2)              # conv2 + BN + ReLU (fp32)
    o_ref[...] = h2.astype(o_ref.dtype)


# --------------------------------- wrapper ---------------------------------

def _fold_conv_bn(w_oihw, conv_bias, bn=None, *, eps=1e-5, compute_dtype=jnp.float32):
    """OIHW 3x3 conv weight (+bias) [+ inference BN] -> per-tap (9, Cin, Cout) weight
    (compute dtype) and (1, Cout) fp32 bias.  Tap k = 3*kh + kw."""
    o = w_oihw.shape[0]
    w = jnp.transpose(w_oihw, (2, 3, 1, 0)).reshape(9, -1, o).astype(jnp.float32)
    cb = jnp.zeros((o,), jnp.float32) if conv_bias is None else conv_bias.astype(jnp.float32)
    if bn is not None:
        gamma, beta, mean, var = bn
        scale = gamma.astype(jnp.float32) / jnp.sqrt(var.astype(jnp.float32) + eps)
        w = w * scale[None, None, :]
        cb = (cb - mean) * scale + beta
    return w.astype(compute_dtype), cb.reshape(1, o)


def _device_defaults():
    """Per-generation (tile_h, vmem_limit_bytes)."""
    kind = ""
    try:
        kind = jax.devices()[0].device_kind.lower()
    except Exception:
        pass
    if "v7" in kind:                          # 64 MiB VMEM / TC, 2 TCs
        return 16, 48 * 1024 * 1024
    if "v5" in kind or "v6" in kind:          # 128 MiB VMEM
        return 32, 64 * 1024 * 1024
    return 16, 32 * 1024 * 1024               # conservative fallback


@partial(jax.jit, static_argnames=("tile_h", "compute_dtype"))
def unet_conv2_pallas(x_nchw, w1, cb1, w2, cb2, bn1=None, bn2=None, *,
                      tile_h=None, compute_dtype=jnp.float32):
    """unetConv2 forward.  x_nchw:(N,Cin,H,W); weights in PyTorch OIHW layout."""
    n, c_in, h_in, w_in = x_nchw.shape
    c_out = w1.shape[0]
    assert w1.shape == (c_out, c_in, 3, 3) and w2.shape == (c_out, c_out, 3, 3)
    hout, wout = h_in - 4, w_in - 4
    assert hout > 0 and wout > 0, "unetConv2 needs H,W > 4 (two valid 3x3 convs)"

    def_tile_h, vmem_limit = _device_defaults()
    if tile_h is None:
        tile_h = def_tile_h

    # NCHW -> NHWC; pad W to a multiple of 8 so the (H,W) flattening and the dy*Wp
    # row offsets in the kernel are sublane aligned (no relayout copies).
    x = jnp.transpose(x_nchw, (0, 2, 3, 1)).astype(compute_dtype)
    wp = -(-w_in // 8) * 8
    if wp != w_in:
        x = jnp.pad(x, ((0, 0), (0, 0), (0, wp - w_in), (0, 0)))

    # Tile conv2-output rows; prefer a tile height that divides hout (no wasted rows).
    t_h = min(tile_h, hout)
    for cand in range(t_h, max(t_h // 2, 1) - 1, -1):
        if hout % cand == 0:
            t_h = cand
            break
    n_hb = -(-hout // t_h)
    hp = n_hb * t_h
    t_hin = t_h + 6        # 4 halo rows + 2 rows of slack so full-width taps stay in bounds

    if hp + 6 > h_in:
        x = jnp.pad(x, ((0, 0), (0, hp + 6 - h_in), (0, 0), (0, 0)))

    # Halo'd input windows, W-flattened so the kernel never reshapes.
    xb = jnp.stack([x[:, i * t_h:i * t_h + t_hin] for i in range(n_hb)], axis=1)
    xb = xb.reshape(n * n_hb, t_hin * wp, c_in)

    # Fold conv bias (+ inference BN) into per-tap matmul weights (fp32 math, then cast).
    w1m, b1 = _fold_conv_bn(w1, cb1, bn1, compute_dtype=compute_dtype)
    w2m, b2 = _fold_conv_bn(w2, cb2, bn2, compute_dtype=compute_dtype)

    n_rows1 = (t_h + 3) * wp       # conv1 full-width rows computed per tile
    n_rows2 = t_h * wp             # conv2 full-width rows stored per tile

    kernel = partial(unet_conv2_kernel, wp=wp, n_rows1=n_rows1, n_rows2=n_rows2)

    flops = 2 * n * n_hb * 9 * (n_rows1 * c_in * c_out + n_rows2 * c_out * c_out)
    bytes_accessed = (xb.size * xb.dtype.itemsize
                      + n * n_hb * n_rows2 * c_out * 4
                      + w1m.size * w1m.dtype.itemsize
                      + w2m.size * w2m.dtype.itemsize
                      + (b1.size + b2.size) * 4)

    out_flat = pl.pallas_call(
        kernel,
        out_shape=jax.ShapeDtypeStruct((n * n_hb * n_rows2, c_out), jnp.float32),
        grid_spec=pltpu.PrefetchScalarGridSpec(
            num_scalar_prefetch=0,
            grid=(n, n_hb),
            in_specs=[
                pl.BlockSpec((1, t_hin * wp, c_in), lambda b, i: (b * n_hb + i, 0, 0)),
                # Grid-invariant operands (constant index map -> no refetch between steps).
                pl.BlockSpec((9, c_in, c_out), lambda b, i: (0, 0, 0)),
                pl.BlockSpec((1, c_out), lambda b, i: (0, 0)),
                pl.BlockSpec((9, c_out, c_out), lambda b, i: (0, 0, 0)),
                pl.BlockSpec((1, c_out), lambda b, i: (0, 0)),
            ],
            out_specs=pl.BlockSpec((n_rows2, c_out), lambda b, i: (b * n_hb + i, 0)),
        ),
        compiler_params=pltpu.CompilerParams(
            dimension_semantics=("parallel", "parallel"),
            vmem_limit_bytes=vmem_limit,
        ),
        cost_estimate=pl.CostEstimate(flops=int(flops), transcendentals=0,
                                      bytes_accessed=int(bytes_accessed)),
    )(xb, w1m, b1, w2m, b2)

    # Drop the padded/garbage H rows and W columns; NHWC -> NCHW.
    out = out_flat.reshape(n, hp, wp, c_out)[:, :hout, :wout]
    return jnp.transpose(out, (0, 3, 1, 2))


# ----------------------- plain-JAX reference (verification) -----------------------

def unet_conv2_ref(x, w1, cb1, w2, cb2, bn1=None, bn2=None, eps=1e-5):
    def stage(z, wgt, cb, bn):
        y = lax.conv_general_dilated(z, wgt, (1, 1), [(0, 0), (0, 0)],
                                     dimension_numbers=("NCHW", "OIHW", "NCHW"))
        y = y + cb[None, :, None, None]
        if bn is not None:
            g, b, m, v = bn
            y = (y - m[None, :, None, None]) * (g / jnp.sqrt(v + eps))[None, :, None, None] \
                + b[None, :, None, None]
        return jnp.maximum(y, 0.0)

    return stage(stage(x, w1, cb1, bn1), w2, cb2, bn2)


if __name__ == "__main__":
    # unetConv2(in_size=4, out_size=8, is_batchnorm=True/False), small shapes
    N, Cin, H, W = 2, 4, 16, 16
    Cout = 8

    key = jax.random.PRNGKey(0)
    kx, k1, kb1, k2, kb2 = jax.random.split(key, 5)

    x = jax.random.normal(kx, (N, Cin, H, W), jnp.float32)
    w1 = 0.2 * jax.random.normal(k1, (Cout, Cin, 3, 3), jnp.float32)
    cb1 = 0.1 * jax.random.normal(kb1, (Cout,), jnp.float32)
    w2 = 0.2 * jax.random.normal(k2, (Cout, Cout, 3, 3), jnp.float32)
    cb2 = 0.1 * jax.random.normal(kb2, (Cout,), jnp.float32)

    def det_bn(c, off):
        gamma = 1.0 + 0.1 * jnp.arange(c, dtype=jnp.float32) / c
        beta = 0.05 * jnp.arange(c, dtype=jnp.float32) - off
        mean = 0.01 * jnp.arange(c, dtype=jnp.float32)
        var = 1.0 + 0.02 * jnp.arange(c, dtype=jnp.float32)
        return (gamma, beta, mean, var)

    bn1 = det_bn(Cout, 0.02)
    bn2 = det_bn(Cout, 0.03)

    # is_batchnorm=True path (fp32 MXU operands)
    out_bn = jax.block_until_ready(unet_conv2_pallas(x, w1, cb1, w2, cb2, bn1, bn2))
    ref_bn = jax.block_until_ready(unet_conv2_ref(x, w1, cb1, w2, cb2, bn1, bn2))
    assert out_bn.shape == (N, Cout, H - 4, W - 4)
    assert jnp.allclose(out_bn, ref_bn, atol=1e-4, rtol=1e-4), \
        f"BN path: max abs err = {jnp.max(jnp.abs(out_bn - ref_bn))}"

    # is_batchnorm=False path (fp32)
    out_nb = jax.block_until_ready(unet_conv2_pallas(x, w1, cb1, w2, cb2, None, None))
    ref_nb = jax.block_until_ready(unet_conv2_ref(x, w1, cb1, w2, cb2, None, None))
    assert jnp.allclose(out_nb, ref_nb, atol=1e-4, rtol=1e-4), \
        f"no-BN path: max abs err = {jnp.max(jnp.abs(out_nb - ref_nb))}"

    # bf16 MXU operand path (v6e/v7x oriented): fp32 accumulate + fp32 epilogue,
    # loosened tolerance vs. the fp32 reference.
    out_bf = jax.block_until_ready(
        unet_conv2_pallas(x, w1, cb1, w2, cb2, bn1, bn2, compute_dtype=jnp.bfloat16))
    assert out_bf.shape == (N, Cout, H - 4, W - 4)
    assert jnp.allclose(out_bf, ref_bn, atol=8e-2, rtol=8e-2), \
        f"bf16 path: max abs err = {jnp.max(jnp.abs(out_bf - ref_bn))}"

    print("KERNEL_OK")
</pallas_src>

<mosaic_0001>
module attributes {stable_mosaic.version = 11 : i64} {
  func.func @unet_conv2_kernel(%arg0: i32, %arg1: i32, %arg2: memref<1x288x4xf32, #tpu.memory_space<vmem>>, %arg3: memref<9x4x8xf32, #tpu.memory_space<vmem>>, %arg4: memref<1x8xf32, #tpu.memory_space<vmem>>, %arg5: memref<9x8x8xf32, #tpu.memory_space<vmem>>, %arg6: memref<1x8xf32, #tpu.memory_space<vmem>>, %arg7: memref<192x8xf32, #tpu.memory_space<vmem>>) attributes {dimension_semantics = [#tpu.dimension_semantics<parallel>, #tpu.dimension_semantics<parallel>], iteration_bounds = array<i64: 2, 1>, scalar_prefetch = 0 : i64, scratch_operands = 0 : i64, tpu.core_type = #tpu.core_type<tc>, window_params = [{transform_indices = @transform_0, window_bounds = array<i64: 1, 288, 4>}, {pipeline_mode = #tpu.pipeline_mode<synchronous>, transform_indices = @transform_1, window_bounds = array<i64: 9, 4, 8>}, {pipeline_mode = #tpu.pipeline_mode<synchronous>, transform_indices = @transform_2, window_bounds = array<i64: 1, 8>}, {pipeline_mode = #tpu.pipeline_mode<synchronous>, transform_indices = @transform_3, window_bounds = array<i64: 9, 8, 8>}, {pipeline_mode = #tpu.pipeline_mode<synchronous>, transform_indices = @transform_4, window_bounds = array<i64: 1, 8>}, {transform_indices = @transform_5, window_bounds = array<i64: 192, 8>}]} {
    %c0 = arith.constant 0 : index
    %c0_0 = arith.constant 0 : index
    %c0_1 = arith.constant 0 : index
    %0 = vector.load %arg2[%c0, %c0_0, %c0_1] : memref<1x288x4xf32, #tpu.memory_space<vmem>>, vector<1x288x4xf32>
    %1 = vector.shape_cast %0 : vector<1x288x4xf32> to vector<288x4xf32>
    %2 = vector.extract_strided_slice %1 {offsets = [1, 0], sizes = [287, 4], strides = [1, 1]} : vector<288x4xf32> to vector<287x4xf32>
    %3 = vector.extract_strided_slice %1 {offsets = [2, 0], sizes = [286, 4], strides = [1, 1]} : vector<288x4xf32> to vector<286x4xf32>
    %4 = vector.extract_strided_slice %1 {offsets = [0, 0], sizes = [240, 4], strides = [1, 1]} : vector<288x4xf32> to vector<240x4xf32>
    %5 = vector.extract_strided_slice %2 {offsets = [0, 0], sizes = [240, 4], strides = [1, 1]} : vector<287x4xf32> to vector<240x4xf32>
    %6 = vector.extract_strided_slice %3 {offsets = [0, 0], sizes = [240, 4], strides = [1, 1]} : vector<286x4xf32> to vector<240x4xf32>
    %7 = vector.extract_strided_slice %1 {offsets = [16, 0], sizes = [240, 4], strides = [1, 1]} : vector<288x4xf32> to vector<240x4xf32>
    %8 = vector.extract_strided_slice %2 {offsets = [16, 0], sizes = [240, 4], strides = [1, 1]} : vector<287x4xf32> to vector<240x4xf32>
    %9 = vector.extract_strided_slice %3 {offsets = [16, 0], sizes = [240, 4], strides = [1, 1]} : vector<286x4xf32> to vector<240x4xf32>
    %10 = vector.extract_strided_slice %1 {offsets = [32, 0], sizes = [240, 4], strides = [1, 1]} : vector<288x4xf32> to vector<240x4xf32>
    %11 = vector.extract_strided_slice %2 {offsets = [32, 0], sizes = [240, 4], strides = [1, 1]} : vector<287x4xf32> to vector<240x4xf32>
    %12 = vector.extract_strided_slice %3 {offsets = [32, 0], sizes = [240, 4], strides = [1, 1]} : vector<286x4xf32> to vector<240x4xf32>
    %c0_2 = arith.constant 0 : index
    %c0_3 = arith.constant 0 : index
    %c0_4 = arith.constant 0 : index
    %13 = vector.load %arg3[%c0_2, %c0_3, %c0_4] : memref<9x4x8xf32, #tpu.memory_space<vmem>>, vector<1x4x8xf32>
    %14 = vector.shape_cast %13 : vector<1x4x8xf32> to vector<4x8xf32>
    %cst = arith.constant dense<0.000000e+00> : vector<240x8xf32>
    %15 = tpu.matmul %4, %14, %cst {dimension_numbers = #tpu.dot_dimension_numbers<[1], [0], [0], [1], [0, 0, 1, 1], [], []>} : vector<240x4xf32>, vector<4x8xf32>, vector<240x8xf32> -> vector<240x8xf32>
    %c1 = arith.constant 1 : index
    %c0_5 = arith.constant 0 : index
    %c0_6 = arith.constant 0 : index
    %16 = vector.load %arg3[%c1, %c0_5, %c0_6] : memref<9x4x8xf32, #tpu.memory_space<vmem>>, vector<1x4x8xf32>
    %17 = vector.shape_cast %16 : vector<1x4x8xf32> to vector<4x8xf32>
    %cst_7 = arith.constant dense<0.000000e+00> : vector<240x8xf32>
    %18 = tpu.matmul %5, %17, %cst_7 {dimension_numbers = #tpu.dot_dimension_numbers<[1], [0], [0], [1], [0, 0, 1, 1], [], []>} : vector<240x4xf32>, vector<4x8xf32>, vector<240x8xf32> -> vector<240x8xf32>
    %19 = arith.addf %15, %18 : vector<240x8xf32>
    %c2 = arith.constant 2 : index
    %c0_8 = arith.constant 0 : index
    %c0_9 = arith.constant 0 : index
    %20 = vector.load %arg3[%c2, %c0_8, %c0_9] : memref<9x4x8xf32, #tpu.memory_space<vmem>>, vector<1x4x8xf32>
    %21 = vector.shape_cast %20 : vector<1x4x8xf32> to vector<4x8xf32>
    %cst_10 = arith.constant dense<0.000000e+00> : vector<240x8xf32>
    %22 = tpu.matmul %6, %21, %cst_10 {dimension_numbers = #tpu.dot_dimension_numbers<[1], [0], [0], [1], [0, 0, 1, 1], [], []>} : vector<240x4xf32>, vector<4x8xf32>, vector<240x8xf32> -> vector<240x8xf32>
    %23 = arith.addf %19, %22 : vector<240x8xf32>
    %c3 = arith.constant 3 : index
    %c0_11 = arith.constant 0 : index
    %c0_12 = arith.constant 0 : index
    %24 = vector.load %arg3[%c3, %c0_11, %c0_12] : memref<9x4x8xf32, #tpu.memory_space<vmem>>, vector<1x4x8xf32>
    %25 = vector.shape_cast %24 : vector<1x4x8xf32> to vector<4x8xf32>
    %cst_13 = arith.constant dense<0.000000e+00> : vector<240x8xf32>
    %26 = tpu.matmul %7, %25, %cst_13 {dimension_numbers = #tpu.dot_dimension_numbers<[1], [0], [0], [1], [0, 0, 1, 1], [], []>} : vector<240x4xf32>, vector<4x8xf32>, vector<240x8xf32> -> vector<240x8xf32>
    %27 = arith.addf %23, %26 : vector<240x8xf32>
    %c4 = arith.constant 4 : index
    %c0_14 = arith.constant 0 : index
    %c0_15 = arith.constant 0 : index
    %28 = vector.load %arg3[%c4, %c0_14, %c0_15] : memref<9x4x8xf32, #tpu.memory_space<vmem>>, vector<1x4x8xf32>
    %29 = vector.shape_cast %28 : vector<1x4x8xf32> to vector<4x8xf32>
    %cst_16 = arith.constant dense<0.000000e+00> : vector<240x8xf32>
    %30 = tpu.matmul %8, %29, %cst_16 {dimension_numbers = #tpu.dot_dimension_numbers<[1], [0], [0], [1], [0, 0, 1, 1], [], []>} : vector<240x4xf32>, vector<4x8xf32>, vector<240x8xf32> -> vector<240x8xf32>
    %31 = arith.addf %27, %30 : vector<240x8xf32>
    %c5 = arith.constant 5 : index
    %c0_17 = arith.constant 0 : index
    %c0_18 = arith.constant 0 : index
    %32 = vector.load %arg3[%c5, %c0_17, %c0_18] : memref<9x4x8xf32, #tpu.memory_space<vmem>>, vector<1x4x8xf32>
    %33 = vector.shape_cast %32 : vector<1x4x8xf32> to vector<4x8xf32>
    %cst_19 = arith.constant dense<0.000000e+00> : vector<240x8xf32>
    %34 = tpu.matmul %9, %33, %cst_19 {dimension_numbers = #tpu.dot_dimension_numbers<[1], [0], [0], [1], [0, 0, 1, 1], [], []>} : vector<240x4xf32>, vector<4x8xf32>, vector<240x8xf32> -> vector<240x8xf32>
    %35 = arith.addf %31, %34 : vector<240x8xf32>
    %c6 = arith.constant 6 : index
    %c0_20 = arith.constant 0 : index
    %c0_21 = arith.constant 0 : index
    %36 = vector.load %arg3[%c6, %c0_20, %c0_21] : memref<9x4x8xf32, #tpu.memory_space<vmem>>, vector<1x4x8xf32>
    %37 = vector.shape_cast %36 : vector<1x4x8xf32> to vector<4x8xf32>
    %cst_22 = arith.constant dense<0.000000e+00> : vector<240x8xf32>
    %38 = tpu.matmul %10, %37, %cst_22 {dimension_numbers = #tpu.dot_dimension_numbers<[1], [0], [0], [1], [0, 0, 1, 1], [], []>} : vector<240x4xf32>, vector<4x8xf32>, vector<240x8xf32> -> vector<240x8xf32>
    %39 = arith.addf %35, %38 : vector<240x8xf32>
    %c7 = arith.constant 7 : index
    %c0_23 = arith.constant 0 : index
    %c0_24 = arith.constant 0 : index
    %40 = vector.load %arg3[%c7, %c0_23, %c0_24] : memref<9x4x8xf32, #tpu.memory_space<vmem>>, vector<1x4x8xf32>
    %41 = vector.shape_cast %40 : vector<1x4x8xf32> to vector<4x8xf32>
    %cst_25 = arith.constant dense<0.000000e+00> : vector<240x8xf32>
    %42 = tpu.matmul %11, %41, %cst_25 {dimension_numbers = #tpu.dot_dimension_numbers<[1], [0], [0], [1], [0, 0, 1, 1], [], []>} : vector<240x4xf32>, vector<4x8xf32>, vector<240x8xf32> -> vector<240x8xf32>
    %43 = arith.addf %39, %42 : vector<240x8xf32>
    %c8 = arith.constant 8 : index
    %c0_26 = arith.constant 0 : index
    %c0_27 = arith.constant 0 : index
    %44 = vector.load %arg3[%c8, %c0_26, %c0_27] : memref<9x4x8xf32, #tpu.memory_space<vmem>>, vector<1x4x8xf32>
    %45 = vector.shape_cast %44 : vector<1x4x8xf32> to vector<4x8xf32>
    %cst_28 = arith.constant dense<0.000000e+00> : vector<240x8xf32>
    %46 = tpu.matmul %12, %45, %cst_28 {dimension_numbers = #tpu.dot_dimension_numbers<[1], [0], [0], [1], [0, 0, 1, 1], [], []>} : vector<240x4xf32>, vector<4x8xf32>, vector<240x8xf32> -> vector<240x8xf32>
    %47 = arith.addf %43, %46 : vector<240x8xf32>
    %c0_29 = arith.constant 0 : index
    %c0_30 = arith.constant 0 : index
    %48 = vector.load %arg4[%c0_29, %c0_30] : memref<1x8xf32, #tpu.memory_space<vmem>>, vector<1x8xf32>
    %49 = vector.broadcast %48 : vector<1x8xf32> to vector<240x8xf32>
    %50 = arith.addf %47, %49 : vector<240x8xf32>
    %cst_31 = arith.constant 0.000000e+00 : f32
    %51 = vector.broadcast %cst_31 : f32 to vector<240x8xf32>
    %52 = arith.maximumf %50, %51 : vector<240x8xf32>
    %53 = vector.extract_strided_slice %52 {offsets = [1, 0], sizes = [239, 8], strides = [1, 1]} : vector<240x8xf32> to vector<239x8xf32>
    %54 = vector.extract_strided_slice %52 {offsets = [2, 0], sizes = [238, 8], strides = [1, 1]} : vector<240x8xf32> to vector<238x8xf32>
    %55 = vector.extract_strided_slice %52 {offsets = [0, 0], sizes = [192, 8], strides = [1, 1]} : vector<240x8xf32> to vector<192x8xf32>
    %56 = vector.extract_strided_slice %53 {offsets = [0, 0], sizes = [192, 8], strides = [1, 1]} : vector<239x8xf32> to vector<192x8xf32>
    %57 = vector.extract_strided_slice %54 {offsets = [0, 0], sizes = [192, 8], strides = [1, 1]} : vector<238x8xf32> to vector<192x8xf32>
    %58 = vector.extract_strided_slice %52 {offsets = [16, 0], sizes = [192, 8], strides = [1, 1]} : vector<240x8xf32> to vector<192x8xf32>
    %59 = vector.extract_strided_slice %53 {offsets = [16, 0], sizes = [192, 8], strides = [1, 1]} : vector<239x8xf32> to vector<192x8xf32>
    %60 = vector.extract_strided_slice %54 {offsets = [16, 0], sizes = [192, 8], strides = [1, 1]} : vector<238x8xf32> to vector<192x8xf32>
    %61 = vector.extract_strided_slice %52 {offsets = [32, 0], sizes = [192, 8], strides = [1, 1]} : vector<240x8xf32> to vector<192x8xf32>
    %62 = vector.extract_strided_slice %53 {offsets = [32, 0], sizes = [192, 8], strides = [1, 1]} : vector<239x8xf32> to vector<192x8xf32>
    %63 = vector.extract_strided_slice %54 {offsets = [32, 0], sizes = [192, 8], strides = [1, 1]} : vector<238x8xf32> to vector<192x8xf32>
    %c0_32 = arith.constant 0 : index
    %c0_33 = arith.constant 0 : index
    %c0_34 = arith.constant 0 : index
    %64 = vector.load %arg5[%c0_32, %c0_33, %c0_34] : memref<9x8x8xf32, #tpu.memory_space<vmem>>, vector<1x8x8xf32>
    %65 = vector.shape_cast %64 : vector<1x8x8xf32> to vector<8x8xf32>
    %cst_35 = arith.constant dense<0.000000e+00> : vector<192x8xf32>
    %66 = tpu.matmul %55, %65, %cst_35 {dimension_numbers = #tpu.dot_dimension_numbers<[1], [0], [0], [1], [0, 0, 1, 1], [], []>} : vector<192x8xf32>, vector<8x8xf32>, vector<192x8xf32> -> vector<192x8xf32>
    %c1_36 = arith.constant 1 : index
    %c0_37 = arith.constant 0 : index
    %c0_38 = arith.constant 0 : index
    %67 = vector.load %arg5[%c1_36, %c0_37, %c0_38] : memref<9x8x8xf32, #tpu.memory_space<vmem>>, vector<1x8x8xf32>
    %68 = vector.shape_cast %67 : vector<1x8x8xf32> to vector<8x8xf32>
    %cst_39 = arith.constant dense<0.000000e+00> : vector<192x8xf32>
    %69 = tpu.matmul %56, %68, %cst_39 {dimension_numbers = #tpu.dot_dimension_numbers<[1], [0], [0], [1], [0, 0, 1, 1], [], []>} : vector<192x8xf32>, vector<8x8xf32>, vector<192x8xf32> -> vector<192x8xf32>
    %70 = arith.addf %66, %69 : vector<192x8xf32>
    %c2_40 = arith.constant 2 : index
    %c0_41 = arith.constant 0 : index
    %c0_42 = arith.constant 0 : index
    %71 = vector.load %arg5[%c2_40, %c0_41, %c0_42] : memref<9x8x8xf32, #tpu.memory_space<vmem>>, vector<1x8x8xf32>
    %72 = vector.shape_cast %71 : vector<1x8x8xf32> to vector<8x8xf32>
    %cst_43 = arith.constant dense<0.000000e+00> : vector<192x8xf32>
    %73 = tpu.matmul %57, %72, %cst_43 {dimension_numbers = #tpu.dot_dimension_numbers<[1], [0], [0], [1], [0, 0, 1, 1], [], []>} : vector<192x8xf32>, vector<8x8xf32>, vector<192x8xf32> -> vector<192x8xf32>
    %74 = arith.addf %70, %73 : vector<192x8xf32>
    %c3_44 = arith.constant 3 : index
    %c0_45 = arith.constant 0 : index
    %c0_46 = arith.constant 0 : index
    %75 = vector.load %arg5[%c3_44, %c0_45, %c0_46] : memref<9x8x8xf32, #tpu.memory_space<vmem>>, vector<1x8x8xf32>
    %76 = vector.shape_cast %75 : vector<1x8x8xf32> to vector<8x8xf32>
    %cst_47 = arith.constant dense<0.000000e+00> : vector<192x8xf32>
    %77 = tpu.matmul %58, %76, %cst_47 {dimension_numbers = #tpu.dot_dimension_numbers<[1], [0], [0], [1], [0, 0, 1, 1], [], []>} : vector<192x8xf32>, vector<8x8xf32>, vector<192x8xf32> -> vector<192x8xf32>
    %78 = arith.addf %74, %77 : vector<192x8xf32>
    %c4_48 = arith.constant 4 : index
    %c0_49 = arith.constant 0 : index
    %c0_50 = arith.constant 0 : index
    %79 = vector.load %arg5[%c4_48, %c0_49, %c0_50] : memref<9x8x8xf32, #tpu.memory_space<vmem>>, vector<1x8x8xf32>
    %80 = vector.shape_cast %79 : vector<1x8x8xf32> to vector<8x8xf32>
    %cst_51 = arith.constant dense<0.000000e+00> : vector<192x8xf32>
    %81 = tpu.matmul %59, %80, %cst_51 {dimension_numbers = #tpu.dot_dimension_numbers<[1], [0], [0], [1], [0, 0, 1, 1], [], []>} : vector<192x8xf32>, vector<8x8xf32>, vector<192x8xf32> -> vector<192x8xf32>
    %82 = arith.addf %78, %81 : vector<192x8xf32>
    %c5_52 = arith.constant 5 : index
    %c0_53 = arith.constant 0 : index
    %c0_54 = arith.constant 0 : index
    %83 = vector.load %arg5[%c5_52, %c0_53, %c0_54] : memref<9x8x8xf32, #tpu.memory_space<vmem>>, vector<1x8x8xf32>
    %84 = vector.shape_cast %83 : vector<1x8x8xf32> to vector<8x8xf32>
    %cst_55 = arith.constant dense<0.000000e+00> : vector<192x8xf32>
    %85 = tpu.matmul %60, %84, %cst_55 {dimension_numbers = #tpu.dot_dimension_numbers<[1], [0], [0], [1], [0, 0, 1, 1], [], []>} : vector<192x8xf32>, vector<8x8xf32>, vector<192x8xf32> -> vector<192x8xf32>
    %86 = arith.addf %82, %85 : vector<192x8xf32>
    %c6_56 = arith.constant 6 : index
    %c0_57 = arith.constant 0 : index
    %c0_58 = arith.constant 0 : index
    %87 = vector.load %arg5[%c6_56, %c0_57, %c0_58] : memref<9x8x8xf32, #tpu.memory_space<vmem>>, vector<1x8x8xf32>
    %88 = vector.shape_cast %87 : vector<1x8x8xf32> to vector<8x8xf32>
    %cst_59 = arith.constant dense<0.000000e+00> : vector<192x8xf32>
    %89 = tpu.matmul %61, %88, %cst_59 {dimension_numbers = #tpu.dot_dimension_numbers<[1], [0], [0], [1], [0, 0, 1, 1], [], []>} : vector<192x8xf32>, vector<8x8xf32>, vector<192x8xf32> -> vector<192x8xf32>
    %90 = arith.addf %86, %89 : vector<192x8xf32>
    %c7_60 = arith.constant 7 : index
    %c0_61 = arith.constant 0 : index
    %c0_62 = arith.constant 0 : index
    %91 = vector.load %arg5[%c7_60, %c0_61, %c0_62] : memref<9x8x8xf32, #tpu.memory_space<vmem>>, vector<1x8x8xf32>
    %92 = vector.shape_cast %91 : vector<1x8x8xf32> to vector<8x8xf32>
    %cst_63 = arith.constant dense<0.000000e+00> : vector<192x8xf32>
    %93 = tpu.matmul %62, %92, %cst_63 {dimension_numbers = #tpu.dot_dimension_numbers<[1], [0], [0], [1], [0, 0, 1, 1], [], []>} : vector<192x8xf32>, vector<8x8xf32>, vector<192x8xf32> -> vector<192x8xf32>
    %94 = arith.addf %90, %93 : vector<192x8xf32>
    %c8_64 = arith.constant 8 : index
    %c0_65 = arith.constant 0 : index
    %c0_66 = arith.constant 0 : index
    %95 = vector.load %arg5[%c8_64, %c0_65, %c0_66] : memref<9x8x8xf32, #tpu.memory_space<vmem>>, vector<1x8x8xf32>
    %96 = vector.shape_cast %95 : vector<1x8x8xf32> to vector<8x8xf32>
    %cst_67 = arith.constant dense<0.000000e+00> : vector<192x8xf32>
    %97 = tpu.matmul %63, %96, %cst_67 {dimension_numbers = #tpu.dot_dimension_numbers<[1], [0], [0], [1], [0, 0, 1, 1], [], []>} : vector<192x8xf32>, vector<8x8xf32>, vector<192x8xf32> -> vector<192x8xf32>
    %98 = arith.addf %94, %97 : vector<192x8xf32>
    %c0_68 = arith.constant 0 : index
    %c0_69 = arith.constant 0 : index
    %99 = vector.load %arg6[%c0_68, %c0_69] : memref<1x8xf32, #tpu.memory_space<vmem>>, vector<1x8xf32>
    %100 = vector.broadcast %99 : vector<1x8xf32> to vector<192x8xf32>
    %101 = arith.addf %98, %100 : vector<192x8xf32>
    %cst_70 = arith.constant 0.000000e+00 : f32
    %102 = vector.broadcast %cst_70 : f32 to vector<192x8xf32>
    %103 = arith.maximumf %101, %102 : vector<192x8xf32>
    %c0_71 = arith.constant 0 : index
    %c0_72 = arith.constant 0 : index
    %104 = vector.load %arg7[%c0_71, %c0_72] : memref<192x8xf32, #tpu.memory_space<vmem>>, vector<192x8xf32>
    tpu.vector_store %arg7[%c0_71, %c0_72], %103 {strides = array<i32>} : memref<192x8xf32, #tpu.memory_space<vmem>>, vector<192x8xf32>,
    return
  }
  func.func @transform_0(%arg0: i32, %arg1: i32) -> (i32, i32, i32) {
    %c1_i32 = arith.constant 1 : i32
    %0 = arith.muli %arg0, %c1_i32 : i32
    %1 = arith.addi %0, %arg1 : i32
    %c0_i32 = arith.constant 0 : i32
    %c0_i32_0 = arith.constant 0 : i32
    %c0_i32_1 = arith.constant 0 : i32
    return %1, %c0_i32, %c0_i32_0 : i32, i32, i32
  }
  func.func @transform_1(%arg0: i32, %arg1: i32) -> (i32, i32, i32) {
    %c0_i32 = arith.constant 0 : i32
    %c0_i32_0 = arith.constant 0 : i32
    %c0_i32_1 = arith.constant 0 : i32
    %c0_i32_2 = arith.constant 0 : i32
    return %c0_i32, %c0_i32_0, %c0_i32_1 : i32, i32, i32
  }
  func.func @transform_2(%arg0: i32, %arg1: i32) -> (i32, i32) {
    %c0_i32 = arith.constant 0 : i32
    %c0_i32_0 = arith.constant 0 : i32
    %c0_i32_1 = arith.constant 0 : i32
    return %c0_i32, %c0_i32_0 : i32, i32
  }
  func.func @transform_3(%arg0: i32, %arg1: i32) -> (i32, i32, i32) {
    %c0_i32 = arith.constant 0 : i32
    %c0_i32_0 = arith.constant 0 : i32
    %c0_i32_1 = arith.constant 0 : i32
    %c0_i32_2 = arith.constant 0 : i32
    return %c0_i32, %c0_i32_0, %c0_i32_1 : i32, i32, i32
  }
  func.func @transform_4(%arg0: i32, %arg1: i32) -> (i32, i32) {
    %c0_i32 = arith.constant 0 : i32
    %c0_i32_0 = arith.constant 0 : i32
    %c0_i32_1 = arith.constant 0 : i32
    return %c0_i32, %c0_i32_0 : i32, i32
  }
  func.func @transform_5(%arg0: i32, %arg1: i32) -> (i32, i32) {
    %c1_i32 = arith.constant 1 : i32
    %0 = arith.muli %arg0, %c1_i32 : i32
    %1 = arith.addi %0, %arg1 : i32
    %c0_i32 = arith.constant 0 : i32
    %c0_i32_0 = arith.constant 0 : i32
    return %1, %c0_i32 : i32, i32
  }
}

</mosaic_0001>

<bundles_post_ra>
// kernel: unet_conv2_pallas.1
= control target key start
LH: loop header
LB: loop body
LE: loop exit
PB: predicated region body
PF: predicated region fallthrough
CT: control target
= control target key end

     0   :  { %s3979_s18 = smov 0   ;;  %s3981_s19 = smov 0   ;;  %s6638_s0 = inlined_call_operand.vmem [shape: f32[2,288,4], index: 0, kind: input, shape index: {}]   ;;  %s6639_s1 = inlined_call_operand.vmem [shape: f32[9,4,8], index: 1, kind: input, shape index: {}]   ;;  %s6640_s2 = inlined_call_operand.vmem [shape: f32[1,8], index: 2, kind: input, shape index: {}]   ;;  %s6641_s3 = inlined_call_operand.vmem [shape: f32[9,8,8], index: 3, kind: input, shape index: {}]   ;;  %s6642_s4 = inlined_call_operand.vmem [shape: f32[1,8], index: 4, kind: input, shape index: {}]   ;;  %s6643_s5 = inlined_call_operand.vmem [shape: f32[384,8], index: 5, kind: output, shape index: {}]  }
   0x1   :  { %s3983_s20 = smov 0  }
   0x2 LB: > { %s27_s21 = sadd.s32 1, %s3943_s19  ;;  %p3375_p0 = scmp.ge.s32.totalorder %s3947_s20, 1  ;;  %s3947_s20 = sphi %s3983_s20, %s15_s20   ;;  %s3943_s19 = sphi %s3981_s19, %s7205_s19   ;;  %s3939_s18 = sphi %s3979_s18, %s7204_s18  }
   0x3   : > { %p29_p1 = scmp.ge.s32.totalorder %s27_s21, 2  ;;  %p205_p2 = scmp.lt.s32.totalorder %s3947_s20, 3 }
   0x5   : > { %s7207_s21 = smov (%p29_p1, %s27_s21), 0  ;;  %p206_p3 = pnand %p3375_p0, %p205_p2 }
   0x7   : > { %209 = sbr.rel (%p206_p3) target bundleno = 1413 (0x585), region = 40 }
   0xc   : > { %v3378_v0 = vld [vmem:[%s6639_s1 + $0x4] sm:$0xf]  ;;  %vm442_vm0 = vcmask 1043456   ;;  %v285_v1 = vld [vmem:[%s6639_s1] sm:$0xf]  ;;  %p236_p4 = scmp.lt.s32.totalorder %s3939_s18, 1 }
   0xd   : > { %3379 = vmatpush.msk.msra.mxu0 %vm442_vm0, %v3378_v0  ;;  %3891 = vmatpush.msk.msra.mxu3 %vm442_vm0, %v3378_v0  ;;  %v3441_v2 = vld [vmem:[%s6639_s1 + $0x8] sm:$0xf]  ;;  %vm381_vm1 = vcmask 31744   ;;  %vm319_vm2 = vcmask 1046528   ;;  %vm723_vm3 = vcmask 1045504   ;;  %vm2006_vm4 = vcmask 64512  }
   0xe   : > { %3410 = vmatpush.msk.msra.mxu1 %vm442_vm0, %v285_v1  ;;  %s237_s28 = scalar_select %p236_p4, %s3939_s18, 1  ;;  %3893 = vmatpush.msk.msra.mxu2 %vm442_vm0, %v3441_v2  ;;  %v3473_v61 = vld [vmem:[%s6639_s1 + $0xc] sm:$0xf] }
   0xf   : > { %3442 = vmatpush.msk.msrb.mxu0 %vm442_vm0, %v3441_v2  ;;  %3892 = vmatpush.msk.msrb.mxu3 %vm442_vm0, %v285_v1  ;;  %s243_s25 = smul.u32 24, %s3939_s18 }
  0x10   : > { %s3894_s29 = smul.u32 288, %s237_s28 }
  0x11   : > { %p244_p5 = scmp.lt.s32.totalorder %s243_s25, 47 }
  0x12   : > { %s4019_s7 = scalar_lea.vmem %s6638_s0, %s3894_s29 }
  0x13   : > { %v4022_v3 = vld [vmem:[%s4019_s7] sm:$0xff]  ;;  %v4025_v4 = vld [vmem:[%s4019_s7 + $0x8] sm:$0xff]  ;;  %v4040_v11 = vld [vmem:[%s4019_s7 + $0x10] sm:$0xff]  ;;  %s7209_s25 = smov (!%p244_p5, %s243_s25), 47 }
  0x14   : > { %v4028_v5 = vld [vmem:[%s4019_s7 + $0xe0] sm:$0xff]  ;;  %v320_v6 = vrot.slane %v4022_v3, 1  ;;  %v321_v7 = vrot.slane %v4025_v4, 1  ;;  %v4033_v8 = vld [vmem:[%s4019_s7 + $0xe8] sm:$0xff]  ;;  %3411 = vmatmul.msk.f32.vlgmr.msra.gmra.mxu1 %vm381_vm1, %v4022_v3  ;;  %v4044_v13 = vld [vmem:[%s4019_s7 + $0xf0] sm:$0xff]  ;;  %v323_v15 = vrot.slane %v4040_v11, 1 }
  0x15   : > { %v6646_v9 = vrot.slane %v4028_v5, 1  ;;  %v377_v10 = vrot.slane %v4033_v8, 1  ;;  %v6644_v16 = vrot.slane %v4044_v13, 1  ;;  %v4065_v19 = vld [vmem:[%s4019_s7 + $0x18] sm:$0xff]  ;;  %v4077_v22 = vld [vmem:[%s4019_s7 + $0xa0] sm:$0xff]  ;;  %v4093_v26 = vld [vmem:[%s4019_s7 + $0xa8] sm:$0xff] }
  0x16   : > { %v322_v12 = vsel %vm319_vm2, %v320_v6, %v321_v7  ;;  %v324_v17 = vsel %vm319_vm2, %v321_v7, %v323_v15  ;;  %v325_v20 = vrot.slane %v4065_v19, 1  ;;  %v4080_v23 = vld [vmem:[%s4019_s7 + $0x20] sm:$0xff]  ;;  %v4096_v27 = vld [vmem:[%s4019_s7 + $0x28] sm:$0xff]  ;;  %v4099_v28 = vld [vmem:[%s4019_s7 + $0x50] sm:$0xff]  ;;  %s3377_s27 = sshll.u32 %s7209_s25, 3 }
  0x17   : > { %3380 = vmatmul.msk.f32.vlgmr.msra.gmra.mxu0 %vm381_vm1, %v322_v12  ;;  %v4050_v14 = vsel %vm319_vm2, %v6646_v9, %v377_v10  ;;  %v4062_v18 = vsel %vm319_vm2, %v377_v10, %v6644_v16  ;;  %v327_v24 = vrot.slane %v4080_v23, 1  ;;  %v4102_v29 = vld [vmem:[%s4019_s7 + $0x58] sm:$0xff]  ;;  %v6645_v30 = vrot.slane %v4099_v28, 2  ;;  %v4124_v35 = vld [vmem:[%s4019_s7 + $0xb0] sm:$0xff]  ;;  %v4130_v37 = vld [vmem:[%s4019_s7 + $0x60] sm:$0xff]  ;;  %s6478_s30 = scalar_lea.vmem %s6643_s5, %s3377_s27 }
  0x18   : > { %6750 = vst [vmem:[#allocation2_spill] sm:$0xff] %v4050_v14  ;;  %3408 = vmatmul.msk.f32.vlgmr.msra.gmra.mxu3 %vm381_vm1, %v4050_v14  ;;  %v4072_v21 = vsel %vm319_vm2, %v323_v15, %v325_v20  ;;  %v745_v31 = vrot.slane %v4102_v29, 2  ;;  %v329_v32 = vrot.slane %v4096_v27, 1  ;;  %v4127_v36 = vld [vmem:[%s4019_s7 + $0x30] sm:$0xff]  ;;  %v747_v38 = vrot.slane %v4130_v37, 2  ;;  %v4149_v42 = vld [vmem:[%s4019_s7 + $0xb8] sm:$0xff] }
  0x19   : > { %6751 = vst [vmem:[#allocation3_spill] sm:$0xff] %v4062_v18  ;;  %v4088_v25 = vsel %vm319_vm2, %v325_v20, %v327_v24  ;;  %v331_v39 = vrot.slane %v4127_v36, 1  ;;  %v4152_v43 = vld [vmem:[%s4019_s7 + $0x38] sm:$0xff]  ;;  %v4155_v44 = vld [vmem:[%s4019_s7 + $0x68] sm:$0xff]  ;;  %v4174_v49 = vld [vmem:[%s4019_s7 + $0xc0] sm:$0xff]  ;;  %3474 = vmatpush.msk.msra.mxu3 %vm442_vm0, %v3473_v61  ;;  %v339_v6 = vrot.slane %v4099_v28, 1 }
  0x1a   : > { %v4114_v33 = vsel %vm723_vm3, %v6645_v30, %v745_v31  ;;  %v4119_v34 = vsel %vm319_vm2, %v327_v24, %v329_v32  ;;  %v4139_v40 = vsel %vm723_vm3, %v745_v31, %v747_v38  ;;  %v749_v45 = vrot.slane %v4155_v44, 2  ;;  %v4177_v50 = vld [vmem:[%s4019_s7 + $0x40] sm:$0xff]  ;;  %v4180_v51 = vld [vmem:[%s4019_s7 + $0x70] sm:$0xff]  ;;  %v4199_v56 = vld [vmem:[%s4019_s7 + $0xc8] sm:$0xff] }
  0x1b   : > { %3453 = vmatmul.msk.f32.vlgmr.msra.gmra.mxu2 %vm381_vm1, %v4114_v33  ;;  %v4144_v41 = vsel %vm319_vm2, %v329_v32, %v331_v39  ;;  %v333_v46 = vrot.slane %v4152_v43, 1  ;;  %v751_v52 = vrot.slane %v4180_v51, 2  ;;  %v335_v53 = vrot.slane %v4177_v50, 1  ;;  %v4202_v57 = vld [vmem:[%s4019_s7 + $0x48] sm:$0xff]  ;;  %v4205_v58 = vld [vmem:[%s4019_s7 + $0x78] sm:$0xff]  ;;  %v4228_v0 = vld [vmem:[%s4019_s7 + $0xd0] sm:$0xff] }
  0x1c   : > { %3412 = vmatmul.msk.f32.gmra.mxu1 %vm381_vm1, %v4025_v4  ;;  %v4164_v47 = vsel %vm723_vm3, %v747_v38, %v749_v45  ;;  %v753_v59 = vrot.slane %v4205_v58, 2  ;;  %v337_v60 = vrot.slane %v4202_v57, 1  ;;  %v4231_v1 = vld [vmem:[%s4019_s7 + $0x80] sm:$0xff]  ;;  %v4250_v12 = vld [vmem:[%s4019_s7 + $0xd8] sm:$0xff]  ;;  %v4253_v15 = vld [vmem:[%s4019_s7 + $0x88] sm:$0xff]  ;;  %v341_v20 = vrot.slane %v4102_v29, 1 }
  0x1d   : > { %v4169_v48 = vsel %vm319_vm2, %v331_v39, %v333_v46  ;;  %v4189_v54 = vsel %vm723_vm3, %v749_v45, %v751_v52  ;;  %v4194_v55 = vsel %vm319_vm2, %v333_v46, %v335_v53  ;;  %v755_v2 = vrot.slane %v4231_v1, 2  ;;  %v4272_v32 = vld [vmem:[%s4019_s7 + $0x90] sm:$0xff] }
  0x1e   : > { %v4217_v62 = vsel %vm723_vm3, %v751_v52, %v753_v59  ;;  %v4223_v63 = vsel %vm319_vm2, %v335_v53, %v337_v60  ;;  %v4245_v10 = vsel %vm319_vm2, %v337_v60, %v339_v6  ;;  %v4267_v31 = vsel %vm319_vm2, %v339_v6, %v341_v20  ;;  %v4291_v52 = vld [vmem:[%s4019_s7 + $0x98] sm:$0xff] }
  0x1f   : > { %3381 = vmatmul.msk.f32.gmra.mxu0 %vm381_vm1, %v324_v17  ;;  %v4240_v7 = vsel %vm723_vm3, %v753_v59, %v755_v2  ;;  %v757_v17 = vrot.slane %v4253_v15, 2  ;;  %v759_v38 = vrot.slane %v4272_v32, 2  ;;  %v343_v39 = vrot.slane %v4130_v37, 1 }
  0x20   : > { %3409 = vmatmul.msk.f32.gmra.mxu3 %vm381_vm1, %v4062_v18  ;;  %v761_v53 = vrot.slane %v4291_v52, 2  ;;  %v345_v59 = vrot.slane %v4155_v44, 1  ;;  %v347_v6 = vrot.slane %v4180_v51, 1  ;;  %v767_v16 = vrot.slane %v4124_v35, 2 }
  0x21   : > { %v4262_v24 = vsel %vm723_vm3, %v755_v2, %v757_v17  ;;  %v4281_v45 = vsel %vm723_vm3, %v757_v17, %v759_v38  ;;  %v4286_v46 = vsel %vm319_vm2, %v341_v20, %v343_v39  ;;  %v763_v2 = vrot.slane %v4077_v22, 2 }
  0x22   : > { %v4300_v60 = vsel %vm723_vm3, %v759_v38, %v761_v53  ;;  %v4305_v61 = vsel %vm319_vm2, %v343_v39, %v345_v59  ;;  %v4321_v20 = vsel %vm319_vm2, %v345_v59, %v347_v6  ;;  %v765_v38 = vrot.slane %v4093_v26, 2 }
  0x23   : > { %3454 = vmatmul.msk.f32.gmra.mxu2 %vm381_vm1, %v4139_v40  ;;  %v4316_v17 = vsel %vm723_vm3, %v761_v53, %v763_v2  ;;  %v349_v39 = vrot.slane %v4205_v58, 1  ;;  %v769_v9 = vrot.slane %v4149_v42, 2 }
  0x24   : > { %3413 = vmatmul.msk.f32.gmra.mxu1 %vm381_vm1, %v4040_v11  ;;  %v4332_v53 = vsel %vm723_vm3, %v763_v2, %v765_v38  ;;  %v351_v2 = vrot.slane %v4231_v1, 1  ;;  %v4348_v30 = vsel %vm723_vm3, %v765_v38, %v767_v16  ;;  %v353_v38 = vrot.slane %v4253_v15, 1 }
  0x25   : > { %6752 = vst [vmem:[#allocation4_spill] sm:$0xff] %v4332_v53  ;;  %v4337_v59 = vsel %vm319_vm2, %v347_v6, %v349_v39  ;;  %v4364_v18 = vsel %vm723_vm3, %v767_v16, %v769_v9  ;;  %v355_v16 = vrot.slane %v4272_v32, 1 }
  0x26   : > { %6753 = vst [vmem:[#allocation5_spill] sm:$0xff] %v4348_v30  ;;  %v4353_v6 = vsel %vm319_vm2, %v349_v39, %v351_v2  ;;  %v4371_v14 = vsel %vm319_vm2, %v351_v2, %v353_v38 }
  0x27   : > { %3382 = vmatmul.msk.f32.gmra.mxu0 %vm381_vm1, %v4072_v21  ;;  %6754 = vst [vmem:[#allocation6_spill] sm:$0xff] %v4353_v6 }
  0x28   : > { %3431 = vmatmul.msk.f32.vlgmr.msrb.gmra.mxu3 %vm381_vm1, %v4077_v22  ;;  %6755 = vst [vmem:[#allocation7_spill] sm:$0xff] %v4364_v18 }
  0x29   : > { %6757 = vst [vmem:[#allocation9_spill] sm:$0xff] %v4371_v14 }
  0x2b   : > { %3455 = vmatmul.msk.f32.gmra.mxu2 %vm381_vm1, %v4164_v47 }
  0x2c   : > { %3414 = vmatmul.msk.f32.gmra.mxu1 %vm381_vm1, %v4065_v19 }
  0x2f   : > { %3383 = vmatmul.msk.f32.gmra.mxu0 %vm381_vm1, %v4088_v25 }
  0x30   : > { %3432 = vmatmul.msk.f32.gmra.mxu3 %vm381_vm1, %v4093_v26 }
  0x33   : > { %3456 = vmatmul.msk.f32.gmra.mxu2 %vm381_vm1, %v4189_v54 }
  0x34   : > { %3415 = vmatmul.msk.f32.gmra.mxu1 %vm381_vm1, %v4080_v23 }
  0x37   : > { %3384 = vmatmul.msk.f32.gmra.mxu0 %vm381_vm1, %v4119_v34 }
  0x38   : > { %3433 = vmatmul.msk.f32.gmra.mxu3 %vm381_vm1, %v4124_v35 }
  0x3b   : > { %3457 = vmatmul.msk.f32.gmra.mxu2 %vm381_vm1, %v4217_v62 }
  0x3c   : > { %3416 = vmatmul.msk.f32.gmra.mxu1 %vm381_vm1, %v4096_v27 }
  0x3f   : > { %3385 = vmatmul.msk.f32.gmra.mxu0 %vm381_vm1, %v4144_v41 }
  0x40   : > { %3434 = vmatmul.msk.f32.gmra.mxu3 %vm381_vm1, %v4149_v42 }
  0x43   : > { %3458 = vmatmul.msk.f32.gmra.mxu2 %vm381_vm1, %v4240_v7 }
  0x44   : > { %3417 = vmatmul.msk.f32.gmra.mxu1 %vm381_vm1, %v4127_v36 }
  0x47   : > { %3386 = vmatmul.msk.f32.gmra.mxu0 %vm381_vm1, %v4169_v48 }
  0x48   : > { %3435 = vmatmul.msk.f32.gmra.mxu3 %vm381_vm1, %v4174_v49 }
  0x4b   : > { %3459 = vmatmul.msk.f32.gmra.mxu2 %vm381_vm1, %v4262_v24 }
  0x4c   : > { %3418 = vmatmul.msk.f32.gmra.mxu1 %vm381_vm1, %v4152_v43 }
  0x4f   : > { %3387 = vmatmul.msk.f32.gmra.mxu0 %vm381_vm1, %v4194_v55 }
  0x50   : > { %3436 = vmatmul.msk.f32.gmra.mxu3 %vm381_vm1, %v4199_v56 }
  0x53   : > { %3460 = vmatmul.msk.f32.gmra.mxu2 %vm381_vm1, %v4281_v45 }
  0x54   : > { %3419 = vmatmul.msk.f32.gmra.mxu1 %vm381_vm1, %v4177_v50 }
  0x57   : > { %3388 = vmatmul.msk.f32.gmra.mxu0 %vm381_vm1, %v4223_v63 }
  0x58   : > { %3437 = vmatmul.msk.f32.gmra.mxu3 %vm381_vm1, %v4228_v0 }
  0x5b   : > { %3461 = vmatmul.msk.f32.gmra.mxu2 %vm381_vm1, %v4300_v60 }
  0x5c   : > { %3420 = vmatmul.msk.f32.gmra.mxu1 %vm381_vm1, %v4202_v57 }
  0x5f   : > { %3389 = vmatmul.msk.f32.gmra.mxu0 %vm381_vm1, %v4245_v10 }
  0x60   : > { %3438 = vmatmul.msk.f32.gmra.mxu3 %vm381_vm1, %v4250_v12 }
  0x63   : > { %3462 = vmatmul.msk.f32.gmra.mxu2 %vm381_vm1, %v4316_v17 }
  0x64   : > { %3421 = vmatmul.msk.f32.gmra.mxu1 %vm381_vm1, %v4099_v28 }
  0x67   : > { %3390 = vmatmul.msk.f32.gmra.mxu0 %vm381_vm1, %v4267_v31 }
  0x68   : > { %3439 = vmatmul.msk.f32.gmra.mxu3 %vm381_vm1, %v4028_v5 }
  0x6b   : > { %3463 = vmatmul.msk.f32.gmra.mxu2 %vm381_vm1, %v4332_v53 }
  0x6c   : > { %3422 = vmatmul.msk.f32.gmra.mxu1 %vm381_vm1, %v4102_v29 }
  0x6f   : > { %3391 = vmatmul.msk.f32.gmra.mxu0 %vm381_vm1, %v4286_v46 }
  0x70   : > { %3440 = vmatmul.msk.f32.gmra.mxu3 %vm381_vm1, %v4033_v8 }
  0x73   : > { %3464 = vmatmul.msk.f32.gmra.mxu2 %vm381_vm1, %v4348_v30  ;;  %v771_v30 = vrot.slane %v4174_v49, 2 }
  0x74   : > { %3423 = vmatmul.msk.f32.gmra.mxu1 %vm381_vm1, %v4130_v37 }
  0x77   : > { %3392 = vmatmul.msk.f32.gmra.mxu0 %vm381_vm1, %v4305_v61 }
  0x78   : > { %3475 = vmatmul.msk.f32.vlgmr.msra.gmra.mxu3 %vm381_vm1, %v4040_v11 }
  0x7b   : > { %3465 = vmatmul.msk.f32.gmra.mxu2 %vm381_vm1, %v4364_v18  ;;  %v4382_v18 = vsel %vm723_vm3, %v769_v9, %v771_v30  ;;  %v357_v9 = vrot.slane %v4291_v52, 1 }
  0x7c   : > { %3424 = vmatmul.msk.f32.gmra.mxu1 %vm381_vm1, %v4155_v44  ;;  %6758 = vst [vmem:[#allocation10_spill] sm:$0xff] %v4382_v18 }
  0x7f   : > { %3393 = vmatmul.msk.f32.gmra.mxu0 %vm381_vm1, %v4321_v20 }
  0x80   : > { %3476 = vmatmul.msk.f32.gmra.mxu3 %vm381_vm1, %v4065_v19 }
  0x83   : > { %3466 = vmatmul.msk.f32.gmra.mxu2 %vm381_vm1, %v4382_v18  ;;  %v4409_v18 = vsel %vm319_vm2, %v355_v16, %v357_v9 }
  0x84   : > { %3425 = vmatmul.msk.f32.gmra.mxu1 %vm381_vm1, %v4180_v51  ;;  %6764 = vst [vmem:[#allocation16_spill] sm:$0xff] %v4409_v18 }
  0x87   : > { %3394 = vmatmul.msk.f32.gmra.mxu0 %vm381_vm1, %v4337_v59 }
  0x88   : > { %3477 = vmatmul.msk.f32.gmra.mxu3 %vm381_vm1, %v4080_v23 }
  0x8c   : > { %3426 = vmatmul.msk.f32.gmra.mxu1 %vm381_vm1, %v4205_v58 }
  0x8f   : > { %3395 = vmatmul.msk.f32.gmra.mxu0 %vm381_vm1, %v4353_v6  ;;  %v4391_v6 = vsel %vm319_vm2, %v353_v38, %v355_v16 }
  0x90   : > { %3478 = vmatmul.msk.f32.gmra.mxu3 %vm381_vm1, %v4096_v27  ;;  %6761 = vst [vmem:[#allocation13_spill] sm:$0xff] %v4391_v6 }
  0x94   : > { %v4368_v39 = vpop.f32.mrf.mxu0  ;;  %3427 = vmatmul.msk.f32.gmra.mxu1 %vm381_vm1, %v4231_v1 }
  0x95   : > { %6756 = vst [vmem:[#allocation8_spill] sm:$0xff] %v4368_v39 }
  0x97   : > { %3396 = vmatmul.msk.f32.gmra.mxu0 %vm381_vm1, %v4371_v14  ;;  %v773_v14 = vrot.slane %v4199_v56, 2 }
  0x98   : > { %3479 = vmatmul.msk.f32.gmra.mxu3 %vm381_vm1, %v4127_v36 }
  0x9b   : > { %v4386_v2 = vpop.f32.mrf.mxu3 }
  0x9c   : > { %6759 = vst [vmem:[#allocation11_spill] sm:$0xff] %v4386_v2  ;;  %v4388_v39 = vpop.f32.mrf.mxu0  ;;  %3428 = vmatmul.msk.f32.gmra.mxu1 %vm381_vm1, %v4253_v15  ;;  %v4402_v2 = vsel %vm723_vm3, %v771_v30, %v773_v14  ;;  %v359_v30 = vrot.slane %v4077_v22, 1 }
  0x9d   : > { %6760 = vst [vmem:[#allocation12_spill] sm:$0xff] %v4388_v39  ;;  %3467 = vmatmul.msk.f32.gmra.mxu2 %vm381_vm1, %v4402_v2 }
  0x9e   : > { %6762 = vst [vmem:[#allocation14_spill] sm:$0xff] %v4402_v2  ;;  %v4429_v2 = vsel %vm319_vm2, %v357_v9, %v359_v30 }
  0x9f   : > { %3397 = vmatmul.msk.f32.gmra.mxu0 %vm381_vm1, %v4391_v6  ;;  %v775_v6 = vrot.slane %v4228_v0, 2  ;;  %6768 = vst [vmem:[#allocation20_spill] sm:$0xff] %v4429_v2 }
  0xa0   : > { %3480 = vmatmul.msk.f32.gmra.mxu3 %vm381_vm1, %v4152_v43 }
  0xa3   : > { %v550_v38 = vpop.f32.mrf.mxu3 }
  0xa4   : > { %v4406_v39 = vpop.f32.mrf.mxu0  ;;  %3429 = vmatmul.msk.f32.gmra.mxu1 %vm381_vm1, %v4272_v32  ;;  %v4420_v38 = vsel %vm723_vm3, %v773_v14, %v775_v6  ;;  %v361_v14 = vrot.slane %v4093_v26, 1 }
  0xa5   : > { %6763 = vst [vmem:[#allocation15_spill] sm:$0xff] %v4406_v39  ;;  %3468 = vmatmul.msk.f32.gmra.mxu2 %vm381_vm1, %v4420_v38 }
  0xa6   : > { %6765 = vst [vmem:[#allocation17_spill] sm:$0xff] %v4420_v38  ;;  %v4449_v38 = vsel %vm319_vm2, %v359_v30, %v361_v14 }
  0xa7   : > { %3398 = vmatmul.msk.f32.gmra.mxu0 %vm381_vm1, %v4409_v18  ;;  %v777_v18 = vrot.slane %v4250_v12, 2  ;;  %6772 = vst [vmem:[#allocation24_spill] sm:$0xff] %v4449_v38 }
  0xa8   : > { %3481 = vmatmul.msk.f32.gmra.mxu3 %vm381_vm1, %v4177_v50 }
  0xab   : > { %v4424_v16 = vpop.f32.mrf.mxu3 }
  0xac   : > { %6766 = vst [vmem:[#allocation18_spill] sm:$0xff] %v4424_v16  ;;  %v4426_v39 = vpop.f32.mrf.mxu0  ;;  %3430 = vmatmul.msk.f32.gmra.mxu1 %vm381_vm1, %v4291_v52  ;;  %v4440_v16 = vsel %vm723_vm3, %v775_v6, %v777_v18  ;;  %v363_v6 = vrot.slane %v4124_v35, 1 }
  0xad   : > { %6767 = vst [vmem:[#allocation19_spill] sm:$0xff] %v4426_v39  ;;  %3469 = vmatmul.msk.f32.gmra.mxu2 %vm381_vm1, %v4440_v16 }
  0xae   : > { %6769 = vst [vmem:[#allocation21_spill] sm:$0xff] %v4440_v16  ;;  %v6679_v16 = vrot.slane %v4033_v8, 2 }
  0xaf   : > { %3399 = vmatmul.msk.f32.gmra.mxu0 %vm381_vm1, %v4429_v2  ;;  %v779_v2 = vrot.slane %v4028_v5, 2 }
  0xb0   : > { %3482 = vmatmul.msk.f32.gmra.mxu3 %vm381_vm1, %v4202_v57 }
  0xb1   : > { %v4458_v53 = vsel %vm723_vm3, %v777_v18, %v779_v2  ;;  %v365_v18 = vrot.slane %v4149_v42, 1 }
  0xb2   : > { %6773 = vst [vmem:[#allocation25_spill] sm:$0xff] %v4458_v53 }
  0xb3   : > { %v4444_v9 = vpop.f32.mrf.mxu3 }
  0xb4   : > { %6770 = vst [vmem:[#allocation22_spill] sm:$0xff] %v4444_v9  ;;  %v4446_v39 = vpop.f32.mrf.mxu0 }
  0xb5   : > { %6771 = vst [vmem:[#allocation23_spill] sm:$0xff] %v4446_v39  ;;  %3470 = vmatmul.msk.f32.gmra.mxu2 %vm381_vm1, %v4458_v53  ;;  %v4467_v39 = vsel %vm319_vm2, %v361_v14, %v363_v6  ;;  %v4478_v53 = vsel %vm723_vm3, %v779_v2, %v6679_v16 }
  0xb6   : > { %6776 = vst [vmem:[#allocation28_spill] sm:$0xff] %v4467_v39 }
  0xb7   : > { %3400 = vmatmul.msk.f32.gmra.mxu0 %vm381_vm1, %v4449_v38  ;;  %6777 = vst [vmem:[#allocation29_spill] sm:$0xff] %v4478_v53 }
  0xb8   : > { %3483 = vmatmul.msk.f32.gmra.mxu3 %vm381_vm1, %v4099_v28 }
  0xbb   : > { %v4462_v9 = vpop.f32.mrf.mxu3 }
  0xbc   : > { %6774 = vst [vmem:[#allocation26_spill] sm:$0xff] %v4462_v9  ;;  %v4464_v30 = vpop.f32.mrf.mxu0 }
  0xbd   : > { %6775 = vst [vmem:[#allocation27_spill] sm:$0xff] %v4464_v30  ;;  %3471 = vmatmul.msk.f32.gmra.mxu2 %vm381_vm1, %v4478_v53  ;;  %v4487_v30 = vsel %vm319_vm2, %v363_v6, %v365_v18  ;;  %v369_v6 = vrot.slane %v4199_v56, 1 }
  0xbe   : > { %6780 = vst [vmem:[#allocation32_spill] sm:$0xff] %v4487_v30 }
  0xbf   : > { %3401 = vmatmul.msk.f32.gmra.mxu0 %vm381_vm1, %v4467_v39  ;;  %v367_v39 = vrot.slane %v4174_v49, 1 }
  0xc0   : > { %3484 = vmatmul.msk.f32.gmra.mxu3 %vm381_vm1, %v4102_v29 }
  0xc1   : > { %v4499_v53 = vsel %vm319_vm2, %v365_v18, %v367_v39  ;;  %v371_v18 = vrot.slane %v4228_v0, 1 }
  0xc2   : > { %6783 = vst [vmem:[#allocation35_spill] sm:$0xff] %v4499_v53 }
  0xc3   : > { %v4482_v14 = vpop.f32.mrf.mxu3 }
  0xc4   : > { %6778 = vst [vmem:[#allocation30_spill] sm:$0xff] %v4482_v14  ;;  %v4484_v9 = vpop.f32.mrf.mxu0 }
  0xc5   : > { %6779 = vst [vmem:[#allocation31_spill] sm:$0xff] %v4484_v9 }
  0xc7   : > { %3402 = vmatmul.msk.f32.gmra.mxu0 %vm381_vm1, %v4487_v30  ;;  %v4511_v30 = vsel %vm319_vm2, %v367_v39, %v369_v6  ;;  %v4527_v39 = vsel %vm319_vm2, %v369_v6, %v371_v18 }
  0xc8   : > { %3485 = vmatmul.msk.f32.gmra.mxu3 %vm381_vm1, %v4130_v37  ;;  %6786 = vst [vmem:[#allocation38_spill] sm:$0xff] %v4511_v30 }
  0xc9   : > { %6789 = vst [vmem:[#allocation41_spill] sm:$0xff] %v4527_v39 }
  0xcb   : > { %v4494_v2 = vpop.f32.mrf.mxu3 }
  0xcc   : > { %6781 = vst [vmem:[#allocation33_spill] sm:$0xff] %v4494_v2  ;;  %v4496_v16 = vpop.f32.mrf.mxu0  ;;  %v3505_v2 = vld [vmem:[%s6639_s1 + $0x10] sm:$0xf] }
  0xcd   : > { %6782 = vst [vmem:[#allocation34_spill] sm:$0xff] %v4496_v16  ;;  %3506 = vmatpush.msk.msra.mxu0 %vm442_vm0, %v3505_v2  ;;  %v373_v16 = vrot.slane %v4250_v12, 1 }
  0xcf   : > { %3403 = vmatmul.msk.f32.gmra.mxu0 %vm381_vm1, %v4499_v53  ;;  %v4539_v2 = vsel %vm319_vm2, %v371_v18, %v373_v16  ;;  %v724_v18 = vrot.slane %v4022_v3, 2 }
  0xd0   : > { %3486 = vmatmul.msk.f32.gmra.mxu3 %vm381_vm1, %v4155_v44  ;;  %6792 = vst [vmem:[#allocation44_spill] sm:$0xff] %v4539_v2 }
  0xd3   : > { %v4506_v14 = vpop.f32.mrf.mxu3 }
  0xd4   : > { %6784 = vst [vmem:[#allocation36_spill] sm:$0xff] %v4506_v14  ;;  %v4508_v9 = vpop.f32.mrf.mxu0 }
  0xd5   : > { %6785 = vst [vmem:[#allocation37_spill] sm:$0xff] %v4508_v9 }
  0xd7   : > { %3404 = vmatmul.msk.f32.gmra.mxu0 %vm381_vm1, %v4511_v30 }
  0xd8   : > { %3487 = vmatmul.msk.f32.gmra.mxu3 %vm381_vm1, %v4180_v51 }
  0xdb   : > { %v4522_v14 = vpop.f32.mrf.mxu3 }
  0xdc   : > { %6787 = vst [vmem:[#allocation39_spill] sm:$0xff] %v4522_v14  ;;  %v4524_v9 = vpop.f32.mrf.mxu0  ;;  %v4541_v14 = vpop.f32.mrf.mxu2 }
  0xdd   : > { %6788 = vst [vmem:[#allocation40_spill] sm:$0xff] %v4524_v9 }
  0xde   : > { %6793 = vst [vmem:[#allocation45_spill] sm:$0xff] %v4541_v14  ;;  %v725_v14 = vrot.slane %v4025_v4, 2 }
  0xdf   : > { %3405 = vmatmul.msk.f32.gmra.mxu0 %vm381_vm1, %v4527_v39  ;;  %v6796_v39 = vrot.slane %v4028_v5, 1 }
  0xe0   : > { %3488 = vmatmul.msk.f32.gmra.mxu3 %vm381_vm1, %v4205_v58 }
  0xe3   : > { %v4534_v30 = vpop.f32.mrf.mxu3 }
  0xe4   : > { %6790 = vst [vmem:[#allocation42_spill] sm:$0xff] %v4534_v30  ;;  %v4536_v53 = vpop.f32.mrf.mxu0  ;;  %v4554_v30 = vsel %vm319_vm2, %v373_v16, %v6796_v39  ;;  %v727_v16 = vrot.slane %v4040_v11, 2 }
  0xe5   : > { %6791 = vst [vmem:[#allocation43_spill] sm:$0xff] %v4536_v53  ;;  %v4556_v53 = vpop.f32.mrf.mxu2 }
  0xe6   : > { %6797 = vst [vmem:[#allocation48_spill] sm:$0xff] %v4554_v30  ;;  %v728_v4 = vsel %vm723_vm3, %v725_v14, %v727_v16 }
  0xe7   : > { %3406 = vmatmul.msk.f32.gmra.mxu0 %vm381_vm1, %v4539_v2  ;;  %6798 = vst [vmem:[#allocation49_spill] sm:$0xff] %v4556_v53 }
  0xe8   : > { %3489 = vmatmul.msk.f32.gmra.mxu3 %vm381_vm1, %v4231_v1 }
  0xeb   : > { %v4547_v6 = vpop.f32.mrf.mxu3 }
  0xec   : > { %6794 = vst [vmem:[#allocation46_spill] sm:$0xff] %v4547_v6  ;;  %v4549_v9 = vpop.f32.mrf.mxu0  ;;  %v4567_v6 = vpop.f32.mrf.mxu1 }
  0xed   : > { %6795 = vst [vmem:[#allocation47_spill] sm:$0xff] %v4549_v9  ;;  %v726_v9 = vsel %vm723_vm3, %v724_v18, %v725_v14  ;;  %v4573_v39 = vpop.f32.mrf.mxu2  ;;  %v731_v14 = vrot.slane %v4080_v23, 2 }
  0xee   : > { %6800 = vst [vmem:[#allocation51_spill] sm:$0xff] %v4573_v39 }
  0xef   : > { %3407 = vmatmul.msk.f32.gmra.mxu0 %vm381_vm1, %v4554_v30 }
  0xf0   : > { %3490 = vmatmul.msk.f32.gmra.mxu3 %vm381_vm1, %v4253_v15 }
  0xf3   : > { %v719_v2 = vpop.f32.mrf.mxu3 }
  0xf4   : > { %v4564_v38 = vpop.f32.mrf.mxu0  ;;  %v4581_v2 = vpop.f32.mrf.mxu1 }
  0xf5   : > { %6799 = vst [vmem:[#allocation50_spill] sm:$0xff] %v4564_v38  ;;  %v4586_v18 = vpop.f32.mrf.mxu2 }
  0xf6   : > { %6802 = vst [vmem:[#allocation53_spill] sm:$0xff] %v4586_v18 }
  0xf7   : > { %3443 = vmatmul.msk.f32.vlgmr.msrb.gmra.mxu0 %vm381_vm1, %v726_v9  ;;  %v729_v9 = vrot.slane %v4065_v19, 2 }
  0xf8   : > { %3491 = vmatmul.msk.f32.gmra.mxu3 %vm381_vm1, %v4272_v32 }
  0xf9   : > { %v730_v38 = vsel %vm723_vm3, %v727_v16, %v729_v9  ;;  %v732_v18 = vsel %vm723_vm3, %v729_v9, %v731_v14  ;;  %v733_v16 = vrot.slane %v4096_v27, 2 }
  0xfb   : > { %v4575_v53 = vpop.f32.mrf.mxu3  ;;  %v4620_v9 = vsel %vm723_vm3, %v731_v14, %v733_v16  ;;  %v735_v14 = vrot.slane %v4127_v36, 2 }
  0xfc   : > { %v4577_v3 = vpop.f32.mrf.mxu0 }
  0xfd   : > { %6801 = vst [vmem:[#allocation52_spill] sm:$0xff] %v4577_v3  ;;  %v4604_v30 = vpop.f32.mrf.mxu2 }
  0xfe   : > { %6808 = vst [vmem:[#allocation59_spill] sm:$0xff] %v4604_v30  ;;  %v3537_v30 = vld [vmem:[%s6639_s1 + $0x14] sm:$0xf] }
  0xff   : > { %3444 = vmatmul.msk.f32.gmra.mxu0 %vm381_vm1, %v728_v4  ;;  %v4597_v4 = vpop.f32.mrf.mxu1  ;;  %3538 = vmatpush.msk.msrb.mxu1 %vm442_vm0, %v3537_v30  ;;  %v4641_v30 = vsel %vm723_vm3, %v733_v16, %v735_v14  ;;  %v737_v16 = vrot.slane %v4152_v43, 2 }
 0x100   : > { %3492 = vmatmul.msk.f32.gmra.mxu3 %vm381_vm1, %v4291_v52  ;;  %6805 = vst [vmem:[#allocation56_spill] sm:$0xff] %v4597_v4  ;;  %v3569_v4 = vld [vmem:[%s6639_s1 + $0x18] sm:$0xf]  ;;  %3539 = vmatmul.msk.f32.vlgmr.msrb.gmra.mxu1 %vm381_vm1, %v730_v38 }
 0x101   : > { %3570 = vmatpush.msk.msrb.mxu2 %vm442_vm0, %v3569_v4  ;;  %v6696_v4 = vrot.slane %v4044_v13, 2 }
 0x103   : > { %v4588_v11 = vpop.f32.mrf.mxu3 }
 0x104   : > { %6803 = vst [vmem:[#allocation54_spill] sm:$0xff] %v4588_v11  ;;  %v4590_v39 = vpop.f32.mrf.mxu0 }
 0x105   : > { %6804 = vst [vmem:[#allocation55_spill] sm:$0xff] %v4590_v39 }
 0x107   : > { %3445 = vmatmul.msk.f32.gmra.mxu0 %vm381_vm1, %v730_v38 }
 0x108   : > { %3493 = vmatmul.msk.f32.gmra.mxu3 %vm381_vm1, %v4077_v22  ;;  %3540 = vmatmul.msk.f32.gmra.mxu1 %vm381_vm1, %v732_v18 }
 0x10b   : > { %v4599_v3 = vpop.f32.mrf.mxu3 }
 0x10c   : > { %6806 = vst [vmem:[#allocation57_spill] sm:$0xff] %v4599_v3  ;;  %v4601_v19 = vpop.f32.mrf.mxu0  ;;  %v4615_v3 = vpop.f32.mrf.mxu1 }
 0x10d   : > { %6807 = vst [vmem:[#allocation58_spill] sm:$0xff] %v4601_v19 }
 0x10e   : > { %6810 = vst [vmem:[#allocation61_spill] sm:$0xff] %v4615_v3 }
 0x10f   : > { %3446 = vmatmul.msk.f32.gmra.mxu0 %vm381_vm1, %v732_v18 }
 0x110   : > { %3494 = vmatmul.msk.f32.gmra.mxu3 %vm381_vm1, %v4093_v26  ;;  %3541 = vmatmul.msk.f32.gmra.mxu1 %vm381_vm1, %v4620_v9 }
 0x113   : > { %v4610_v39 = vpop.f32.mrf.mxu3 }
 0x114   : > { %6809 = vst [vmem:[#allocation60_spill] sm:$0xff] %v4610_v39  ;;  %v4617_v19 = vpop.f32.mrf.mxu0  ;;  %v4627_v39 = vpop.f32.mrf.mxu2 }
 0x115   : > { %6811 = vst [vmem:[#allocation62_spill] sm:$0xff] %v4617_v19  ;;  %v4650_v11 = vpop.f32.mrf.mxu1 }
 0x116   : > { %6812 = vst [vmem:[#allocation63_spill] sm:$0xff] %v4627_v39  ;;  %v6815_v39 = vrot.slane %v4033_v8, 2 }
 0x117   : > { %3447 = vmatmul.msk.f32.gmra.mxu0 %vm381_vm1, %v4620_v9 }
 0x118   : > { %3495 = vmatmul.msk.f32.gmra.mxu3 %vm381_vm1, %v4124_v35  ;;  %v4648_v38 = vsel %vm723_vm3, %v6815_v39, %v6696_v4  ;;  %v3601_v39 = vld [vmem:[%s6639_s1 + $0x1c] sm:$0xf]  ;;  %3542 = vmatmul.msk.f32.gmra.mxu1 %vm381_vm1, %v4641_v30 }
 0x119   : > { %6816 = vst [vmem:[#allocation66_spill] sm:$0xff] %v4648_v38  ;;  %3472 = vmatmul.msk.f32.gmra.mxu2 %vm381_vm1, %v4648_v38  ;;  %3602 = vmatpush.msk.msrb.mxu3 %vm442_vm0, %v3601_v39  ;;  %v739_v39 = vrot.slane %v4177_v50, 2 }
 0x11b   : > { %v4635_v19 = vpop.f32.mrf.mxu3 }
 0x11c   : > { %6813 = vst [vmem:[#allocation64_spill] sm:$0xff] %v4635_v19  ;;  %v4638_v3 = vpop.f32.mrf.mxu0  ;;  %v4663_v4 = vpop.f32.mrf.mxu2  ;;  %v4671_v19 = vsel %vm723_vm3, %v735_v14, %v737_v16  ;;  %v3633_v14 = vld [vmem:[%s6639_s1 + $0x20] sm:$0xf] }
 0x11d   : > { %6814 = vst [vmem:[#allocation65_spill] sm:$0xff] %v4638_v3  ;;  %v4679_v18 = vpop.f32.mrf.mxu1  ;;  %3634 = vmatpush.msk.msrb.mxu0 %vm442_vm0, %v3633_v14  ;;  %v741_v14 = vrot.slane %v4202_v57, 2 }
 0x11e   : > { %6817 = vst [vmem:[#allocation67_spill] sm:$0xff] %v4663_v4 }
 0x11f   : > { %3448 = vmatmul.msk.f32.gmra.mxu0 %vm381_vm1, %v4641_v30 }
 0x120   : > { %3496 = vmatmul.msk.f32.gmra.mxu3 %vm381_vm1, %v4149_v42  ;;  %3543 = vmatmul.msk.f32.gmra.mxu1 %vm381_vm1, %v4671_v19 }
 0x121   : > { %3571 = vmatmul.msk.f32.vlgmr.msrb.gmra.mxu2 %vm381_vm1, %v4080_v23 }
 0x123   : > { %v4666_v3 = vpop.f32.mrf.mxu3 }
 0x124   : > { %6818 = vst [vmem:[#allocation68_spill] sm:$0xff] %v4666_v3  ;;  %v4668_v38 = vpop.f32.mrf.mxu0  ;;  %v4688_v23 = vpop.f32.mrf.mxu2  ;;  %v4695_v3 = vsel %vm723_vm3, %v737_v16, %v739_v39 }
 0x125   : > { %6819 = vst [vmem:[#allocation69_spill] sm:$0xff] %v4668_v38 }
 0x126   : > { %6820 = vst [vmem:[#allocation70_spill] sm:$0xff] %v4688_v23  ;;  %v4706_v23 = vpop.f32.mrf.mxu1 }
 0x127   : > { %3449 = vmatmul.msk.f32.gmra.mxu0 %vm381_vm1, %v4671_v19  ;;  %6823 = vst [vmem:[#allocation73_spill] sm:$0xff] %v4706_v23 }
 0x128   : > { %3497 = vmatmul.msk.f32.gmra.mxu3 %vm381_vm1, %v4174_v49  ;;  %3544 = vmatmul.msk.f32.gmra.mxu1 %vm381_vm1, %v4695_v3 }
 0x129   : > { %3572 = vmatmul.msk.f32.gmra.mxu2 %vm381_vm1, %v4096_v27 }
 0x12b   : > { %v4690_v38 = vpop.f32.mrf.mxu3 }
 0x12c   : > { %6821 = vst [vmem:[#allocation71_spill] sm:$0xff] %v4690_v38  ;;  %v4692_v4 = vpop.f32.mrf.mxu0  ;;  %v4713_v38 = vsel %vm723_vm3, %v739_v39, %v741_v14  ;;  %v4715_v27 = vpop.f32.mrf.mxu2 }
 0x12d   : > { %6822 = vst [vmem:[#allocation72_spill] sm:$0xff] %v4692_v4 }
 0x12e   : > { %6826 = vst [vmem:[#allocation76_spill] sm:$0xff] %v4715_v27  ;;  %v6829_v27 = vrot.slane %v4099_v28, 2 }
 0x12f   : > { %3450 = vmatmul.msk.f32.gmra.mxu0 %vm381_vm1, %v4695_v3 }
 0x130   : > { %3498 = vmatmul.msk.f32.gmra.mxu3 %vm381_vm1, %v4199_v56  ;;  %v4734_v23 = vsel %vm723_vm3, %v741_v14, %v6829_v27  ;;  %3545 = vmatmul.msk.f32.gmra.mxu1 %vm381_vm1, %v4713_v38 }
 0x131   : > { %3573 = vmatmul.msk.f32.gmra.mxu2 %vm381_vm1, %v4127_v36 }
 0x133   : > { %v4708_v4 = vpop.f32.mrf.mxu3 }
 0x134   : > { %6824 = vst [vmem:[#allocation74_spill] sm:$0xff] %v4708_v4  ;;  %v4710_v16 = vpop.f32.mrf.mxu0  ;;  %v4738_v36 = vpop.f32.mrf.mxu2 }
 0x135   : > { %6825 = vst [vmem:[#allocation75_spill] sm:$0xff] %v4710_v16  ;;  %v4727_v16 = vpop.f32.mrf.mxu1 }
 0x136   : > { %6830 = vst [vmem:[#allocation79_spill] sm:$0xff] %v4738_v36 }
 0x137   : > { %3451 = vmatmul.msk.f32.gmra.mxu0 %vm381_vm1, %v4713_v38 }
 0x138   : > { %3499 = vmatmul.msk.f32.gmra.mxu3 %vm381_vm1, %v4228_v0  ;;  %3546 = vmatmul.msk.f32.gmra.mxu1 %vm381_vm1, %v4734_v23 }
 0x139   : > { %3574 = vmatmul.msk.f32.gmra.mxu2 %vm381_vm1, %v4152_v43 }
 0x13b   : > { %v4725_v4 = vpop.f32.mrf.mxu3 }
 0x13c   : > { %6827 = vst [vmem:[#allocation77_spill] sm:$0xff] %v4725_v4  ;;  %v4729_v39 = vpop.f32.mrf.mxu0  ;;  %v4760_v43 = vpop.f32.mrf.mxu2 }
 0x13d   : > { %6828 = vst [vmem:[#allocation78_spill] sm:$0xff] %v4729_v39  ;;  %v4750_v14 = vpop.f32.mrf.mxu1 }
 0x13e   : > { %6832 = vst [vmem:[#allocation81_spill] sm:$0xff] %v4760_v43 }
 0x13f   : > { %3452 = vmatmul.msk.f32.gmra.mxu0 %vm381_vm1, %v4734_v23 }
 0x140   : > { %3500 = vmatmul.msk.f32.gmra.mxu3 %vm381_vm1, %v4250_v12  ;;  %3547 = vmatmul.msk.f32.gmra.mxu1 %vm381_vm1, %v4114_v33 }
 0x141   : > { %3575 = vmatmul.msk.f32.gmra.mxu2 %vm381_vm1, %v4177_v50 }
 0x143   : > { %v4746_v39 = vpop.f32.mrf.mxu3 }
 0x144   : > { %v4748_v4 = vpop.f32.mrf.mxu0 }
 0x145   : > { %6831 = vst [vmem:[#allocation80_spill] sm:$0xff] %v4748_v4 }
 0x147   : > { %3507 = vmatmul.msk.f32.vlgmr.msra.gmra.mxu0 %vm381_vm1, %v4072_v21  ;;  %v4772_v21 = vpop.f32.mrf.mxu1 }
 0x148   : > { %3501 = vmatmul.msk.f32.gmra.mxu3 %vm381_vm1, %v4028_v5  ;;  %v4776_v5 = vpop.f32.mrf.mxu2  ;;  %3548 = vmatmul.msk.f32.gmra.mxu1 %vm381_vm1, %v4139_v40 }
 0x149   : > { %3576 = vmatmul.msk.f32.gmra.mxu2 %vm381_vm1, %v4202_v57  ;;  %6835 = vst [vmem:[#allocation84_spill] sm:$0xff] %v4776_v5 }
 0x14b   : > { %v4762_v27 = vpop.f32.mrf.mxu3 }
 0x14c   : > { %6833 = vst [vmem:[#allocation82_spill] sm:$0xff] %v4762_v27  ;;  %v4764_v36 = vpop.f32.mrf.mxu0  ;;  %v6880_v27 = vld [vmem:[#allocation16_spill] sm:$0xff] }
 0x14d   : > { %6834 = vst [vmem:[#allocation83_spill] sm:$0xff] %v4764_v36 }
 0x14f   : > { %3508 = vmatmul.msk.f32.gmra.mxu0 %vm381_vm1, %v4088_v25  ;;  %v4790_v25 = vpop.f32.mrf.mxu1 }
 0x150   : > { %3502 = vmatmul.msk.f32.gmra.mxu3 %vm381_vm1, %v4033_v8  ;;  %6838 = vst [vmem:[#allocation87_spill] sm:$0xff] %v4790_v25  ;;  %v4796_v4 = vpop.f32.mrf.mxu2  ;;  %3549 = vmatmul.msk.f32.gmra.mxu1 %vm381_vm1, %v4164_v47  ;;  %v6886_v25 = vld [vmem:[#allocation20_spill] sm:$0xff] }
 0x151   : > { %3577 = vmatmul.msk.f32.gmra.mxu2 %vm381_vm1, %v4099_v28  ;;  %6841 = vst [vmem:[#allocation90_spill] sm:$0xff] %v4796_v4 }
 0x153   : > { %v4778_v50 = vpop.f32.mrf.mxu3 }
 0x154   : > { %6836 = vst [vmem:[#allocation85_spill] sm:$0xff] %v4778_v50  ;;  %v4780_v36 = vpop.f32.mrf.mxu0 }
 0x155   : > { %6837 = vst [vmem:[#allocation86_spill] sm:$0xff] %v4780_v36  ;;  %v4799_v36 = vld [vmem:[%s4019_s7 + $0xf8] sm:$0xff] }
 0x157   : > { %3509 = vmatmul.msk.f32.gmra.mxu0 %vm381_vm1, %v4119_v34  ;;  %v4811_v5 = vpop.f32.mrf.mxu1 }
 0x158   : > { %3503 = vmatmul.msk.f32.gmra.mxu3 %vm381_vm1, %v4044_v13  ;;  %6843 = vst [vmem:[#allocation92_spill] sm:$0xff] %v4811_v5  ;;  %v4817_v4 = vpop.f32.mrf.mxu2  ;;  %3550 = vmatmul.msk.f32.gmra.mxu1 %vm381_vm1, %v4189_v54 }
 0x159   : > { %3578 = vmatmul.msk.f32.gmra.mxu2 %vm381_vm1, %v4102_v29  ;;  %6845 = vst [vmem:[#allocation94_spill] sm:$0xff] %v4817_v4 }
 0x15b   : > { %v4792_v8 = vpop.f32.mrf.mxu3 }
 0x15c   : > { %6839 = vst [vmem:[#allocation88_spill] sm:$0xff] %v4792_v8  ;;  %v4794_v57 = vpop.f32.mrf.mxu0  ;;  %v6876_v8 = vld [vmem:[#allocation13_spill] sm:$0xff] }
 0x15d   : > { %6840 = vst [vmem:[#allocation89_spill] sm:$0xff] %v4794_v57 }
 0x15f   : > { %3510 = vmatmul.msk.f32.gmra.mxu0 %vm381_vm1, %v4144_v41 }
 0x160   : > { %3504 = vmatmul.msk.f32.gmra.mxu3 %vm381_vm1, %v4799_v36  ;;  %3551 = vmatmul.msk.f32.gmra.mxu1 %vm381_vm1, %v4217_v62 }
 0x161   : > { %3579 = vmatmul.msk.f32.gmra.mxu2 %vm381_vm1, %v4130_v37  ;;  %v4839_v37 = vpop.f32.mrf.mxu2 }
 0x162   : > { %6849 = vst [vmem:[#allocation98_spill] sm:$0xff] %v4839_v37 }
 0x163   : > { %v4809_v28 = vpop.f32.mrf.mxu3 }
 0x164   : > { %6842 = vst [vmem:[#allocation91_spill] sm:$0xff] %v4809_v28  ;;  %v4813_v57 = vpop.f32.mrf.mxu0  ;;  %v4829_v28 = vpop.f32.mrf.mxu1 }
 0x165   : > { %6844 = vst [vmem:[#allocation93_spill] sm:$0xff] %v4813_v57 }
 0x166   : > { %6848 = vst [vmem:[#allocation97_spill] sm:$0xff] %v4829_v28  ;;  %v6877_v28 = vld [vmem:[#allocation10_spill] sm:$0xff] }
 0x167   : > { %3511 = vmatmul.msk.f32.gmra.mxu0 %vm381_vm1, %v4169_v48 }
 0x168   : > { %3603 = vmatmul.msk.f32.vlgmr.msrb.gmra.mxu3 %vm381_vm1, %v4119_v34  ;;  %3552 = vmatmul.msk.f32.gmra.mxu1 %vm381_vm1, %v4240_v7 }
 0x169   : > { %3580 = vmatmul.msk.f32.gmra.mxu2 %vm381_vm1, %v4155_v44 }
 0x16b   : > { %v4825_v29 = vpop.f32.mrf.mxu3 }
 0x16c   : > { %6846 = vst [vmem:[#allocation95_spill] sm:$0xff] %v4825_v29  ;;  %v4827_v43 = vpop.f32.mrf.mxu0  ;;  %v4851_v44 = vpop.f32.mrf.mxu1  ;;  %v6875_v29 = vld [vmem:[#allocation8_spill] sm:$0xff] }
 0x16d   : > { %6847 = vst [vmem:[#allocation96_spill] sm:$0xff] %v4827_v43 }
 0x16e   : > { %6851 = vst [vmem:[#allocation100_spill] sm:$0xff] %v4851_v44 }
 0x16f   : > { %3512 = vmatmul.msk.f32.gmra.mxu0 %vm381_vm1, %v4194_v55 }
 0x170   : > { %3604 = vmatmul.msk.f32.gmra.mxu3 %vm381_vm1, %v4144_v41  ;;  %v4855_v41 = vpop.f32.mrf.mxu2  ;;  %3553 = vmatmul.msk.f32.gmra.mxu1 %vm381_vm1, %v4262_v24 }
 0x171   : > { %3581 = vmatmul.msk.f32.gmra.mxu2 %vm381_vm1, %v4180_v51  ;;  %6852 = vst [vmem:[#allocation101_spill] sm:$0xff] %v4855_v41 }
 0x173   : > { %v4841_v34 = vpop.f32.mrf.mxu3 }
 0x174   : > { %6850 = vst [vmem:[#allocation99_spill] sm:$0xff] %v4841_v34  ;;  %v4843_v57 = vpop.f32.mrf.mxu0  ;;  %v4869_v51 = vpop.f32.mrf.mxu1  ;;  %v6872_v34 = vld [vmem:[#allocation9_spill] sm:$0xff] }
 0x175   : > { %6854 = vst [vmem:[#allocation103_spill] sm:$0xff] %v4869_v51  ;;  %v633_v51 = vadd.f32 %v4567_v6, %v6875_v29  ;;  %v6879_v29 = vld [vmem:[#allocation12_spill] sm:$0xff] }
 0x177   : > { %3513 = vmatmul.msk.f32.gmra.mxu0 %vm381_vm1, %v4223_v63  ;;  %v954_v44 = vadd.f32 %v4843_v57, %v633_v51 }
 0x178   : > { %3605 = vmatmul.msk.f32.gmra.mxu3 %vm381_vm1, %v4169_v48  ;;  %v4875_v4 = vpop.f32.mrf.mxu2  ;;  %3554 = vmatmul.msk.f32.gmra.mxu1 %vm381_vm1, %v4281_v45 }
 0x179   : > { %3582 = vmatmul.msk.f32.gmra.mxu2 %vm381_vm1, %v4205_v58  ;;  %6856 = vst [vmem:[#allocation105_spill] sm:$0xff] %v4875_v4 }
 0x17b   : > { %v4857_v43 = vpop.f32.mrf.mxu3 }
 0x17c   : > { %6853 = vst [vmem:[#allocation102_spill] sm:$0xff] %v4857_v43  ;;  %v4859_v37 = vpop.f32.mrf.mxu0  ;;  %v4887_v58 = vpop.f32.mrf.mxu1 }
 0x17d   : > { %6858 = vst [vmem:[#allocation107_spill] sm:$0xff] %v4887_v58 }
 0x17f   : > { %3514 = vmatmul.msk.f32.gmra.mxu0 %vm381_vm1, %v4245_v10 }
 0x180   : > { %3606 = vmatmul.msk.f32.gmra.mxu3 %vm381_vm1, %v4194_v55  ;;  %v4893_v4 = vpop.f32.mrf.mxu2  ;;  %3555 = vmatmul.msk.f32.gmra.mxu1 %vm381_vm1, %v4300_v60 }
 0x181   : > { %3583 = vmatmul.msk.f32.gmra.mxu2 %vm381_vm1, %v4231_v1  ;;  %6859 = vst [vmem:[#allocation108_spill] sm:$0xff] %v4893_v4 }
 0x183   : > { %v4871_v48 = vpop.f32.mrf.mxu3 }
 0x184   : > { %6855 = vst [vmem:[#allocation104_spill] sm:$0xff] %v4871_v48  ;;  %v4873_v41 = vpop.f32.mrf.mxu0 }
 0x187   : > { %3515 = vmatmul.msk.f32.gmra.mxu0 %vm381_vm1, %v4267_v31 }
 0x188   : > { %3607 = vmatmul.msk.f32.gmra.mxu3 %vm381_vm1, %v4223_v63  ;;  %3556 = vmatmul.msk.f32.gmra.mxu1 %vm381_vm1, %v4316_v17 }
 0x189   : > { %3584 = vmatmul.msk.f32.gmra.mxu2 %vm381_vm1, %v4253_v15  ;;  %v4915_v15 = vpop.f32.mrf.mxu2 }
 0x18b   : > { %v4885_v55 = vpop.f32.mrf.mxu3 }
 0x18c   : > { %6857 = vst [vmem:[#allocation106_spill] sm:$0xff] %v4885_v55  ;;  %v4889_v48 = vpop.f32.mrf.mxu0  ;;  %v4905_v55 = vpop.f32.mrf.mxu1 }
 0x18d   : > { %6861 = vst [vmem:[#allocation110_spill] sm:$0xff] %v4905_v55 }
 0x18f   : > { %3516 = vmatmul.msk.f32.gmra.mxu0 %vm381_vm1, %v4286_v46 }
 0x190   : > { %3608 = vmatmul.msk.f32.gmra.mxu3 %vm381_vm1, %v4245_v10 }
 0x191   : > { %3585 = vmatmul.msk.f32.gmra.mxu2 %vm381_vm1, %v4272_v32 }
 0x193   : > { %v4901_v63 = vpop.f32.mrf.mxu3 }
 0x194   : > { %6860 = vst [vmem:[#allocation109_spill] sm:$0xff] %v4901_v63  ;;  %v4903_v1 = vpop.f32.mrf.mxu0  ;;  %v4927_v32 = vpop.f32.mrf.mxu1 }
 0x195   : > { %6863 = vst [vmem:[#allocation112_spill] sm:$0xff] %v4927_v32 }
 0x197   : > { %3517 = vmatmul.msk.f32.gmra.mxu0 %vm381_vm1, %v4305_v61 }
 0x198   : > { %3609 = vmatmul.msk.f32.gmra.mxu3 %vm381_vm1, %v4267_v31 }
 0x199   : > { %3586 = vmatmul.msk.f32.gmra.mxu2 %vm381_vm1, %v4291_v52  ;;  %v6865_v52 = vld [vmem:[#allocation4_spill] sm:$0xff] }
 0x19a   : > { %3557 = vmatmul.msk.f32.gmra.mxu1 %vm381_vm1, %v6865_v52 }
 0x19b   : > { %v4917_v10 = vpop.f32.mrf.mxu3 }
 0x19c   : > { %6862 = vst [vmem:[#allocation111_spill] sm:$0xff] %v4917_v10  ;;  %v4919_v4 = vpop.f32.mrf.mxu0  ;;  %v952_v31 = vpop.f32.mrf.mxu2 }
 0x19d   : > { %v4943_v43 = vpop.f32.mrf.mxu1 }
 0x19e   : > { %6866 = vst [vmem:[#allocation4_spill] sm:$0xff] %v4943_v43 }
 0x19f   : > { %3518 = vmatmul.msk.f32.gmra.mxu0 %vm381_vm1, %v4321_v20 }
 0x1a0   : > { %3610 = vmatmul.msk.f32.gmra.mxu3 %vm381_vm1, %v4286_v46 }
 0x1a1   : > { %3587 = vmatmul.msk.f32.gmra.mxu2 %vm381_vm1, %v4077_v22  ;;  %v6868_v22 = vld [vmem:[#allocation6_spill] sm:$0xff] }
 0x1a3   : > { %v4931_v63 = vpop.f32.mrf.mxu3 }
 0x1a4   : > { %6864 = vst [vmem:[#allocation113_spill] sm:$0xff] %v4931_v63  ;;  %v4933_v10 = vpop.f32.mrf.mxu0  ;;  %v1452_v32 = vpop.f32.mrf.mxu2  ;;  %v6869_v63 = vld [vmem:[#allocation5_spill] sm:$0xff] }
 0x1a5   : > { %3558 = vmatmul.msk.f32.gmra.mxu1 %vm381_vm1, %v6869_v63  ;;  %v4959_v43 = vpop.f32.mrf.mxu1 }
 0x1a6   : > { %6871 = vst [vmem:[#allocation5_spill] sm:$0xff] %v4959_v43 }
 0x1a7   : > { %3519 = vmatmul.msk.f32.gmra.mxu0 %vm381_vm1, %v4337_v59 }
 0x1a8   : > { %3611 = vmatmul.msk.f32.gmra.mxu3 %vm381_vm1, %v4305_v61 }
 0x1a9   : > { %3588 = vmatmul.msk.f32.gmra.mxu2 %vm381_vm1, %v4093_v26  ;;  %v1929_v26 = vld [vmem:[%s6641_s3] sm:$0xff] }
 0x1aa   : > { %2207 = vmatpush.msra.mxu2 %v1929_v26 }
 0x1ab   : > { %v4945_v46 = vpop.f32.mrf.mxu3 }
 0x1ac   : > { %6867 = vst [vmem:[#allocation114_spill] sm:$0xff] %v4945_v46  ;;  %v4947_v31 = vpop.f32.mrf.mxu0  ;;  %v1455_v61 = vpop.f32.mrf.mxu2 }
 0x1af   : > { %3520 = vmatmul.msk.f32.gmra.mxu0 %vm381_vm1, %v6868_v22 }
 0x1b0   : > { %3612 = vmatmul.msk.f32.gmra.mxu3 %vm381_vm1, %v4321_v20  ;;  %v3665_v20 = vld [vmem:[%s6641_s3 + $0x8] sm:$0xff] }
 0x1b1   : > { %3589 = vmatmul.msk.f32.gmra.mxu2 %vm381_vm1, %v4124_v35  ;;  %2070 = vmatpush.msra.mxu1 %v3665_v20  ;;  %v1307_v35 = vpop.f32.mrf.mxu1 }
 0x1b3   : > { %v4957_v55 = vpop.f32.mrf.mxu3 }
 0x1b4   : > { %6870 = vst [vmem:[#allocation6_spill] sm:$0xff] %v4957_v55  ;;  %v4961_v46 = vpop.f32.mrf.mxu0  ;;  %v6873_v55 = vld [vmem:[#allocation7_spill] sm:$0xff]  ;;  %v1458_v43 = vpop.f32.mrf.mxu2 }
 0x1b5   : > { %3559 = vmatmul.msk.f32.gmra.mxu1 %vm381_vm1, %v6873_v55 }
 0x1b7   : > { %3521 = vmatmul.msk.f32.gmra.mxu0 %vm381_vm1, %v6872_v34 }
 0x1b8   : > { %3613 = vmatmul.msk.f32.gmra.mxu3 %vm381_vm1, %v4337_v59 }
 0x1b9   : > { %3590 = vmatmul.msk.f32.gmra.mxu2 %vm381_vm1, %v4149_v42  ;;  %v636_v42 = vadd.f32 %v4581_v2, %v6879_v29  ;;  %v1310_v57 = vpop.f32.mrf.mxu1 }
 0x1bb   : > { %v4977_v58 = vpop.f32.mrf.mxu3  ;;  %v955_v51 = vadd.f32 %v4859_v37, %v636_v42 }
 0x1bc   : > { %6874 = vst [vmem:[#allocation9_spill] sm:$0xff] %v4977_v58  ;;  %v4979_v26 = vpop.f32.mrf.mxu0  ;;  %v1461_v59 = vpop.f32.mrf.mxu2  ;;  %v1099_v58 = vadd.f32 %v4575_v53, %v954_v44 }
 0x1bd   : > { %3560 = vmatmul.msk.f32.gmra.mxu1 %vm381_vm1, %v6877_v28 }
 0x1bf   : > { %3522 = vmatmul.msk.f32.gmra.mxu0 %vm381_vm1, %v6876_v8 }
 0x1c0   : > { %3614 = vmatmul.msk.f32.gmra.mxu3 %vm381_vm1, %v6868_v22  ;;  %v6881_v22 = vld [vmem:[#allocation14_spill] sm:$0xff] }
 0x1c1   : > { %3591 = vmatmul.msk.f32.gmra.mxu2 %vm381_vm1, %v4174_v49  ;;  %v6884_v49 = vld [vmem:[#allocation15_spill] sm:$0xff] }
 0x1c3   : > { %v4992_v20 = vpop.f32.mrf.mxu3 }
 0x1c4   : > { %6878 = vst [vmem:[#allocation7_spill] sm:$0xff] %v4992_v20  ;;  %v1159_v6 = vpop.f32.mrf.mxu0  ;;  %v1464_v44 = vpop.f32.mrf.mxu2  ;;  %v6885_v20 = vld [vmem:[#allocation56_spill] sm:$0xff] }
 0x1c5   : > { %v1248_v50 = vadd.f32 %v1159_v6, %v1099_v58  ;;  %3561 = vmatmul.msk.f32.gmra.mxu1 %vm381_vm1, %v6881_v22  ;;  %v6883_v58 = vld [vmem:[#allocation54_spill] sm:$0xff]  ;;  %v639_v37 = vadd.f32 %v6885_v20, %v6884_v49 }
 0x1c6   : > { %v1100_v6 = vadd.f32 %v6883_v58, %v955_v51  ;;  %v6889_v58 = vld [vmem:[#allocation57_spill] sm:$0xff] }
 0x1c7   : > { %v1396_v5 = vadd.f32 %v1307_v35, %v1248_v50  ;;  %3523 = vmatmul.msk.f32.gmra.mxu0 %vm381_vm1, %v6880_v27  ;;  %v956_v35 = vadd.f32 %v4873_v41, %v639_v37  ;;  %v6890_v41 = vld [vmem:[#allocation19_spill] sm:$0xff] }
 0x1c8   : > { %3615 = vmatmul.msk.f32.gmra.mxu3 %vm381_vm1, %v6872_v34  ;;  %v1313_v34 = vpop.f32.mrf.mxu1  ;;  %v6892_v37 = vld [vmem:[#allocation11_spill] sm:$0xff] }
 0x1c9   : > { %v1541_v53 = vadd.f32 %v1452_v32, %v1396_v5  ;;  %3592 = vmatmul.msk.f32.gmra.mxu2 %vm381_vm1, %v4199_v56  ;;  %v6887_v5 = vld [vmem:[#allocation17_spill] sm:$0xff]  ;;  %v1101_v56 = vadd.f32 %v6889_v58, %v956_v35 }
 0x1cb   : > { %v5006_v2 = vpop.f32.mrf.mxu3 }
 0x1cc   : > { %6882 = vst [vmem:[#allocation8_spill] sm:$0xff] %v5006_v2  ;;  %v1162_v29 = vpop.f32.mrf.mxu0  ;;  %v5020_v51 = vpop.f32.mrf.mxu2 }
 0x1cd   : > { %v1249_v50 = vadd.f32 %v1162_v29, %v1100_v6  ;;  %3562 = vmatmul.msk.f32.gmra.mxu1 %vm381_vm1, %v6887_v5 }
 0x1cf   : > { %v1397_v42 = vadd.f32 %v1310_v57, %v1249_v50  ;;  %3524 = vmatmul.msk.f32.gmra.mxu0 %vm381_vm1, %v6886_v25  ;;  %v6891_v57 = vld [vmem:[#allocation61_spill] sm:$0xff]  ;;  %v6893_v50 = vld [vmem:[#allocation46_spill] sm:$0xff] }
 0x1d0   : > { %3616 = vmatmul.msk.f32.gmra.mxu3 %vm381_vm1, %v6876_v8  ;;  %v642_v29 = vadd.f32 %v6891_v57, %v6890_v41  ;;  %v717_v2 = vadd.f32 %v6893_v50, %v6892_v37  ;;  %v6899_v50 = vld [vmem:[#allocation28_spill] sm:$0xff] }
 0x1d1   : > { %v1542_v32 = vadd.f32 %v1455_v61, %v1397_v42  ;;  %3593 = vmatmul.msk.f32.gmra.mxu2 %vm381_vm1, %v4228_v0  ;;  %v6894_v42 = vld [vmem:[#allocation24_spill] sm:$0xff] }
 0x1d2   : > { %v957_v8 = vadd.f32 %v4889_v48, %v642_v29  ;;  %v6896_v0 = vld [vmem:[#allocation60_spill] sm:$0xff]  ;;  %v6898_v29 = vld [vmem:[#allocation23_spill] sm:$0xff] }
 0x1d3   : > { %v5022_v20 = vpop.f32.mrf.mxu3 }
 0x1d4   : > { %6888 = vst [vmem:[#allocation13_spill] sm:$0xff] %v5022_v20  ;;  %v1165_v6 = vpop.f32.mrf.mxu0  ;;  %v6895_v20 = vld [vmem:[#allocation21_spill] sm:$0xff]  ;;  %v5038_v58 = vpop.f32.mrf.mxu2  ;;  %v1102_v57 = vadd.f32 %v6896_v0, %v957_v8 }
 0x1d5   : > { %v1250_v49 = vadd.f32 %v1165_v6, %v1101_v56  ;;  %3563 = vmatmul.msk.f32.gmra.mxu1 %vm381_vm1, %v6895_v20  ;;  %v982_v56 = vadd.f32 %v4915_v15, %v717_v2  ;;  %v1316_v6 = vpop.f32.mrf.mxu1  ;;  %v6900_v15 = vld [vmem:[#allocation25_spill] sm:$0xff] }
 0x1d7   : > { %v1398_v61 = vadd.f32 %v1313_v34, %v1250_v49  ;;  %3525 = vmatmul.msk.f32.gmra.mxu0 %vm381_vm1, %v6894_v42  ;;  %v645_v49 = vadd.f32 %v4650_v11, %v6898_v29 }
 0x1d8   : > { %3617 = vmatmul.msk.f32.gmra.mxu3 %vm381_vm1, %v6880_v27 }
 0x1d9   : > { %v1543_v35 = vadd.f32 %v1458_v43, %v1398_v61  ;;  %3594 = vmatmul.msk.f32.gmra.mxu2 %vm381_vm1, %v4250_v12  ;;  %v958_v43 = vadd.f32 %v4903_v1, %v645_v49  ;;  %v6901_v61 = vld [vmem:[#allocation64_spill] sm:$0xff] }
 0x1db   : > { %v1094_v41 = vpop.f32.mrf.mxu3 }
 0x1dc   : > { %v5042_v48 = vadd.f32 %v1094_v41, %v982_v56  ;;  %v1168_v34 = vpop.f32.mrf.mxu0  ;;  %v5055_v8 = vpop.f32.mrf.mxu2  ;;  %v1103_v56 = vadd.f32 %v6901_v61, %v958_v43  ;;  %v3922_v43 = vld [vmem:[%s4019_s7 + $0xe8] sm:$0xff] }
 0x1dd   : > { %v1251_v37 = vadd.f32 %v1168_v34, %v1102_v57  ;;  %3564 = vmatmul.msk.f32.gmra.mxu1 %vm381_vm1, %v6900_v15  ;;  %v1319_v41 = vpop.f32.mrf.mxu1  ;;  %v6902_v57 = vld [vmem:[#allocation32_spill] sm:$0xff]  ;;  %v6903_v34 = vld [vmem:[#allocation29_spill] sm:$0xff] }
 0x1de   : > { %6897 = vst [vmem:[#allocation10_spill] sm:$0xff] %v5042_v48 }
 0x1df   : > { %v1399_v27 = vadd.f32 %v1316_v6, %v1251_v37  ;;  %3526 = vmatmul.msk.f32.gmra.mxu0 %vm381_vm1, %v6899_v50  ;;  %v3921_v6 = vld [vmem:[%s4019_s7 + $0xe0] sm:$0xff] }
 0x1e0   : > { %3618 = vmatmul.msk.f32.gmra.mxu3 %vm381_vm1, %v6886_v25 }
 0x1e1   : > { %v1544_v2 = vadd.f32 %v1461_v59, %v1399_v27  ;;  %3595 = vmatmul.msk.f32.gmra.mxu2 %vm381_vm1, %v3921_v6  ;;  %v6904_v27 = vld [vmem:[#allocation35_spill] sm:$0xff] }
 0x1e3   : > { %v1097_v11 = vpop.f32.mrf.mxu3 }
 0x1e4   : > { %v1171_v12 = vpop.f32.mrf.mxu0  ;;  %v5066_v59 = vpop.f32.mrf.mxu2  ;;  %v6905_v11 = vld [vmem:[#allocation66_spill] sm:$0xff] }
 0x1e5   : > { %v1252_v1 = vadd.f32 %v1171_v12, %v1103_v56  ;;  %3565 = vmatmul.msk.f32.gmra.mxu1 %vm381_vm1, %v6903_v34  ;;  %v3923_v56 = vld [vmem:[%s4019_s7 + $0xf0] sm:$0xff]  ;;  %v6907_v12 = vld [vmem:[#allocation38_spill] sm:$0xff] }
 0x1e7   : > { %v1400_v0 = vadd.f32 %v1319_v41, %v1252_v1  ;;  %3527 = vmatmul.msk.f32.gmra.mxu0 %vm381_vm1, %v6902_v57 }
 0x1e8   : > { %3619 = vmatmul.msk.f32.gmra.mxu3 %vm381_vm1, %v6894_v42 }
 0x1e9   : > { %v1545_v25 = vadd.f32 %v1464_v44, %v1400_v0  ;;  %3596 = vmatmul.msk.f32.gmra.mxu2 %vm381_vm1, %v3922_v43 }
 0x1eb   : > { %v1601_v29 = vpop.f32.mrf.mxu3 }
 0x1ec   : > { %v5068_v49 = vadd.f32 %v1601_v29, %v1541_v53  ;;  %v5070_v37 = vpop.f32.mrf.mxu0  ;;  %v5080_v44 = vpop.f32.mrf.mxu2 }
 0x1ed   : > { %3566 = vmatmul.msk.f32.gmra.mxu1 %vm381_vm1, %v6905_v11  ;;  %6906 = vst [vmem:[#allocation12_spill] sm:$0xff] %v5080_v44  ;;  %v6924_v11 = vrot.slane %v4044_v13, 1 }
 0x1ef   : > { %3528 = vmatmul.msk.f32.gmra.mxu0 %vm381_vm1, %v6904_v27 }
 0x1f0   : > { %3620 = vmatmul.msk.f32.gmra.mxu3 %vm381_vm1, %v6899_v50 }
 0x1f1   : > { %3597 = vmatmul.msk.f32.gmra.mxu2 %vm381_vm1, %v3923_v56  ;;  %v6911_v56 = vld [vmem:[#allocation44_spill] sm:$0xff] }
 0x1f3   : > { %v1604_v42 = vpop.f32.mrf.mxu3 }
 0x1f4   : > { %v5082_v61 = vadd.f32 %v1604_v42, %v1542_v32  ;;  %v5084_v53 = vpop.f32.mrf.mxu0  ;;  %v5092_v41 = vpop.f32.mrf.mxu2  ;;  %v6909_v32 = vld [vmem:[#allocation41_spill] sm:$0xff]  ;;  %v5112_v42 = vld [vmem:[%s4019_s7 + $0x100] sm:$0xff] }
 0x1f5   : > { %6908 = vst [vmem:[#allocation16_spill] sm:$0xff] %v5092_v41  ;;  %v6915_v41 = vld [vmem:[#allocation48_spill] sm:$0xff] }
 0x1f7   : > { %3529 = vmatmul.msk.f32.gmra.mxu0 %vm381_vm1, %v6907_v12 }
 0x1f8   : > { %3621 = vmatmul.msk.f32.gmra.mxu3 %vm381_vm1, %v6902_v57 }
 0x1f9   : > { %3598 = vmatmul.msk.f32.gmra.mxu2 %vm381_vm1, %v4799_v36 }
 0x1fb   : > { %v1607_v50 = vpop.f32.mrf.mxu3 }
 0x1fc   : > { %v5094_v1 = vadd.f32 %v1607_v50, %v1543_v35  ;;  %v5096_v6 = vpop.f32.mrf.mxu0  ;;  %v5104_v0 = vpop.f32.mrf.mxu2  ;;  %v6699_v35 = vrot.slane %v4799_v36, 2 }
 0x1fd   : > { %6910 = vst [vmem:[#allocation14_spill] sm:$0xff] %v5104_v0 }
 0x1ff   : > { %3530 = vmatmul.msk.f32.gmra.mxu0 %vm381_vm1, %v6909_v32 }
 0x200   : > { %3622 = vmatmul.msk.f32.gmra.mxu3 %vm381_vm1, %v6904_v27 }
 0x201   : > { %3599 = vmatmul.msk.f32.gmra.mxu2 %vm381_vm1, %v5112_v42 }
 0x203   : > { %v1610_v29 = vpop.f32.mrf.mxu3 }
 0x204   : > { %v5106_v57 = vadd.f32 %v1610_v29, %v1544_v2  ;;  %v5108_v43 = vpop.f32.mrf.mxu0  ;;  %v5120_v27 = vpop.f32.mrf.mxu2  ;;  %v6913_v2 = vrot.slane %v4044_v13, 2 }
 0x205   : > { %6912 = vst [vmem:[#allocation54_spill] sm:$0xff] %v5120_v27 }
 0x206   : > { %v5127_v50 = vsel %vm723_vm3, %v6913_v2, %v6699_v35  ;;  %v6918_v2 = vld [vmem:[#allocation2_spill] sm:$0xff]  ;;  %v6921_v35 = vld [vmem:[#allocation3_spill] sm:$0xff] }
 0x207   : > { %3531 = vmatmul.msk.f32.gmra.mxu0 %vm381_vm1, %v6911_v56  ;;  %6914 = vst [vmem:[#allocation15_spill] sm:$0xff] %v5127_v50  ;;  %3567 = vmatmul.msk.f32.gmra.mxu1 %vm381_vm1, %v5127_v50  ;;  %v1131_v50 = vrot.slane %v4799_v36, 1 }
 0x208   : > { %3623 = vmatmul.msk.f32.gmra.mxu3 %vm381_vm1, %v6907_v12 }
 0x20b   : > { %v1613_v29 = vpop.f32.mrf.mxu3 }
 0x20c   : > { %v5131_v48 = vadd.f32 %v1613_v29, %v1545_v25  ;;  %v5133_v0 = vpop.f32.mrf.mxu0  ;;  %v5139_v12 = vpop.f32.mrf.mxu2 }
 0x20d   : > { %6916 = vst [vmem:[#allocation56_spill] sm:$0xff] %v5139_v12 }
 0x20f   : > { %3532 = vmatmul.msk.f32.gmra.mxu0 %vm381_vm1, %v6915_v41 }
 0x210   : > { %3624 = vmatmul.msk.f32.gmra.mxu3 %vm381_vm1, %v6909_v32 }
 0x213   : > { %v5186_v44 = vpop.f32.mrf.mxu3 }
 0x214   : > { %v5141_v27 = vpop.f32.mrf.mxu0  ;;  %v5147_v25 = vpop.f32.mrf.mxu2 }
 0x215   : > { %6917 = vst [vmem:[#allocation20_spill] sm:$0xff] %v5141_v27  ;;  %v5164_v27 = vld [vmem:[%s4019_s7 + $0x108] sm:$0xff] }
 0x216   : > { %6919 = vst [vmem:[#allocation17_spill] sm:$0xff] %v5147_v25  ;;  %3600 = vmatmul.msk.f32.gmra.mxu2 %vm381_vm1, %v5164_v27  ;;  %v1133_v25 = vrot.slane %v5112_v42, 1 }
 0x217   : > { %3533 = vmatmul.msk.f32.gmra.mxu0 %vm381_vm1, %v6918_v2  ;;  %6925 = vst [vmem:[#allocation11_spill] sm:$0xff] %v5164_v27 }
 0x218   : > { %3625 = vmatmul.msk.f32.gmra.mxu3 %vm381_vm1, %v6911_v56  ;;  %v1132_v56 = vsel %vm319_vm2, %v6924_v11, %v1131_v50  ;;  %v1134_v13 = vsel %vm319_vm2, %v1131_v50, %v1133_v25 }
 0x21c   : > { %v5149_v29 = vpop.f32.mrf.mxu0  ;;  %v5156_v32 = vpop.f32.mrf.mxu2 }
 0x21d   : > { %6920 = vst [vmem:[#allocation57_spill] sm:$0xff] %v5149_v29 }
 0x21e   : > { %6922 = vst [vmem:[#allocation19_spill] sm:$0xff] %v5156_v32 }
 0x21f   : > { %3534 = vmatmul.msk.f32.gmra.mxu0 %vm381_vm1, %v6921_v35 }
 0x220   : > { %3626 = vmatmul.msk.f32.gmra.mxu3 %vm381_vm1, %v6915_v41 }
 0x224   : > { %v5158_v12 = vpop.f32.mrf.mxu0  ;;  %v5172_v41 = vpop.f32.mrf.mxu2 }
 0x225   : > { %6923 = vst [vmem:[#allocation61_spill] sm:$0xff] %v5158_v12  ;;  %v5177_v12 = vpop.f32.mrf.mxu1 }
 0x226   : > { %6926 = vst [vmem:[#allocation46_spill] sm:$0xff] %v5172_v41 }
 0x227   : > { %3535 = vmatmul.msk.f32.gmra.mxu0 %vm381_vm1, %v1132_v56 }
 0x228   : > { %3627 = vmatmul.msk.f32.gmra.mxu3 %vm381_vm1, %v6918_v2 }
 0x22c   : > { %v5174_v32 = vpop.f32.mrf.mxu0  ;;  %v5182_v11 = vpop.f32.mrf.mxu2 }
 0x22d   : > { %6927 = vst [vmem:[#allocation24_spill] sm:$0xff] %v5174_v32  ;;  %v5190_v2 = vpop.f32.mrf.mxu1  ;;  %v5197_v32 = vpop.f32.mrf.mxu3 }
 0x22e   : > { %6928 = vst [vmem:[#allocation21_spill] sm:$0xff] %v5182_v11 }
 0x22f   : > { %3536 = vmatmul.msk.f32.gmra.mxu0 %vm381_vm1, %v1134_v13 }
 0x230   : > { %3628 = vmatmul.msk.f32.gmra.mxu3 %vm381_vm1, %v6921_v35  ;;  %v1573_v35 = vrot.slane %v5164_v27, 1 }
 0x234   : > { %v5184_v29 = vpop.f32.mrf.mxu0  ;;  %v5195_v41 = vpop.f32.mrf.mxu2 }
 0x235   : > { %6929 = vst [vmem:[#allocation60_spill] sm:$0xff] %v5184_v29  ;;  %v5203_v11 = vpop.f32.mrf.mxu1  ;;  %v1574_v29 = vsel %vm319_vm2, %v1133_v25, %v1573_v35 }
 0x236   : > { %6931 = vst [vmem:[#allocation28_spill] sm:$0xff] %v5195_v41  ;;  %v5213_v41 = vpop.f32.mrf.mxu3 }
 0x237   : > { %3635 = vmatmul.msk.f32.vlgmr.msrb.gmra.mxu0 %vm381_vm1, %v4620_v9 }
 0x238   : > { %3629 = vmatmul.msk.f32.gmra.mxu3 %vm381_vm1, %v1132_v56 }
 0x23c   : > { %v5193_v50 = vpop.f32.mrf.mxu0  ;;  %v5208_v56 = vpop.f32.mrf.mxu2 }
 0x23d   : > { %6930 = vst [vmem:[#allocation23_spill] sm:$0xff] %v5193_v50 }
 0x23e   : > { %6933 = vst [vmem:[#allocation64_spill] sm:$0xff] %v5208_v56 }
 0x23f   : > { %3636 = vmatmul.msk.f32.gmra.mxu0 %vm381_vm1, %v4641_v30  ;;  %v5215_v30 = vpop.f32.mrf.mxu1 }
 0x240   : > { %3630 = vmatmul.msk.f32.gmra.mxu3 %vm381_vm1, %v1134_v13 }
 0x244   : > { %v5205_v9 = vpop.f32.mrf.mxu0  ;;  %v5221_v50 = vpop.f32.mrf.mxu2 }
 0x245   : > { %6932 = vst [vmem:[#allocation25_spill] sm:$0xff] %v5205_v9  ;;  %v5223_v9 = vpop.f32.mrf.mxu3 }
 0x246   : > { %6935 = vst [vmem:[#allocation29_spill] sm:$0xff] %v5221_v50 }
 0x247   : > { %3637 = vmatmul.msk.f32.gmra.mxu0 %vm381_vm1, %v4671_v19  ;;  %v5227_v56 = vpop.f32.mrf.mxu1 }
 0x248   : > { %3631 = vmatmul.msk.f32.gmra.mxu3 %vm381_vm1, %v1574_v29 }
 0x24c   : > { %v5217_v13 = vpop.f32.mrf.mxu0  ;;  %v5231_v19 = vpop.f32.mrf.mxu2 }
 0x24d   : > { %6934 = vst [vmem:[#allocation32_spill] sm:$0xff] %v5217_v13  ;;  %v5235_v27 = vpop.f32.mrf.mxu3 }
 0x24e   : > { %6937 = vst [vmem:[#allocation38_spill] sm:$0xff] %v5231_v19 }
 0x24f   : > { %3638 = vmatmul.msk.f32.gmra.mxu0 %vm381_vm1, %v4695_v3  ;;  %v5239_v3 = vpop.f32.mrf.mxu1 }
 0x254   : > { %v5225_v25 = vpop.f32.mrf.mxu0  ;;  %v5243_v13 = vpop.f32.mrf.mxu2 }
 0x255   : > { %6936 = vst [vmem:[#allocation35_spill] sm:$0xff] %v5225_v25  ;;  %v5245_v25 = vpop.f32.mrf.mxu3 }
 0x256   : > { %6940 = vst [vmem:[#allocation48_spill] sm:$0xff] %v5243_v13 }
 0x257   : > { %3639 = vmatmul.msk.f32.gmra.mxu0 %vm381_vm1, %v4713_v38  ;;  %6941 = vst [vmem:[#allocation2_spill] sm:$0xff] %v5245_v25  ;;  %v5249_v38 = vpop.f32.mrf.mxu1 }
 0x258   : > { %6942 = vst [vmem:[#allocation3_spill] sm:$0xff] %v5249_v38 }
 0x25c   : > { %v5233_v29 = vpop.f32.mrf.mxu0 }
 0x25d   : > { %6938 = vst [vmem:[#allocation41_spill] sm:$0xff] %v5233_v29  ;;  %v3714_v29 = vld [vmem:[%s6641_s3 + $0x10] sm:$0xff]  ;;  %v5260_v13 = vpop.f32.mrf.mxu3 }
 0x25e   : > { %2395 = vmatpush.msra.mxu3 %v3714_v29 }
 0x25f   : > { %3640 = vmatmul.msk.f32.gmra.mxu0 %vm381_vm1, %v4734_v23  ;;  %v5256_v23 = vpop.f32.mrf.mxu2 }
 0x260   : > { %6944 = vst [vmem:[#allocation116_spill] sm:$0xff] %v5256_v23 }
 0x264   : > { %v5241_v50 = vpop.f32.mrf.mxu0 }
 0x265   : > { %6939 = vst [vmem:[#allocation44_spill] sm:$0xff] %v5241_v50  ;;  %v5262_v50 = vpop.f32.mrf.mxu1 }
 0x267   : > { %3641 = vmatmul.msk.f32.gmra.mxu0 %vm381_vm1, %v4114_v33  ;;  %v5268_v33 = vpop.f32.mrf.mxu2 }
 0x268   : > { %6946 = vst [vmem:[#allocation118_spill] sm:$0xff] %v5268_v33 }
 0x26c   : > { %v5251_v19 = vpop.f32.mrf.mxu0 }
 0x26d   : > { %6943 = vst [vmem:[#allocation115_spill] sm:$0xff] %v5251_v19  ;;  %v5270_v19 = vpop.f32.mrf.mxu3  ;;  %v5274_v23 = vpop.f32.mrf.mxu1 }
 0x26e   : > { %6948 = vst [vmem:[#allocation120_spill] sm:$0xff] %v5274_v23 }
 0x26f   : > { %3642 = vmatmul.msk.f32.gmra.mxu0 %vm381_vm1, %v4139_v40  ;;  %v5278_v40 = vpop.f32.mrf.mxu2 }
 0x270   : > { %6949 = vst [vmem:[#allocation121_spill] sm:$0xff] %v5278_v40 }
 0x274   : > { %v5264_v25 = vpop.f32.mrf.mxu0 }
 0x275   : > { %6945 = vst [vmem:[#allocation117_spill] sm:$0xff] %v5264_v25  ;;  %v5282_v25 = vpop.f32.mrf.mxu3 }
 0x277   : > { %3643 = vmatmul.msk.f32.gmra.mxu0 %vm381_vm1, %v4164_v47  ;;  %v5286_v47 = vpop.f32.mrf.mxu1 }
 0x278   : > { %6951 = vst [vmem:[#allocation123_spill] sm:$0xff] %v5286_v47  ;;  %v5308_v47 = vld [vmem:[%s4019_s7 + $0x110] sm:$0xff] }
 0x27c   : > { %v5272_v38 = vpop.f32.mrf.mxu0 }
 0x27d   : > { %6947 = vst [vmem:[#allocation119_spill] sm:$0xff] %v5272_v38  ;;  %v5290_v38 = vpop.f32.mrf.mxu2  ;;  %v5292_v23 = vpop.f32.mrf.mxu3 }
 0x27e   : > { %6953 = vst [vmem:[#allocation125_spill] sm:$0xff] %v5290_v38 }
 0x27f   : > { %3644 = vmatmul.msk.f32.gmra.mxu0 %vm381_vm1, %v4189_v54  ;;  %6954 = vst [vmem:[#allocation126_spill] sm:$0xff] %v5292_v23  ;;  %v5296_v54 = vpop.f32.mrf.mxu1 }
 0x284   : > { %v5280_v29 = vpop.f32.mrf.mxu0 }
 0x285   : > { %6950 = vst [vmem:[#allocation122_spill] sm:$0xff] %v5280_v29  ;;  %v5300_v29 = vpop.f32.mrf.mxu2 }
 0x286   : > { %6956 = vst [vmem:[#allocation128_spill] sm:$0xff] %v5300_v29 }
 0x287   : > { %3645 = vmatmul.msk.f32.gmra.mxu0 %vm381_vm1, %v4217_v62  ;;  %v5304_v62 = vpop.f32.mrf.mxu3  ;;  %v5310_v38 = vpop.f32.mrf.mxu1 }
 0x288   : > { %6957 = vst [vmem:[#allocation129_spill] sm:$0xff] %v5304_v62 }
 0x289   : > { %6958 = vst [vmem:[#allocation130_spill] sm:$0xff] %v5310_v38 }
 0x28c   : > { %v5288_v33 = vpop.f32.mrf.mxu0 }
 0x28d   : > { %6952 = vst [vmem:[#allocation124_spill] sm:$0xff] %v5288_v33  ;;  %v6702_v33 = vrot.slane %v5112_v42, 2  ;;  %v5327_v38 = vpop.f32.mrf.mxu2 }
 0x28e   : > { %6961 = vst [vmem:[#allocation132_spill] sm:$0xff] %v5327_v38 }
 0x28f   : > { %3646 = vmatmul.msk.f32.gmra.mxu0 %vm381_vm1, %v4240_v7  ;;  %v1575_v7 = vrot.slane %v5308_v47, 1 }
 0x294   : > { %v5298_v40 = vpop.f32.mrf.mxu0 }
 0x295   : > { %6955 = vst [vmem:[#allocation127_spill] sm:$0xff] %v5298_v40  ;;  %v6960_v40 = vrot.slane %v4799_v36, 2  ;;  %v3764_v36 = vld [vmem:[%s6641_s3 + $0x20] sm:$0xff] }
 0x296   : > { %2639 = vmatpush.msrb.mxu2 %v3764_v36  ;;  %v5353_v36 = vld [vmem:[%s6640_s2] ss:$0 sm:$0xff] }
 0x297   : > { %3647 = vmatmul.msk.f32.gmra.mxu0 %vm381_vm1, %v4262_v24  ;;  %v5320_v29 = vsel %vm723_vm3, %v6960_v40, %v6702_v33  ;;  %v1576_v24 = vsel %vm319_vm2, %v1573_v35, %v1575_v7  ;;  %v5337_v35 = vpop.f32.mrf.mxu1  ;;  %v3739_v40 = vld [vmem:[%s6641_s3 + $0x18] sm:$0xff] }
 0x298   : > { %3568 = vmatmul.msk.f32.gmra.mxu1 %vm381_vm1, %v5320_v29  ;;  %3632 = vmatmul.msk.f32.gmra.mxu3 %vm381_vm1, %v1576_v24  ;;  %6964 = vst [vmem:[#allocation135_spill] sm:$0xff] %v5337_v35 }
 0x299   : > { %2515 = vmatpush.msrb.mxu1 %v3739_v40 }
 0x29c   : > { %v5312_v23 = vpop.f32.mrf.mxu0 }
 0x29d   : > { %6959 = vst [vmem:[#allocation131_spill] sm:$0xff] %v5312_v23  ;;  %v5330_v23 = vpop.f32.mrf.mxu3 }
 0x29e   : > { %6962 = vst [vmem:[#allocation133_spill] sm:$0xff] %v5330_v23 }
 0x29f   : > { %3648 = vmatmul.msk.f32.gmra.mxu0 %vm381_vm1, %v4281_v45  ;;  %v1539_v45 = vpop.f32.mrf.mxu2  ;;  %v5348_v33 = vpop.f32.mrf.mxu1 }
 0x2a0   : > { %6966 = vst [vmem:[#allocation137_spill] sm:$0xff] %v5348_v33 }
 0x2a4   : > { %v5332_v62 = vpop.f32.mrf.mxu0 }
 0x2a5   : > { %6963 = vst [vmem:[#allocation134_spill] sm:$0xff] %v5332_v62  ;;  %v5344_v24 = vpop.f32.mrf.mxu3 }
 0x2a6   : > { %6965 = vst [vmem:[#allocation136_spill] sm:$0xff] %v5344_v24 }
 0x2a7   : > { %3649 = vmatmul.msk.f32.gmra.mxu0 %vm381_vm1, %v4300_v60 }
 0x2ac   : > { %v1246_v7 = vpop.f32.mrf.mxu0 }
 0x2ad   : > { %v5356_v38 = vpop.f32.mrf.mxu3 }
 0x2ae   : > { %6967 = vst [vmem:[#allocation138_spill] sm:$0xff] %v5356_v38 }
 0x2af   : > { %3650 = vmatmul.msk.f32.gmra.mxu0 %vm381_vm1, %v4316_v17  ;;  %v5361_v17 = vpop.f32.mrf.mxu1 }
 0x2b0   : > { %6968 = vst [vmem:[#allocation139_spill] sm:$0xff] %v5361_v17 }
 0x2b4   : > { %v1749_v60 = vpop.f32.mrf.mxu0 }
 0x2b5   : > { %v1838_v45 = vadd.f32 %v1749_v60, %v5068_v49  ;;  %v5368_v49 = vpop.f32.mrf.mxu3 }
 0x2b7   : > { %v1871_v40 = vadd.f32 %v5353_v36, %v1838_v45  ;;  %3651 = vmatmul.msk.f32.gmra.mxu0 %vm381_vm1, %v6865_v52 }
 0x2b9   : > { %v1900_v7 = vmax.f32 %v1871_v40, 0.0  ;;  %v5371_v40 = vpop.f32.mrf.mxu1 }
 0x2bb   : > { %3690 = vmatmul.msk.f32.vlgmr.msra.gmra.mxu2 %vm2006_vm4, %v1900_v7  ;;  %v1957_v45 = vrot.slane %v1900_v7, 1  ;;  %v2283_v38 = vrot.slane %v1900_v7, 2 }
 0x2bc   : > { %v1752_v62 = vpop.f32.mrf.mxu0 }
 0x2bd   : > { %v1839_v33 = vadd.f32 %v1752_v62, %v5082_v61  ;;  %v6969_v62 = vld [vmem:[#allocation27_spill] sm:$0xff] }
 0x2bf   : > { %v1872_v24 = vadd.f32 %v5353_v36, %v1839_v33  ;;  %3652 = vmatmul.msk.f32.gmra.mxu0 %vm381_vm1, %v6869_v63 }
 0x2c1   : > { %v1901_v60 = vmax.f32 %v1872_v24, 0.0  ;;  %v648_v24 = vadd.f32 %v4679_v18, %v6969_v62  ;;  %v6971_v62 = vld [vmem:[#allocation31_spill] sm:$0xff] }
 0x2c3   : > { %v1958_v52 = vrot.slane %v1901_v60, 1  ;;  %v2284_v35 = vrot.slane %v1901_v60, 2  ;;  %3691 = vmatmul.msk.f32.gmra.mxu2 %vm2006_vm4, %v1901_v60 }
 0x2c4   : > { %v1755_v17 = vpop.f32.mrf.mxu0 }
 0x2c5   : > { %v1840_v23 = vadd.f32 %v1755_v17, %v5094_v1  ;;  %v1959_v61 = vsel %vm319_vm2, %v1957_v45, %v1958_v52  ;;  %v2285_v33 = vsel %vm723_vm3, %v2283_v38, %v2284_v35  ;;  %v959_v1 = vadd.f32 %v4919_v4, %v648_v24  ;;  %v5386_v17 = vpop.f32.mrf.mxu3  ;;  %v6970_v4 = vld [vmem:[#allocation68_spill] sm:$0xff]  ;;  %v6972_v24 = vld [vmem:[#allocation73_spill] sm:$0xff] }
 0x2c6   : > { %3666 = vmatmul.msk.f32.vlgmr.msra.gmra.mxu1 %vm2006_vm4, %v1959_v61  ;;  %3715 = vmatmul.msk.f32.vlgmr.msra.gmra.mxu3 %vm2006_vm4, %v2285_v33  ;;  %v5395_v61 = vpop.f32.mrf.mxu1 }
 0x2c7   : > { %v1873_v63 = vadd.f32 %v5353_v36, %v1840_v23  ;;  %3653 = vmatmul.msk.f32.gmra.mxu0 %vm381_vm1, %v6873_v55  ;;  %v1104_v33 = vadd.f32 %v6970_v4, %v959_v1 }
 0x2c9   : > { %v5383_v7 = vmax.f32 %v1873_v63, 0.0 }
 0x2cb   : > { %3692 = vmatmul.msk.f32.gmra.mxu2 %vm2006_vm4, %v5383_v7  ;;  %v1960_v38 = vrot.slane %v5383_v7, 1  ;;  %v2286_v60 = vrot.slane %v5383_v7, 2 }
 0x2cc   : > { %v1758_v23 = vpop.f32.mrf.mxu0 }
 0x2cd   : > { %v1841_v45 = vadd.f32 %v1758_v23, %v5106_v57  ;;  %v1961_v55 = vsel %vm319_vm2, %v1958_v52, %v1960_v38  ;;  %v2287_v18 = vsel %vm723_vm3, %v2284_v35, %v2286_v60  ;;  %v651_v57 = vadd.f32 %v6972_v24, %v6971_v62 }
 0x2ce   : > { %3667 = vmatmul.msk.f32.gmra.mxu1 %vm2006_vm4, %v1961_v55  ;;  %3716 = vmatmul.msk.f32.gmra.mxu3 %vm2006_vm4, %v2287_v18  ;;  %v1253_v52 = vadd.f32 %v5070_v37, %v1104_v33 }
 0x2cf   : > { %v1874_v63 = vadd.f32 %v5353_v36, %v1841_v45  ;;  %3654 = vmatmul.msk.f32.gmra.mxu0 %vm381_vm1, %v6877_v28  ;;  %v960_v35 = vadd.f32 %v4933_v10, %v651_v57  ;;  %v5414_v28 = vpop.f32.mrf.mxu3  ;;  %v6973_v10 = vld [vmem:[#allocation71_spill] sm:$0xff] }
 0x2d0   : > { %v1401_v18 = vadd.f32 %v5177_v12, %v1253_v52 }
 0x2d1   : > { %v5406_v23 = vmax.f32 %v1874_v63, 0.0  ;;  %v1105_v63 = vadd.f32 %v6973_v10, %v960_v35 }
 0x2d3   : > { %3693 = vmatmul.msk.f32.gmra.mxu2 %vm2006_vm4, %v5406_v23  ;;  %v1962_v55 = vrot.slane %v5406_v23, 1  ;;  %v2288_v1 = vrot.slane %v5406_v23, 2  ;;  %v1254_v24 = vadd.f32 %v5084_v53, %v1105_v63 }
 0x2d4   : > { %v1761_v45 = vpop.f32.mrf.mxu0 }
 0x2d5   : > { %v1842_v4 = vadd.f32 %v1761_v45, %v5131_v48  ;;  %v5418_v37 = vsel %vm319_vm2, %v1960_v38, %v1962_v55  ;;  %v5421_v33 = vsel %vm723_vm3, %v2286_v60, %v2288_v1  ;;  %v5431_v48 = vpop.f32.mrf.mxu1  ;;  %v6974_v38 = vld [vmem:[#allocation34_spill] sm:$0xff]  ;;  %v1546_v60 = vadd.f32 %v5020_v51, %v1401_v18 }
 0x2d6   : > { %3668 = vmatmul.msk.f32.gmra.mxu1 %vm2006_vm4, %v5418_v37  ;;  %3717 = vmatmul.msk.f32.gmra.mxu3 %vm2006_vm4, %v5421_v33  ;;  %v654_v62 = vadd.f32 %v4727_v16, %v6974_v38  ;;  %v1402_v16 = vadd.f32 %v5190_v2, %v1254_v24  ;;  %v6976_v2 = vld [vmem:[#allocation37_spill] sm:$0xff] }
 0x2d7   : > { %v1875_v12 = vadd.f32 %v5353_v36, %v1842_v4  ;;  %3655 = vmatmul.msk.f32.gmra.mxu0 %vm381_vm1, %v6881_v22  ;;  %v1695_v35 = vadd.f32 %v5186_v44, %v1546_v60  ;;  %v5457_v18 = vpop.f32.mrf.mxu3 }
 0x2d8   : > { %v961_v52 = vadd.f32 %v4947_v31, %v654_v62  ;;  %v6975_v31 = vld [vmem:[#allocation74_spill] sm:$0xff] }
 0x2d9   : > { %v5437_v57 = vmax.f32 %v1875_v12, 0.0 }
 0x2da   : > { %v1106_v44 = vadd.f32 %v6975_v31, %v961_v52 }
 0x2db   : > { %3694 = vmatmul.msk.f32.gmra.mxu2 %vm2006_vm4, %v5437_v57  ;;  %v1964_v22 = vrot.slane %v5437_v57, 1  ;;  %v2290_v45 = vrot.slane %v5437_v57, 2 }
 0x2dc   : > { %v1764_v4 = vpop.f32.mrf.mxu0  ;;  %v1255_v12 = vadd.f32 %v5096_v6, %v1106_v44 }
 0x2dd   : > { %v1843_v10 = vadd.f32 %v1764_v4, %v1695_v35  ;;  %v5447_v51 = vsel %vm319_vm2, %v1962_v55, %v1964_v22  ;;  %v5450_v53 = vsel %vm723_vm3, %v2288_v1, %v2290_v45  ;;  %v657_v55 = vadd.f32 %v4750_v14, %v6976_v2  ;;  %v5468_v62 = vpop.f32.mrf.mxu1 }
 0x2de   : > { %3669 = vmatmul.msk.f32.gmra.mxu1 %vm2006_vm4, %v5447_v51  ;;  %3718 = vmatmul.msk.f32.gmra.mxu3 %vm2006_vm4, %v5450_v53  ;;  %v1547_v1 = vadd.f32 %v5038_v58, %v1402_v16  ;;  %v1403_v58 = vadd.f32 %v5203_v11, %v1255_v12  ;;  %v6978_v11 = vld [vmem:[#allocation40_spill] sm:$0xff] }
 0x2df   : > { %v1876_v63 = vadd.f32 %v5353_v36, %v1843_v10  ;;  %3656 = vmatmul.msk.f32.gmra.mxu0 %vm381_vm1, %v6887_v5  ;;  %v962_v60 = vadd.f32 %v4961_v46, %v657_v55  ;;  %v6977_v46 = vld [vmem:[#allocation77_spill] sm:$0xff]  ;;  %v5495_v31 = vpop.f32.mrf.mxu3 }
 0x2e0   : > { %v1696_v24 = vadd.f32 %v5197_v32, %v1547_v1  ;;  %v1548_v10 = vadd.f32 %v5055_v8, %v1403_v58 }
 0x2e1   : > { %v5466_v38 = vmax.f32 %v1876_v63, 0.0  ;;  %v1107_v32 = vadd.f32 %v6977_v46, %v962_v60 }
 0x2e2   : > { %v1697_v2 = vadd.f32 %v5213_v41, %v1548_v10 }
 0x2e3   : > { %3695 = vmatmul.msk.f32.gmra.mxu2 %vm2006_vm4, %v5466_v38  ;;  %v1966_v5 = vrot.slane %v5466_v38, 1  ;;  %v2292_v52 = vrot.slane %v5466_v38, 2 }
 0x2e4   : > { %v1767_v14 = vpop.f32.mrf.mxu0 }
 0x2e5   : > { %v1844_v35 = vadd.f32 %v1767_v14, %v1696_v24  ;;  %v5478_v6 = vsel %vm319_vm2, %v1964_v22, %v1966_v5  ;;  %v5481_v4 = vsel %vm723_vm3, %v2290_v45, %v2292_v52  ;;  %v660_v22 = vadd.f32 %v4772_v21, %v6978_v11  ;;  %v5505_v21 = vpop.f32.mrf.mxu1  ;;  %v6980_v24 = vld [vmem:[#allocation87_spill] sm:$0xff] }
 0x2e6   : > { %3670 = vmatmul.msk.f32.gmra.mxu1 %vm2006_vm4, %v5478_v6  ;;  %3719 = vmatmul.msk.f32.gmra.mxu3 %vm2006_vm4, %v5481_v4  ;;  %v1256_v45 = vadd.f32 %v5108_v43, %v1107_v32  ;;  %v6981_v32 = vld [vmem:[#allocation45_spill] sm:$0xff] }
 0x2e7   : > { %v1877_v16 = vadd.f32 %v5353_v36, %v1844_v35  ;;  %3657 = vmatmul.msk.f32.gmra.mxu0 %vm381_vm1, %v6895_v20  ;;  %v963_v63 = vadd.f32 %v4979_v26, %v660_v22  ;;  %v5529_v46 = vpop.f32.mrf.mxu3 }
 0x2e8   : > { %v1404_v43 = vadd.f32 %v5215_v30, %v1256_v45  ;;  %v6979_v30 = vld [vmem:[#allocation43_spill] sm:$0xff]  ;;  %v6984_v45 = vld [vmem:[#allocation82_spill] sm:$0xff] }
 0x2e9   : > { %v5497_v44 = vmax.f32 %v1877_v16, 0.0  ;;  %v1108_v41 = vadd.f32 %v4746_v39, %v963_v63 }
 0x2ea   : > { %v1549_v14 = vadd.f32 %v5066_v59, %v1404_v43 }
 0x2eb   : > { %3696 = vmatmul.msk.f32.gmra.mxu2 %vm2006_vm4, %v5497_v44  ;;  %v1968_v20 = vrot.slane %v5497_v44, 1  ;;  %v2294_v55 = vrot.slane %v5497_v44, 2 }
 0x2ec   : > { %v1770_v8 = vpop.f32.mrf.mxu0  ;;  %v1698_v35 = vadd.f32 %v5223_v9, %v1549_v14  ;;  %v6989_v14 = vld [vmem:[#allocation49_spill] sm:$0xff] }
 0x2ed   : > { %v1845_v1 = vadd.f32 %v1770_v8, %v1697_v2  ;;  %v5509_v12 = vsel %vm319_vm2, %v1966_v5, %v1968_v20  ;;  %v5512_v26 = vsel %vm723_vm3, %v2292_v52, %v2294_v55  ;;  %v663_v5 = vadd.f32 %v6980_v24, %v6979_v30  ;;  %v5543_v10 = vpop.f32.mrf.mxu1 }
 0x2ee   : > { %3671 = vmatmul.msk.f32.gmra.mxu1 %vm2006_vm4, %v5509_v12  ;;  %3720 = vmatmul.msk.f32.gmra.mxu3 %vm2006_vm4, %v5512_v26  ;;  %v1257_v52 = vadd.f32 %v5133_v0, %v1108_v41  ;;  %6983 = vst [vmem:[#allocation68_spill] sm:$0xff] %v5543_v10 }
 0x2ef   : > { %v1878_v60 = vadd.f32 %v5353_v36, %v1845_v1  ;;  %3658 = vmatmul.msk.f32.gmra.mxu0 %vm381_vm1, %v6900_v15  ;;  %v964_v16 = vadd.f32 %v6981_v32, %v663_v5  ;;  %v6988_v1 = vld [vmem:[#allocation20_spill] sm:$0xff]  ;;  %v5566_v32 = vpop.f32.mrf.mxu3 }
 0x2f0   : > { %v1405_v59 = vadd.f32 %v5227_v56, %v1257_v52  ;;  %v6985_v56 = vld [vmem:[#allocation47_spill] sm:$0xff]  ;;  %6990 = vst [vmem:[#allocation31_spill] sm:$0xff] %v5566_v32 }
 0x2f1   : > { %v5526_v58 = vmax.f32 %v1878_v60, 0.0  ;;  %v1109_v63 = vadd.f32 %v6984_v45, %v964_v16 }
 0x2f3   : > { %3697 = vmatmul.msk.f32.gmra.mxu2 %vm2006_vm4, %v5526_v58  ;;  %v1970_v39 = vrot.slane %v5526_v58, 1  ;;  %v2296_v15 = vrot.slane %v5526_v58, 2  ;;  %v1258_v41 = vadd.f32 %v6988_v1, %v1109_v63  ;;  %v6994_v63 = vld [vmem:[#allocation50_spill] sm:$0xff] }
 0x2f4   : > { %v1773_v11 = vpop.f32.mrf.mxu0  ;;  %v6999_v1 = vld [vmem:[#allocation2_spill] sm:$0xff] }
 0x2f5   : > { %v1846_v22 = vadd.f32 %v1773_v11, %v1698_v35  ;;  %v5538_v0 = vsel %vm319_vm2, %v1968_v20, %v1970_v39  ;;  %v5541_v9 = vsel %vm723_vm3, %v2294_v55, %v2296_v15  ;;  %v6986_v20 = vld [vmem:[#allocation92_spill] sm:$0xff]  ;;  %v1406_v35 = vadd.f32 %v5239_v3, %v1258_v41  ;;  %v6993_v3 = vld [vmem:[#allocation66_spill] sm:$0xff] }
 0x2f6   : > { %6982 = vst [vmem:[#allocation27_spill] sm:$0xff] %v5538_v0  ;;  %3672 = vmatmul.msk.f32.gmra.mxu1 %vm2006_vm4, %v5538_v0  ;;  %3721 = vmatmul.msk.f32.gmra.mxu3 %vm2006_vm4, %v5541_v9  ;;  %v666_v8 = vadd.f32 %v6986_v20, %v6985_v56  ;;  %v6987_v55 = vld [vmem:[#allocation12_spill] sm:$0xff]  ;;  %v5584_v56 = vpop.f32.mrf.mxu1 }
 0x2f7   : > { %v1879_v2 = vadd.f32 %v5353_v36, %v1846_v22  ;;  %3659 = vmatmul.msk.f32.gmra.mxu0 %vm381_vm1, %v6903_v34  ;;  %v1550_v43 = vadd.f32 %v6987_v55, %v1405_v59  ;;  %v6992_v59 = vld [vmem:[#allocation85_spill] sm:$0xff]  ;;  %6996 = vst [vmem:[#allocation71_spill] sm:$0xff] %v5584_v56 }
 0x2f8   : > { %v965_v34 = vadd.f32 %v6989_v14, %v666_v8  ;;  %v6998_v8 = vld [vmem:[#allocation57_spill] sm:$0xff] }
 0x2f9   : > { %v5557_v60 = vmax.f32 %v1879_v2, 0.0  ;;  %v1699_v30 = vadd.f32 %v5235_v27, %v1550_v43  ;;  %v6995_v2 = vld [vmem:[#allocation97_spill] sm:$0xff] }
 0x2fa   : > { %v1110_v22 = vadd.f32 %v6992_v59, %v965_v34  ;;  %v7000_v34 = vld [vmem:[#allocation51_spill] sm:$0xff] }
 0x2fb   : > { %3698 = vmatmul.msk.f32.gmra.mxu2 %vm2006_vm4, %v5557_v60  ;;  %v1972_v24 = vrot.slane %v5557_v60, 1  ;;  %v2298_v5 = vrot.slane %v5557_v60, 2  ;;  %v7001_v59 = vld [vmem:[#allocation3_spill] sm:$0xff] }
 0x2fc   : > { %v1776_v52 = vpop.f32.mrf.mxu0  ;;  %v1259_v55 = vadd.f32 %v6998_v8, %v1110_v22  ;;  %v7008_v8 = vld [vmem:[#allocation100_spill] sm:$0xff] }
 0x2fd   : > { %v1847_v16 = vadd.f32 %v1776_v52, %v1699_v30  ;;  %v5569_v11 = vsel %vm319_vm2, %v1970_v39, %v1972_v24  ;;  %v5572_v27 = vsel %vm723_vm3, %v2296_v15, %v2298_v5  ;;  %v669_v39 = vadd.f32 %v6995_v2, %v6994_v63  ;;  %v6997_v15 = vld [vmem:[#allocation16_spill] sm:$0xff] }
 0x2fe   : > { %6991 = vst [vmem:[#allocation73_spill] sm:$0xff] %v5569_v11  ;;  %3673 = vmatmul.msk.f32.gmra.mxu1 %vm2006_vm4, %v5569_v11  ;;  %3722 = vmatmul.msk.f32.gmra.mxu3 %vm2006_vm4, %v5572_v27  ;;  %v1551_v20 = vadd.f32 %v6997_v15, %v1406_v35  ;;  %v7004_v2 = vld [vmem:[#allocation88_spill] sm:$0xff]  ;;  %v5611_v15 = vpop.f32.mrf.mxu3  ;;  %v5622_v56 = vpop.f32.mrf.mxu1 }
 0x2ff   : > { %v1880_v45 = vadd.f32 %v5353_v36, %v1847_v16  ;;  %3660 = vmatmul.msk.f32.gmra.mxu0 %vm381_vm1, %v6993_v3  ;;  %v966_v52 = vadd.f32 %v7000_v34, %v669_v39  ;;  %v1407_v3 = vadd.f32 %v7001_v59, %v1259_v55  ;;  %7005 = vst [vmem:[#allocation37_spill] sm:$0xff] %v5611_v15  ;;  %v7010_v34 = vld [vmem:[#allocation61_spill] sm:$0xff] }
 0x300   : > { %v1700_v41 = vadd.f32 %v6999_v1, %v1551_v20  ;;  %v7006_v20 = vld [vmem:[#allocation15_spill] sm:$0xff]  ;;  %v7009_v1 = vld [vmem:[#allocation14_spill] sm:$0xff]  ;;  %7011 = vst [vmem:[#allocation77_spill] sm:$0xff] %v5622_v56 }
 0x301   : > { %v5588_v43 = vmax.f32 %v1880_v45, 0.0  ;;  %v3814_v45 = vld [vmem:[%s6641_s3 + $0x30] sm:$0xff]  ;;  %v1111_v39 = vadd.f32 %v7004_v2, %v966_v52 }
 0x302   : > { %2882 = vmatpush.msra.mxu0 %v3814_v45 }
 0x303   : > { %3699 = vmatmul.msk.f32.gmra.mxu2 %vm2006_vm4, %v5588_v43  ;;  %v1974_v30 = vrot.slane %v5588_v43, 1  ;;  %v2300_v14 = vrot.slane %v5588_v43, 2 }
 0x304   : > { %v1779_v16 = vpop.f32.mrf.mxu0 }
 0x305   : > { %v1848_v63 = vadd.f32 %v1779_v16, %v1700_v41  ;;  %v5598_v35 = vsel %vm319_vm2, %v1972_v24, %v1974_v30  ;;  %v5601_v22 = vsel %vm723_vm3, %v2298_v5, %v2300_v14  ;;  %v7007_v5 = vld [vmem:[#allocation52_spill] sm:$0xff]  ;;  %v1552_v41 = vadd.f32 %v7009_v1, %v1407_v3 }
 0x306   : > { %7002 = vst [vmem:[#allocation34_spill] sm:$0xff] %v5598_v35  ;;  %3674 = vmatmul.msk.f32.gmra.mxu1 %vm2006_vm4, %v5598_v35  ;;  %3723 = vmatmul.msk.f32.gmra.mxu3 %vm2006_vm4, %v5601_v22  ;;  %v672_v55 = vadd.f32 %v7008_v8, %v7007_v5  ;;  %v1260_v16 = vadd.f32 %v7010_v34, %v1111_v39  ;;  %v7018_v34 = vld [vmem:[#allocation11_spill] sm:$0xff]  ;;  %v5650_v56 = vpop.f32.mrf.mxu3 }
 0x307   : > { %7003 = vst [vmem:[#allocation74_spill] sm:$0xff] %v5601_v22  ;;  %v1881_v24 = vadd.f32 %v5353_v36, %v1848_v63  ;;  %3661 = vmatmul.msk.f32.gmra.mxu0 %vm381_vm1, %v7006_v20  ;;  %v1701_v52 = vadd.f32 %v5260_v13, %v1552_v41  ;;  %v7012_v20 = vld [vmem:[#allocation53_spill] sm:$0xff]  ;;  %v7015_v13 = vld [vmem:[#allocation91_spill] sm:$0xff] }
 0x308   : > { %v967_v5 = vadd.f32 %v7012_v20, %v672_v55  ;;  %v1408_v3 = vadd.f32 %v5262_v50, %v1260_v16  ;;  %v7016_v50 = vld [vmem:[#allocation55_spill] sm:$0xff]  ;;  %v1721_v16 = vrot.slane %v7018_v34, 2  ;;  %v7020_v20 = vld [vmem:[#allocation24_spill] sm:$0xff]  ;;  %7021 = vst [vmem:[#allocation87_spill] sm:$0xff] %v5650_v56 }
 0x309   : > { %v5620_v59 = vmax.f32 %v1881_v24, 0.0  ;;  %v7017_v41 = vld [vmem:[#allocation103_spill] sm:$0xff] }
 0x30a   : > { %v1112_v1 = vadd.f32 %v7015_v13, %v967_v5  ;;  %v7022_v13 = vld [vmem:[#allocation59_spill] sm:$0xff] }
 0x30b   : > { %3700 = vmatmul.msk.f32.gmra.mxu2 %vm2006_vm4, %v5620_v59  ;;  %v1976_v63 = vrot.slane %v5620_v59, 1  ;;  %v2302_v2 = vrot.slane %v5620_v59, 2 }
 0x30c   : > { %v1782_v45 = vpop.f32.mrf.mxu0 }
 0x30d   : > { %v1849_v8 = vadd.f32 %v1782_v45, %v1701_v52  ;;  %v5632_v39 = vsel %vm319_vm2, %v1974_v30, %v1976_v63  ;;  %v5635_v24 = vsel %vm723_vm3, %v2300_v14, %v2302_v2  ;;  %v675_v30 = vadd.f32 %v7017_v41, %v7016_v50  ;;  %v7019_v14 = vld [vmem:[#allocation54_spill] sm:$0xff]  ;;  %v5660_v41 = vpop.f32.mrf.mxu1 }
 0x30e   : > { %7013 = vst [vmem:[#allocation40_spill] sm:$0xff] %v5632_v39  ;;  %3675 = vmatmul.msk.f32.gmra.mxu1 %vm2006_vm4, %v5632_v39  ;;  %3724 = vmatmul.msk.f32.gmra.mxu3 %vm2006_vm4, %v5635_v24  ;;  %v1553_v52 = vadd.f32 %v7019_v14, %v1408_v3  ;;  %v1261_v45 = vadd.f32 %v7020_v20, %v1112_v1  ;;  %v7024_v1 = vrot.slane %v5112_v42, 2 }
 0x30f   : > { %7014 = vst [vmem:[#allocation43_spill] sm:$0xff] %v5635_v24  ;;  %v1882_v55 = vadd.f32 %v5353_v36, %v1849_v8  ;;  %3662 = vmatmul.msk.f32.gmra.mxu0 %vm381_vm1, %v5320_v29  ;;  %v968_v50 = vadd.f32 %v7022_v13, %v675_v30  ;;  %v7028_v30 = vld [vmem:[#allocation95_spill] sm:$0xff]  ;;  %v7074_v24 = vld [vmem:[#allocation137_spill] sm:$0xff] }
 0x310   : > { %v1702_v5 = vadd.f32 %v5270_v19, %v1553_v52  ;;  %7023 = vst [vmem:[#allocation45_spill] sm:$0xff] %v5660_v41  ;;  %v1722_v34 = vsel %vm723_vm3, %v7024_v1, %v1721_v16  ;;  %v7031_v1 = vld [vmem:[#allocation56_spill] sm:$0xff] }
 0x311   : > { %v5652_v15 = vmax.f32 %v1882_v55, 0.0  ;;  %v7025_v55 = vld [vmem:[#allocation120_spill] sm:$0xff]  ;;  %v1113_v13 = vadd.f32 %v7028_v30, %v968_v50 }
 0x312   : > { %v1409_v14 = vadd.f32 %v7025_v55, %v1261_v45  ;;  %v7029_v45 = vld [vmem:[#allocation58_spill] sm:$0xff]  ;;  %v7032_v55 = vld [vmem:[#allocation60_spill] sm:$0xff] }
 0x313   : > { %3701 = vmatmul.msk.f32.gmra.mxu2 %vm2006_vm4, %v5652_v15  ;;  %v1978_v29 = vrot.slane %v5652_v15, 1  ;;  %v2304_v8 = vrot.slane %v5652_v15, 2  ;;  %v1262_v41 = vadd.f32 %v7032_v55, %v1113_v13  ;;  %v7035_v13 = vld [vmem:[#allocation123_spill] sm:$0xff] }
 0x314   : > { %v1785_v3 = vpop.f32.mrf.mxu0 }
 0x315   : > { %v1850_v20 = vadd.f32 %v1785_v3, %v1702_v5  ;;  %v5667_v19 = vsel %vm319_vm2, %v1976_v63, %v1978_v29  ;;  %v5670_v52 = vsel %vm723_vm3, %v2302_v2, %v2304_v8  ;;  %v7030_v5 = vld [vmem:[#allocation107_spill] sm:$0xff]  ;;  %v1723_v63 = vrot.slane %v5308_v47, 2 }
 0x316   : > { %7026 = vst [vmem:[#allocation82_spill] sm:$0xff] %v5667_v19  ;;  %3676 = vmatmul.msk.f32.gmra.mxu1 %vm2006_vm4, %v5667_v19  ;;  %3725 = vmatmul.msk.f32.gmra.mxu3 %vm2006_vm4, %v5670_v52  ;;  %v678_v3 = vadd.f32 %v7030_v5, %v7029_v45  ;;  %v1554_v2 = vadd.f32 %v7031_v1, %v1409_v14  ;;  %v1394_v45 = vpop.f32.mrf.mxu1 }
 0x317   : > { %7027 = vst [vmem:[#allocation47_spill] sm:$0xff] %v5670_v52  ;;  %v1883_v42 = vadd.f32 %v5353_v36, %v1850_v20  ;;  %3663 = vmatmul.msk.f32.gmra.mxu0 %vm381_vm1, %v1722_v34  ;;  %v5687_v52 = vpop.f32.mrf.mxu3  ;;  %v7034_v20 = vld [vmem:[#allocation63_spill] sm:$0xff]  ;;  %v1724_v14 = vsel %vm723_vm3, %v1721_v16, %v1723_v63  ;;  %v7043_v45 = vld [vmem:[#allocation126_spill] sm:$0xff] }
 0x318   : > { %v1703_v32 = vadd.f32 %v5282_v25, %v1554_v2  ;;  %7033 = vst [vmem:[#allocation92_spill] sm:$0xff] %v5687_v52  ;;  %v969_v30 = vadd.f32 %v7034_v20, %v678_v3  ;;  %v7038_v3 = vld [vmem:[#allocation99_spill] sm:$0xff] }
 0x319   : > { %v5684_v56 = vmax.f32 %v1883_v42, 0.0  ;;  %v1410_v42 = vadd.f32 %v7035_v13, %v1262_v41  ;;  %v7039_v41 = vld [vmem:[#allocation62_spill] sm:$0xff]  ;;  %v7042_v20 = vld [vmem:[#allocation23_spill] sm:$0xff] }
 0x31a   : > { %v1114_v2 = vadd.f32 %v7038_v3, %v969_v30 }
 0x31b   : > { %3702 = vmatmul.msk.f32.gmra.mxu2 %vm2006_vm4, %v5684_v56  ;;  %v1980_v50 = vrot.slane %v5684_v56, 1  ;;  %v2306_v34 = vrot.slane %v5684_v56, 2 }
 0x31c   : > { %v1788_v47 = vpop.f32.mrf.mxu0 }
 0x31d   : > { %v1851_v5 = vadd.f32 %v1788_v47, %v1703_v32  ;;  %v5697_v25 = vsel %vm319_vm2, %v1978_v29, %v1980_v50  ;;  %v5700_v1 = vsel %vm723_vm3, %v2304_v8, %v2306_v34  ;;  %v7040_v32 = vld [vmem:[#allocation110_spill] sm:$0xff]  ;;  %v7041_v29 = vld [vmem:[#allocation17_spill] sm:$0xff]  ;;  %v1263_v8 = vadd.f32 %v7042_v20, %v1114_v2 }
 0x31e   : > { %7036 = vst [vmem:[#allocation12_spill] sm:$0xff] %v5697_v25  ;;  %3677 = vmatmul.msk.f32.gmra.mxu1 %vm2006_vm4, %v5697_v25  ;;  %3726 = vmatmul.msk.f32.gmra.mxu3 %vm2006_vm4, %v5700_v1  ;;  %v681_v63 = vadd.f32 %v7040_v32, %v7039_v41  ;;  %v1555_v55 = vadd.f32 %v7041_v29, %v1410_v42  ;;  %v7047_v32 = vld [vmem:[#allocation102_spill] sm:$0xff]  ;;  %v7064_v25 = vld [vmem:[#allocation135_spill] sm:$0xff] }
 0x31f   : > { %7037 = vst [vmem:[#allocation20_spill] sm:$0xff] %v5700_v1  ;;  %v1884_v16 = vadd.f32 %v5353_v36, %v1851_v5  ;;  %3664 = vmatmul.msk.f32.gmra.mxu0 %vm381_vm1, %v1724_v14  ;;  %v1688_v3 = vpop.f32.mrf.mxu3  ;;  %v7044_v14 = vld [vmem:[#allocation67_spill] sm:$0xff]  ;;  %v1411_v41 = vadd.f32 %v5296_v54, %v1263_v8  ;;  %v7048_v54 = vld [vmem:[#allocation65_spill] sm:$0xff] }
 0x320   : > { %v1704_v13 = vadd.f32 %v7043_v45, %v1555_v55  ;;  %v970_v52 = vadd.f32 %v7044_v14, %v681_v63  ;;  %v7050_v55 = vld [vmem:[#allocation19_spill] sm:$0xff] }
 0x321   : > { %v5713_v47 = vmax.f32 %v1884_v16, 0.0  ;;  %v1556_v20 = vadd.f32 %v7050_v55, %v1411_v41 }
 0x322   : > { %v1115_v29 = vadd.f32 %v7047_v32, %v970_v52 }
 0x323   : > { %3703 = vmatmul.msk.f32.gmra.mxu2 %vm2006_vm4, %v5713_v47  ;;  %v1982_v30 = vrot.slane %v5713_v47, 1  ;;  %v2308_v5 = vrot.slane %v5713_v47, 2 }
 0x324   : > { %v1791_v1 = vpop.f32.mrf.mxu0 }
 0x325   : > { %v1852_v42 = vadd.f32 %v1791_v1, %v1704_v13  ;;  %v5723_v2 = vsel %vm319_vm2, %v1980_v50, %v1982_v30  ;;  %v5726_v16 = vsel %vm723_vm3, %v2306_v34, %v2308_v5  ;;  %v7049_v1 = vld [vmem:[#allocation112_spill] sm:$0xff]  ;;  %v7051_v34 = vld [vmem:[#allocation25_spill] sm:$0xff] }
 0x326   : > { %7045 = vst [vmem:[#allocation49_spill] sm:$0xff] %v5723_v2  ;;  %3678 = vmatmul.msk.f32.gmra.mxu1 %vm2006_vm4, %v5723_v2  ;;  %3727 = vmatmul.msk.f32.gmra.mxu3 %vm2006_vm4, %v5726_v16  ;;  %v684_v50 = vadd.f32 %v7049_v1, %v7048_v54  ;;  %v1264_v8 = vadd.f32 %v7051_v34, %v1115_v29  ;;  %v7052_v13 = vld [vmem:[#allocation129_spill] sm:$0xff]  ;;  %v7054_v2 = vld [vmem:[#allocation130_spill] sm:$0xff] }
 0x327   : > { %7046 = vst [vmem:[#allocation85_spill] sm:$0xff] %v5726_v16  ;;  %v1885_v63 = vadd.f32 %v5353_v36, %v1852_v42  ;;  %3815 = vmatmul.msk.f32.vlgmr.msra.gmra.mxu0 %vm2006_vm4, %v5437_v57  ;;  %v1705_v3 = vadd.f32 %v7052_v13, %v1556_v20  ;;  %v7053_v42 = vld [vmem:[#allocation70_spill] sm:$0xff] }
 0x328   : > { %v971_v32 = vadd.f32 %v7053_v42, %v684_v50  ;;  %v1412_v54 = vadd.f32 %v7054_v2, %v1264_v8  ;;  %v7058_v2 = vld [vmem:[#allocation69_spill] sm:$0xff]  ;;  %v7060_v20 = vld [vmem:[#allocation46_spill] sm:$0xff] }
 0x329   : > { %v5740_v45 = vmax.f32 %v1885_v63, 0.0  ;;  %v7057_v63 = vld [vmem:[#allocation104_spill] sm:$0xff] }
 0x32a   : > { %v1116_v55 = vadd.f32 %v7057_v63, %v971_v32  ;;  %v1557_v34 = vadd.f32 %v7060_v20, %v1412_v54  ;;  %v7063_v63 = vld [vmem:[#allocation76_spill] sm:$0xff] }
 0x32b   : > { %3704 = vmatmul.msk.f32.gmra.mxu2 %vm2006_vm4, %v5740_v45  ;;  %v1984_v52 = vrot.slane %v5740_v45, 1  ;;  %v2310_v14 = vrot.slane %v5740_v45, 2 }
 0x32c   : > { %v1794_v16 = vpop.f32.mrf.mxu0 }
 0x32d   : > { %v1853_v1 = vadd.f32 %v1794_v16, %v1705_v3  ;;  %v5750_v41 = vsel %vm319_vm2, %v1982_v30, %v1984_v52  ;;  %v5753_v29 = vsel %vm723_vm3, %v2308_v5, %v2310_v14  ;;  %v7059_v16 = vld [vmem:[#allocation4_spill] sm:$0xff]  ;;  %v7062_v3 = vld [vmem:[#allocation133_spill] sm:$0xff] }
 0x32e   : > { %7055 = vst [vmem:[#allocation66_spill] sm:$0xff] %v5750_v41  ;;  %3679 = vmatmul.msk.f32.gmra.mxu1 %vm2006_vm4, %v5750_v41  ;;  %3728 = vmatmul.msk.f32.gmra.mxu3 %vm2006_vm4, %v5753_v29  ;;  %v687_v30 = vadd.f32 %v7059_v16, %v7058_v2  ;;  %v7061_v5 = vld [vmem:[#allocation32_spill] sm:$0xff]  ;;  %v1706_v42 = vadd.f32 %v7062_v3, %v1557_v34  ;;  %v7070_v34 = vld [vmem:[#allocation21_spill] sm:$0xff] }
 0x32f   : > { %7056 = vst [vmem:[#allocation50_spill] sm:$0xff] %v5753_v29  ;;  %v1886_v50 = vadd.f32 %v5353_v36, %v1853_v1  ;;  %3816 = vmatmul.msk.f32.gmra.mxu0 %vm2006_vm4, %v5466_v38  ;;  %v1265_v8 = vadd.f32 %v7061_v5, %v1116_v55 }
 0x330   : > { %v972_v29 = vadd.f32 %v7063_v63, %v687_v30 }
 0x331   : > { %v5767_v13 = vmax.f32 %v1886_v50, 0.0  ;;  %v1413_v2 = vadd.f32 %v7064_v25, %v1265_v8  ;;  %v7067_v50 = vld [vmem:[#allocation106_spill] sm:$0xff]  ;;  %v7068_v25 = vld [vmem:[#allocation72_spill] sm:$0xff] }
 0x332   : > { %v1117_v20 = vadd.f32 %v7067_v50, %v972_v29  ;;  %v7073_v50 = vld [vmem:[#allocation79_spill] sm:$0xff] }
 0x333   : > { %3705 = vmatmul.msk.f32.gmra.mxu2 %vm2006_vm4, %v5767_v13  ;;  %v1986_v32 = vrot.slane %v5767_v13, 1  ;;  %v2312_v1 = vrot.slane %v5767_v13, 2  ;;  %v1558_v5 = vadd.f32 %v7070_v34, %v1413_v2  ;;  %v7077_v34 = vld [vmem:[#allocation109_spill] sm:$0xff] }
 0x334   : > { %v1797_v41 = vpop.f32.mrf.mxu0 }
 0x335   : > { %v1854_v16 = vadd.f32 %v1797_v41, %v1706_v42  ;;  %v5777_v54 = vsel %vm319_vm2, %v1984_v52, %v1986_v32  ;;  %v5780_v55 = vsel %vm723_vm3, %v2310_v14, %v2312_v1  ;;  %v7069_v41 = vld [vmem:[#allocation5_spill] sm:$0xff]  ;;  %v7071_v14 = vld [vmem:[#allocation35_spill] sm:$0xff]  ;;  %v7072_v42 = vld [vmem:[#allocation136_spill] sm:$0xff] }
 0x336   : > { %7065 = vst [vmem:[#allocation97_spill] sm:$0xff] %v5777_v54  ;;  %3680 = vmatmul.msk.f32.gmra.mxu1 %vm2006_vm4, %v5777_v54  ;;  %3729 = vmatmul.msk.f32.gmra.mxu3 %vm2006_vm4, %v5780_v55  ;;  %v690_v52 = vadd.f32 %v7069_v41, %v7068_v25  ;;  %v1266_v8 = vadd.f32 %v7071_v14, %v1117_v20  ;;  %v7080_v14 = vld [vmem:[#allocation28_spill] sm:$0xff] }
 0x337   : > { %7066 = vst [vmem:[#allocation16_spill] sm:$0xff] %v5780_v55  ;;  %v1887_v30 = vadd.f32 %v5353_v36, %v1854_v16  ;;  %3817 = vmatmul.msk.f32.gmra.mxu0 %vm2006_vm4, %v5497_v44  ;;  %v1707_v63 = vadd.f32 %v7072_v42, %v1558_v5 }
 0x338   : > { %v973_v55 = vadd.f32 %v7073_v50, %v690_v52  ;;  %v1414_v25 = vadd.f32 %v7074_v24, %v1266_v8  ;;  %v7078_v24 = vld [vmem:[#allocation75_spill] sm:$0xff]  ;;  %v7081_v8 = vld [vmem:[#allocation41_spill] sm:$0xff]  ;;  %v7082_v50 = vld [vmem:[#allocation138_spill] sm:$0xff] }
 0x339   : > { %v5794_v3 = vmax.f32 %v1887_v30, 0.0 }
 0x33a   : > { %v1118_v5 = vadd.f32 %v7077_v34, %v973_v55  ;;  %v7083_v34 = vld [vmem:[#allocation81_spill] sm:$0xff] }
 0x33b   : > { %3706 = vmatmul.msk.f32.gmra.mxu2 %vm2006_vm4, %v5794_v3  ;;  %v1988_v29 = vrot.slane %v5794_v3, 1  ;;  %v2314_v16 = vrot.slane %v5794_v3, 2 }
 0x33c   : > { %v1800_v54 = vpop.f32.mrf.mxu0  ;;  %v1267_v42 = vadd.f32 %v7081_v8, %v1118_v5 }
 0x33d   : > { %v1855_v41 = vadd.f32 %v1800_v54, %v1707_v63  ;;  %v5804_v2 = vsel %vm319_vm2, %v1986_v32, %v1988_v29  ;;  %v5807_v20 = vsel %vm723_vm3, %v2312_v1, %v2314_v16  ;;  %v7079_v32 = vld [vmem:[#allocation18_spill] sm:$0xff]  ;;  %v1559_v1 = vadd.f32 %v7080_v14, %v1414_v25 }
 0x33e   : > { %7075 = vst [vmem:[#allocation57_spill] sm:$0xff] %v5804_v2  ;;  %3681 = vmatmul.msk.f32.gmra.mxu1 %vm2006_vm4, %v5804_v2  ;;  %v2209_v30 = vpop.f32.mrf.mxu2  ;;  %3730 = vmatmul.msk.f32.gmra.mxu3 %vm2006_vm4, %v5807_v20  ;;  %v693_v54 = vadd.f32 %v7079_v32, %v7078_v24  ;;  %v7084_v24 = vld [vmem:[#allocation139_spill] sm:$0xff] }
 0x33f   : > { %7076 = vst [vmem:[#allocation2_spill] sm:$0xff] %v5807_v20  ;;  %v1888_v52 = vadd.f32 %v5353_v36, %v1855_v41  ;;  %3818 = vmatmul.msk.f32.gmra.mxu0 %vm2006_vm4, %v5526_v58  ;;  %v1708_v2 = vadd.f32 %v7082_v50, %v1559_v1  ;;  %v1415_v32 = vadd.f32 %v7084_v24, %v1267_v42  ;;  %v7087_v1 = vld [vmem:[#allocation111_spill] sm:$0xff] }
 0x340   : > { %v974_v20 = vadd.f32 %v7083_v34, %v693_v54  ;;  %v7091_v34 = vld [vmem:[#allocation44_spill] sm:$0xff] }
 0x341   : > { %v5821_v63 = vmax.f32 %v1888_v52, 0.0 }
 0x342   : > { %v1119_v8 = vadd.f32 %v7087_v1, %v974_v20 }
 0x343   : > { %v2072_v10 = vpop.f32.mrf.mxu1  ;;  %3707 = vmatmul.msk.f32.gmra.mxu2 %vm2006_vm4, %v5821_v63  ;;  %v1990_v55 = vrot.slane %v5821_v63, 1  ;;  %v2316_v41 = vrot.slane %v5821_v63, 2 }
 0x344   : > { %v1803_v19 = vpop.f32.mrf.mxu0  ;;  %v2210_v42 = vadd.f32 %v2209_v30, %v2072_v10  ;;  %v1268_v24 = vadd.f32 %v7091_v34, %v1119_v8  ;;  %v7093_v10 = vld [vmem:[#allocation84_spill] sm:$0xff] }
 0x345   : > { %v1856_v25 = vadd.f32 %v1803_v19, %v1708_v2  ;;  %v5831_v5 = vsel %vm319_vm2, %v1988_v29, %v1990_v55  ;;  %v5834_v52 = vsel %vm723_vm3, %v2314_v16, %v2316_v41  ;;  %v7088_v19 = vld [vmem:[#allocation78_spill] sm:$0xff]  ;;  %v7090_v16 = vld [vmem:[#allocation64_spill] sm:$0xff] }
 0x346   : > { %7085 = vst [vmem:[#allocation51_spill] sm:$0xff] %v5831_v5  ;;  %3682 = vmatmul.msk.f32.gmra.mxu1 %vm2006_vm4, %v5831_v5  ;;  %v2212_v14 = vpop.f32.mrf.mxu2  ;;  %3731 = vmatmul.msk.f32.gmra.mxu3 %vm2006_vm4, %v5834_v52  ;;  %v7089_v29 = vld [vmem:[#allocation22_spill] sm:$0xff]  ;;  %v1560_v50 = vadd.f32 %v7090_v16, %v1415_v32  ;;  %v1416_v8 = vadd.f32 %v5371_v40, %v1268_v24  ;;  %v7097_v40 = vld [vmem:[#allocation80_spill] sm:$0xff] }
 0x347   : > { %7086 = vst [vmem:[#allocation3_spill] sm:$0xff] %v5834_v52  ;;  %v1889_v54 = vadd.f32 %v5353_v36, %v1856_v25  ;;  %3819 = vmatmul.msk.f32.gmra.mxu0 %vm2006_vm4, %v5557_v60  ;;  %v696_v2 = vadd.f32 %v7089_v29, %v7088_v19 }
 0x348   : > { %v1709_v20 = vadd.f32 %v5368_v49, %v1560_v50 }
 0x349   : > { %v5848_v5 = vmax.f32 %v1889_v54, 0.0  ;;  %v2397_v22 = vpop.f32.mrf.mxu3  ;;  %v975_v30 = vadd.f32 %v7093_v10, %v696_v2 }
 0x34a   : > { %v5850_v39 = vadd.f32 %v2397_v22, %v2210_v42  ;;  %v7096_v42 = vld [vmem:[#allocation113_spill] sm:$0xff] }
 0x34b   : > { %v2075_v1 = vpop.f32.mrf.mxu1  ;;  %3708 = vmatmul.msk.f32.gmra.mxu2 %vm2006_vm4, %v5848_v5  ;;  %v1992_v25 = vrot.slane %v5848_v5, 1  ;;  %v2318_v19 = vrot.slane %v5848_v5, 2  ;;  %v1120_v16 = vadd.f32 %v7096_v42, %v975_v30 }
 0x34c   : > { %7092 = vst [vmem:[#allocation88_spill] sm:$0xff] %v5850_v39  ;;  %v1806_v32 = vpop.f32.mrf.mxu0  ;;  %v2213_v34 = vadd.f32 %v2212_v14, %v2075_v1  ;;  %v7102_v14 = vld [vmem:[#allocation90_spill] sm:$0xff] }
 0x34d   : > { %v1857_v54 = vadd.f32 %v1806_v32, %v1709_v20  ;;  %v5860_v29 = vsel %vm319_vm2, %v1990_v55, %v1992_v25  ;;  %v5863_v22 = vsel %vm723_vm3, %v2316_v41, %v2318_v19  ;;  %v7098_v55 = vld [vmem:[#allocation26_spill] sm:$0xff]  ;;  %v7099_v41 = vld [vmem:[#allocation29_spill] sm:$0xff]  ;;  %v7100_v20 = vld [vmem:[#allocation115_spill] sm:$0xff] }
 0x34e   : > { %7094 = vst [vmem:[#allocation15_spill] sm:$0xff] %v5860_v29  ;;  %3683 = vmatmul.msk.f32.gmra.mxu1 %vm2006_vm4, %v5860_v29  ;;  %v2215_v49 = vpop.f32.mrf.mxu2  ;;  %3732 = vmatmul.msk.f32.gmra.mxu3 %vm2006_vm4, %v5863_v22  ;;  %v699_v50 = vadd.f32 %v7098_v55, %v7097_v40  ;;  %v1561_v24 = vadd.f32 %v7099_v41, %v1416_v8 }
 0x34f   : > { %7095 = vst [vmem:[#allocation52_spill] sm:$0xff] %v5863_v22  ;;  %v1890_v2 = vadd.f32 %v5353_v36, %v1857_v54  ;;  %3820 = vmatmul.msk.f32.gmra.mxu0 %vm2006_vm4, %v5588_v43  ;;  %v1269_v10 = vadd.f32 %v7100_v20, %v1120_v16 }
 0x350   : > { %v1710_v30 = vadd.f32 %v5386_v17, %v1561_v24  ;;  %v976_v1 = vadd.f32 %v7102_v14, %v699_v50 }
 0x351   : > { %v5877_v32 = vmax.f32 %v1890_v2, 0.0  ;;  %v2400_v39 = vpop.f32.mrf.mxu3  ;;  %v1417_v16 = vadd.f32 %v5395_v61, %v1269_v10  ;;  %v7104_v61 = vld [vmem:[#allocation83_spill] sm:$0xff] }
 0x352   : > { %v5879_v52 = vadd.f32 %v2400_v39, %v2213_v34  ;;  %v7103_v34 = vld [vmem:[#allocation114_spill] sm:$0xff] }
 0x353   : > { %v2078_v42 = vpop.f32.mrf.mxu1  ;;  %3709 = vmatmul.msk.f32.gmra.mxu2 %vm2006_vm4, %v5877_v32  ;;  %v1994_v54 = vrot.slane %v5877_v32, 1  ;;  %v2320_v40 = vrot.slane %v5877_v32, 2  ;;  %v1121_v41 = vadd.f32 %v7103_v34, %v976_v1 }
 0x354   : > { %7101 = vst [vmem:[#allocation100_spill] sm:$0xff] %v5879_v52  ;;  %v1809_v8 = vpop.f32.mrf.mxu0  ;;  %v2216_v20 = vadd.f32 %v2215_v49, %v2078_v42  ;;  %v7109_v49 = vld [vmem:[#allocation94_spill] sm:$0xff] }
 0x355   : > { %v1858_v2 = vadd.f32 %v1809_v8, %v1710_v30  ;;  %v5889_v55 = vsel %vm319_vm2, %v1992_v25, %v1994_v54  ;;  %v5892_v39 = vsel %vm723_vm3, %v2318_v19, %v2320_v40  ;;  %v7105_v25 = vld [vmem:[#allocation30_spill] sm:$0xff]  ;;  %v7107_v30 = vld [vmem:[#allocation117_spill] sm:$0xff] }
 0x356   : > { %3684 = vmatmul.msk.f32.gmra.mxu1 %vm2006_vm4, %v5889_v55  ;;  %v2218_v17 = vpop.f32.mrf.mxu2  ;;  %3733 = vmatmul.msk.f32.gmra.mxu3 %vm2006_vm4, %v5892_v39  ;;  %v702_v24 = vadd.f32 %v7105_v25, %v7104_v61  ;;  %v7106_v19 = vld [vmem:[#allocation38_spill] sm:$0xff]  ;;  %v1270_v14 = vadd.f32 %v7107_v30, %v1121_v41 }
 0x357   : > { %v1891_v50 = vadd.f32 %v5353_v36, %v1858_v2  ;;  %3821 = vmatmul.msk.f32.gmra.mxu0 %vm2006_vm4, %v5620_v59  ;;  %v1562_v10 = vadd.f32 %v7106_v19, %v1417_v16 }
 0x358   : > { %v977_v42 = vadd.f32 %v7109_v49, %v702_v24  ;;  %v1418_v41 = vadd.f32 %v5431_v48, %v1270_v14  ;;  %v7111_v48 = vld [vmem:[#allocation86_spill] sm:$0xff] }
 0x359   : > { %v5906_v8 = vmax.f32 %v1891_v50, 0.0  ;;  %v2403_v52 = vpop.f32.mrf.mxu3  ;;  %v1711_v1 = vadd.f32 %v5414_v28, %v1562_v10 }
 0x35a   : > { %v5908_v22 = vadd.f32 %v2403_v52, %v2216_v20  ;;  %v7110_v20 = vld [vmem:[#allocation6_spill] sm:$0xff] }
 0x35b   : > { %v2081_v34 = vpop.f32.mrf.mxu1  ;;  %3710 = vmatmul.msk.f32.gmra.mxu2 %vm2006_vm4, %v5906_v8  ;;  %v1996_v2 = vrot.slane %v5906_v8, 1  ;;  %v2322_v61 = vrot.slane %v5906_v8, 2  ;;  %v1122_v19 = vadd.f32 %v7110_v20, %v977_v42  ;;  %v3789_v42 = vld [vmem:[%s6641_s3 + $0x28] sm:$0xff] }
 0x35c   : > { %7108 = vst [vmem:[#allocation14_spill] sm:$0xff] %v5908_v22  ;;  %v1812_v16 = vpop.f32.mrf.mxu0  ;;  %v2219_v30 = vadd.f32 %v2218_v17, %v2081_v34  ;;  %2762 = vmatpush.msrb.mxu3 %v3789_v42 }
 0x35d   : > { %v1859_v50 = vadd.f32 %v1812_v16, %v1711_v1  ;;  %v5918_v25 = vsel %vm319_vm2, %v1994_v54, %v1996_v2  ;;  %v5921_v52 = vsel %vm723_vm3, %v2320_v40, %v2322_v61  ;;  %v7112_v54 = vld [vmem:[#allocation33_spill] sm:$0xff]  ;;  %v7113_v40 = vld [vmem:[#allocation48_spill] sm:$0xff]  ;;  %v7114_v1 = vld [vmem:[#allocation119_spill] sm:$0xff] }
 0x35e   : > { %3685 = vmatmul.msk.f32.gmra.mxu1 %vm2006_vm4, %v5918_v25  ;;  %v2221_v28 = vpop.f32.mrf.mxu2  ;;  %3734 = vmatmul.msk.f32.gmra.mxu3 %vm2006_vm4, %v5921_v52  ;;  %v705_v10 = vadd.f32 %v7112_v54, %v7111_v48  ;;  %v1563_v14 = vadd.f32 %v7113_v40, %v1418_v41  ;;  %v1271_v49 = vadd.f32 %v7114_v1, %v1122_v19  ;;  %v7117_v1 = vld [vmem:[#allocation9_spill] sm:$0xff] }
 0x35f   : > { %v1892_v24 = vadd.f32 %v5353_v36, %v1859_v50  ;;  %3822 = vmatmul.msk.f32.gmra.mxu0 %vm2006_vm4, %v5652_v15  ;;  %v3864_v50 = vld [vmem:[%s6641_s3 + $0x40] sm:$0xff] }
 0x360   : > { %v1712_v17 = vadd.f32 %v5457_v18, %v1563_v14  ;;  %3129 = vmatpush.msra.mxu2 %v3864_v50  ;;  %v7119_v50 = vld [vmem:[#allocation122_spill] sm:$0xff] }
 0x361   : > { %v5935_v16 = vmax.f32 %v1892_v24, 0.0  ;;  %v2406_v22 = vpop.f32.mrf.mxu3  ;;  %v7116_v24 = vld [vmem:[#allocation98_spill] sm:$0xff] }
 0x362   : > { %v5940_v20 = vadd.f32 %v2406_v22, %v2219_v30  ;;  %v978_v48 = vadd.f32 %v7116_v24, %v705_v10  ;;  %v1419_v22 = vadd.f32 %v5468_v62, %v1271_v49 }
 0x363   : > { %v2084_v34 = vpop.f32.mrf.mxu1  ;;  %3711 = vmatmul.msk.f32.gmra.mxu2 %vm2006_vm4, %v5935_v16  ;;  %v1998_v41 = vrot.slane %v5935_v16, 1  ;;  %v2324_v19 = vrot.slane %v5935_v16, 2 }
 0x364   : > { %7115 = vst [vmem:[#allocation61_spill] sm:$0xff] %v5940_v20  ;;  %v1815_v54 = vpop.f32.mrf.mxu0  ;;  %v1123_v10 = vadd.f32 %v7117_v1, %v978_v48  ;;  %v2222_v62 = vadd.f32 %v2221_v28, %v2084_v34 }
 0x365   : > { %v1860_v30 = vadd.f32 %v1815_v54, %v1712_v17  ;;  %v5953_v40 = vsel %vm319_vm2, %v1996_v2, %v1998_v41  ;;  %v5956_v18 = vsel %vm723_vm3, %v2322_v61, %v2324_v19  ;;  %v7118_v2 = vld [vmem:[#allocation116_spill] sm:$0xff]  ;;  %v3839_v54 = vld [vmem:[%s6641_s3 + $0x38] sm:$0xff] }
 0x366   : > { %3686 = vmatmul.msk.f32.gmra.mxu1 %vm2006_vm4, %v5953_v40  ;;  %v2224_v14 = vpop.f32.mrf.mxu2  ;;  %3735 = vmatmul.msk.f32.gmra.mxu3 %vm2006_vm4, %v5956_v18  ;;  %v1564_v49 = vadd.f32 %v7118_v2, %v1419_v22  ;;  %v1272_v61 = vadd.f32 %v7119_v50, %v1123_v10 }
 0x367   : > { %v1893_v42 = vadd.f32 %v5353_v36, %v1860_v30  ;;  %3823 = vmatmul.msk.f32.gmra.mxu0 %vm2006_vm4, %v5684_v56  ;;  %3006 = vmatpush.msra.mxu1 %v3839_v54 }
 0x368   : > { %v1713_v48 = vadd.f32 %v5495_v31, %v1564_v49  ;;  %v1420_v1 = vadd.f32 %v5505_v21, %v1272_v61  ;;  %v7121_v49 = vld [vmem:[#allocation118_spill] sm:$0xff] }
 0x369   : > { %v5968_v17 = vmax.f32 %v1893_v42, 0.0  ;;  %v2409_v24 = vpop.f32.mrf.mxu3 }
 0x36a   : > { %v5973_v20 = vadd.f32 %v2409_v24, %v2222_v62  ;;  %v1565_v50 = vadd.f32 %v7121_v49, %v1420_v1 }
 0x36b   : > { %v2087_v30 = vpop.f32.mrf.mxu1  ;;  %3712 = vmatmul.msk.f32.gmra.mxu2 %vm2006_vm4, %v5968_v17  ;;  %v2000_v28 = vrot.slane %v5968_v17, 1  ;;  %v2326_v34 = vrot.slane %v5968_v17, 2 }
 0x36c   : > { %7120 = vst [vmem:[#allocation53_spill] sm:$0xff] %v5973_v20  ;;  %v1818_v22 = vpop.f32.mrf.mxu0  ;;  %v2225_v21 = vadd.f32 %v2224_v14, %v2087_v30  ;;  %v1714_v24 = vadd.f32 %v5529_v46, %v1565_v50 }
 0x36d   : > { %v1861_v10 = vadd.f32 %v1818_v22, %v1713_v48  ;;  %v5982_v42 = vsel %vm319_vm2, %v1998_v41, %v2000_v28  ;;  %v5985_v62 = vsel %vm723_vm3, %v2324_v19, %v2326_v34 }
 0x36e   : > { %3687 = vmatmul.msk.f32.gmra.mxu1 %vm2006_vm4, %v5982_v42  ;;  %v2227_v31 = vpop.f32.mrf.mxu2  ;;  %3736 = vmatmul.msk.f32.gmra.mxu3 %vm2006_vm4, %v5985_v62 }
 0x36f   : > { %v1894_v2 = vadd.f32 %v5353_v36, %v1861_v10  ;;  %3824 = vmatmul.msk.f32.gmra.mxu0 %vm2006_vm4, %v5713_v47 }
 0x371   : > { %v5995_v41 = vmax.f32 %v1894_v2, 0.0  ;;  %v2412_v61 = vpop.f32.mrf.mxu3 }
 0x372   : > { %v5997_v19 = vadd.f32 %v2412_v61, %v2225_v21 }
 0x373   : > { %v2090_v54 = vpop.f32.mrf.mxu1  ;;  %3713 = vmatmul.msk.f32.gmra.mxu2 %vm2006_vm4, %v5995_v41  ;;  %v2002_v48 = vrot.slane %v5995_v41, 1  ;;  %v2328_v22 = vrot.slane %v5995_v41, 2 }
 0x374   : > { %v1821_v10 = vpop.f32.mrf.mxu0  ;;  %v2228_v2 = vadd.f32 %v2227_v31, %v2090_v54 }
 0x375   : > { %v1862_v20 = vadd.f32 %v1821_v10, %v1714_v24  ;;  %v6005_v14 = vsel %vm319_vm2, %v2000_v28, %v2002_v48  ;;  %v6008_v30 = vsel %vm723_vm3, %v2326_v34, %v2328_v22 }
 0x376   : > { %3688 = vmatmul.msk.f32.gmra.mxu1 %vm2006_vm4, %v6005_v14  ;;  %v2230_v46 = vpop.f32.mrf.mxu2  ;;  %3737 = vmatmul.msk.f32.gmra.mxu3 %vm2006_vm4, %v6008_v30 }
 0x377   : > { %v1895_v1 = vadd.f32 %v5353_v36, %v1862_v20  ;;  %3825 = vmatmul.msk.f32.gmra.mxu0 %vm2006_vm4, %v5740_v45 }
 0x379   : > { %v6017_v21 = vmax.f32 %v1895_v1, 0.0  ;;  %v2415_v28 = vpop.f32.mrf.mxu3 }
 0x37a   : > { %v6019_v49 = vadd.f32 %v2415_v28, %v2228_v2 }
 0x37b   : > { %v2093_v34 = vpop.f32.mrf.mxu1  ;;  %3765 = vmatmul.msk.f32.vlgmr.msrb.gmra.mxu2 %vm2006_vm4, %v5418_v37  ;;  %v6740_v50 = vrot.slane %v6017_v21, 1  ;;  %v6739_v61 = vrot.slane %v6017_v21, 2 }
 0x37c   : > { %v6025_v24 = vpop.f32.mrf.mxu0  ;;  %v2231_v31 = vadd.f32 %v2230_v46, %v2093_v34 }
 0x37d   : > { %v6030_v36 = vsel %vm319_vm2, %v2002_v48, %v6740_v50  ;;  %v6035_v20 = vsel %vm723_vm3, %v2328_v22, %v6739_v61  ;;  %v7129_v61 = vld [vmem:[#allocation40_spill] sm:$0xff]  ;;  %v7130_v50 = vld [vmem:[#allocation101_spill] sm:$0xff] }
 0x37e   : > { %3689 = vmatmul.msk.f32.gmra.mxu1 %vm2006_vm4, %v6030_v36  ;;  %v2233_v37 = vpop.f32.mrf.mxu2  ;;  %3738 = vmatmul.msk.f32.gmra.mxu3 %vm2006_vm4, %v6035_v20 }
 0x37f   : > { %3826 = vmatmul.msk.f32.gmra.mxu0 %vm2006_vm4, %v5767_v13 }
 0x381   : > { %v2418_v54 = vpop.f32.mrf.mxu3 }
 0x382   : > { %v6043_v10 = vadd.f32 %v2418_v54, %v2231_v31 }
 0x383   : > { %v2096_v48 = vpop.f32.mrf.mxu1  ;;  %3766 = vmatmul.msk.f32.gmra.mxu2 %vm2006_vm4, %v5447_v51 }
 0x384   : > { %v6047_v22 = vpop.f32.mrf.mxu0  ;;  %v2234_v46 = vadd.f32 %v2233_v37, %v2096_v48 }
 0x386   : > { %v2236_v1 = vpop.f32.mrf.mxu2  ;;  %3740 = vmatmul.msk.f32.vlgmr.msrb.gmra.mxu1 %vm2006_vm4, %v5383_v7  ;;  %3790 = vmatmul.msk.f32.vlgmr.msrb.gmra.mxu3 %vm2006_vm4, %v5421_v33 }
 0x387   : > { %3827 = vmatmul.msk.f32.gmra.mxu0 %vm2006_vm4, %v5794_v3 }
 0x389   : > { %v2421_v2 = vpop.f32.mrf.mxu3 }
 0x38a   : > { %v6055_v28 = vadd.f32 %v2421_v2, %v2234_v46 }
 0x38b   : > { %v2099_v34 = vpop.f32.mrf.mxu1  ;;  %3767 = vmatmul.msk.f32.gmra.mxu2 %vm2006_vm4, %v5478_v6 }
 0x38c   : > { %v6059_v51 = vpop.f32.mrf.mxu0  ;;  %v2237_v7 = vadd.f32 %v2236_v1, %v2099_v34 }
 0x38e   : > { %v2239_v31 = vpop.f32.mrf.mxu2  ;;  %3741 = vmatmul.msk.f32.gmra.mxu1 %vm2006_vm4, %v5406_v23  ;;  %3791 = vmatmul.msk.f32.gmra.mxu3 %vm2006_vm4, %v5450_v53 }
 0x38f   : > { %3828 = vmatmul.msk.f32.gmra.mxu0 %vm2006_vm4, %v5821_v63 }
 0x391   : > { %v2424_v33 = vpop.f32.mrf.mxu3 }
 0x392   : > { %v6067_v37 = vadd.f32 %v2424_v33, %v2237_v7 }
 0x393   : > { %v2102_v54 = vpop.f32.mrf.mxu1  ;;  %3768 = vmatmul.msk.f32.gmra.mxu2 %vm2006_vm4, %v5509_v12 }
 0x394   : > { %v6071_v48 = vpop.f32.mrf.mxu0  ;;  %v2240_v23 = vadd.f32 %v2239_v31, %v2102_v54 }
 0x395   : > { %7122 = vst [vmem:[#allocation91_spill] sm:$0xff] %v6071_v48 }
 0x396   : > { %v2242_v46 = vpop.f32.mrf.mxu2  ;;  %3742 = vmatmul.msk.f32.gmra.mxu1 %vm2006_vm4, %v5437_v57  ;;  %3792 = vmatmul.msk.f32.gmra.mxu3 %vm2006_vm4, %v5481_v4 }
 0x397   : > { %3829 = vmatmul.msk.f32.gmra.mxu0 %vm2006_vm4, %v5848_v5 }
 0x399   : > { %v2427_v53 = vpop.f32.mrf.mxu3 }
 0x39a   : > { %v6079_v1 = vadd.f32 %v2427_v53, %v2240_v23 }
 0x39b   : > { %v2105_v2 = vpop.f32.mrf.mxu1  ;;  %3769 = vmatmul.msk.f32.gmra.mxu2 %vm2006_vm4, %v5538_v0 }
 0x39c   : > { %7123 = vst [vmem:[#allocation55_spill] sm:$0xff] %v6079_v1  ;;  %v1836_v34 = vpop.f32.mrf.mxu0  ;;  %v2243_v57 = vadd.f32 %v2242_v46, %v2105_v2  ;;  %v7149_v1 = vld [vmem:[#allocation71_spill] sm:$0xff] }
 0x39e   : > { %v2245_v7 = vpop.f32.mrf.mxu2  ;;  %3743 = vmatmul.msk.f32.gmra.mxu1 %vm2006_vm4, %v5466_v38  ;;  %3793 = vmatmul.msk.f32.gmra.mxu3 %vm2006_vm4, %v5512_v26 }
 0x39f   : > { %3830 = vmatmul.msk.f32.gmra.mxu0 %vm2006_vm4, %v5877_v32 }
 0x3a1   : > { %v2430_v31 = vpop.f32.mrf.mxu3 }
 0x3a2   : > { %v6089_v33 = vadd.f32 %v2430_v31, %v2243_v57  ;;  %v7126_v57 = vld [vmem:[#allocation89_spill] sm:$0xff] }
 0x3a3   : > { %v2108_v54 = vpop.f32.mrf.mxu1  ;;  %3770 = vmatmul.msk.f32.gmra.mxu2 %vm2006_vm4, %v5569_v11  ;;  %v7137_v11 = vld [vmem:[#allocation82_spill] sm:$0xff] }
 0x3a4   : > { %7124 = vst [vmem:[#allocation103_spill] sm:$0xff] %v6089_v33  ;;  %v2246_v38 = vadd.f32 %v2245_v7, %v2108_v54  ;;  %v7127_v7 = vld [vmem:[#allocation36_spill] sm:$0xff] }
 0x3a5   : > { %v708_v31 = vadd.f32 %v7127_v7, %v7126_v57  ;;  %v7133_v57 = vld [vmem:[#allocation93_spill] sm:$0xff]  ;;  %v7134_v7 = vld [vmem:[#allocation39_spill] sm:$0xff] }
 0x3a6   : > { %v2248_v23 = vpop.f32.mrf.mxu2  ;;  %3744 = vmatmul.msk.f32.gmra.mxu1 %vm2006_vm4, %v5497_v44  ;;  %3794 = vmatmul.msk.f32.gmra.mxu3 %vm2006_vm4, %v5541_v9 }
 0x3a7   : > { %3831 = vmatmul.msk.f32.gmra.mxu0 %vm2006_vm4, %v5906_v8  ;;  %v979_v48 = vadd.f32 %v7130_v50, %v708_v31 }
 0x3a9   : > { %v2433_v53 = vpop.f32.mrf.mxu3 }
 0x3aa   : > { %v6099_v46 = vadd.f32 %v2433_v53, %v2246_v38 }
 0x3ab   : > { %v2111_v2 = vpop.f32.mrf.mxu1  ;;  %3771 = vmatmul.msk.f32.gmra.mxu2 %vm2006_vm4, %v5598_v35  ;;  %v7131_v35 = vld [vmem:[#allocation74_spill] sm:$0xff] }
 0x3ac   : > { %7125 = vst [vmem:[#allocation11_spill] sm:$0xff] %v6099_v46  ;;  %v2249_v44 = vadd.f32 %v2248_v23, %v2111_v2  ;;  %v7132_v23 = vld [vmem:[#allocation7_spill] sm:$0xff] }
 0x3ad   : > { %v1124_v2 = vadd.f32 %v7132_v23, %v979_v48 }
 0x3ae   : > { %v2251_v34 = vpop.f32.mrf.mxu2  ;;  %3745 = vmatmul.msk.f32.gmra.mxu1 %vm2006_vm4, %v5526_v58  ;;  %3795 = vmatmul.msk.f32.gmra.mxu3 %vm2006_vm4, %v5572_v27 }
 0x3af   : > { %3832 = vmatmul.msk.f32.gmra.mxu0 %vm2006_vm4, %v5935_v16 }
 0x3b1   : > { %v2436_v54 = vpop.f32.mrf.mxu3 }
 0x3b2   : > { %v6111_v38 = vadd.f32 %v2436_v54, %v2249_v44  ;;  %v711_v54 = vadd.f32 %v7134_v7, %v7133_v57  ;;  %v7144_v7 = vld [vmem:[#allocation121_spill] sm:$0xff] }
 0x3b3   : > { %v2114_v53 = vpop.f32.mrf.mxu1  ;;  %3772 = vmatmul.msk.f32.gmra.mxu2 %vm2006_vm4, %v7129_v61 }
 0x3b4   : > { %7128 = vst [vmem:[#allocation54_spill] sm:$0xff] %v6111_v38  ;;  %v2252_v44 = vadd.f32 %v2251_v34, %v2114_v53  ;;  %v7135_v38 = vld [vmem:[#allocation124_spill] sm:$0xff]  ;;  %v7140_v34 = vld [vmem:[#allocation43_spill] sm:$0xff] }
 0x3b5   : > { %v1273_v61 = vadd.f32 %v7135_v38, %v1124_v2  ;;  %v7141_v53 = vld [vmem:[#allocation8_spill] sm:$0xff] }
 0x3b6   : > { %v2254_v58 = vpop.f32.mrf.mxu2  ;;  %3746 = vmatmul.msk.f32.gmra.mxu1 %vm2006_vm4, %v5557_v60  ;;  %3796 = vmatmul.msk.f32.gmra.mxu3 %vm2006_vm4, %v7131_v35  ;;  %v7138_v60 = vld [vmem:[#allocation105_spill] sm:$0xff]  ;;  %v7139_v35 = vld [vmem:[#allocation68_spill] sm:$0xff] }
 0x3b7   : > { %3833 = vmatmul.msk.f32.gmra.mxu0 %vm2006_vm4, %v5968_v17  ;;  %v980_v33 = vadd.f32 %v7138_v60, %v711_v54  ;;  %v1421_v48 = vadd.f32 %v7139_v35, %v1273_v61  ;;  %v7142_v2 = vld [vmem:[#allocation96_spill] sm:$0xff]  ;;  %v7145_v60 = vld [vmem:[#allocation127_spill] sm:$0xff] }
 0x3b9   : > { %v2439_v46 = vpop.f32.mrf.mxu3  ;;  %v1125_v38 = vadd.f32 %v7141_v53, %v980_v33  ;;  %v1566_v54 = vadd.f32 %v7144_v7, %v1421_v48  ;;  %v7148_v33 = vld [vmem:[#allocation108_spill] sm:$0xff]  ;;  %v7150_v48 = vld [vmem:[#allocation47_spill] sm:$0xff]  ;;  %v7152_v7 = vld [vmem:[#allocation125_spill] sm:$0xff] }
 0x3ba   : > { %v6126_v50 = vadd.f32 %v2439_v46, %v2252_v44  ;;  %v7143_v44 = vld [vmem:[#allocation42_spill] sm:$0xff] }
 0x3bb   : > { %v2117_v31 = vpop.f32.mrf.mxu1  ;;  %3773 = vmatmul.msk.f32.gmra.mxu2 %vm2006_vm4, %v7137_v11  ;;  %v714_v57 = vadd.f32 %v7143_v44, %v7142_v2  ;;  %v1274_v35 = vadd.f32 %v7145_v60, %v1125_v38  ;;  %v7151_v38 = vld [vmem:[#allocation13_spill] sm:$0xff] }
 0x3bc   : > { %7136 = vst [vmem:[#allocation24_spill] sm:$0xff] %v6126_v50  ;;  %v2255_v46 = vadd.f32 %v2254_v58, %v2117_v31 }
 0x3bd   : > { %v981_v53 = vadd.f32 %v7148_v33, %v714_v57  ;;  %v1422_v58 = vadd.f32 %v7149_v1, %v1274_v35  ;;  %v7153_v57 = vld [vmem:[#allocation131_spill] sm:$0xff]  ;;  %v7155_v35 = vld [vmem:[#allocation37_spill] sm:$0xff] }
 0x3be   : > { %v2257_v23 = vpop.f32.mrf.mxu2  ;;  %3747 = vmatmul.msk.f32.gmra.mxu1 %vm2006_vm4, %v5588_v43  ;;  %3797 = vmatmul.msk.f32.gmra.mxu3 %vm2006_vm4, %v7140_v34  ;;  %v7146_v43 = vld [vmem:[#allocation31_spill] sm:$0xff]  ;;  %v7147_v34 = vld [vmem:[#allocation12_spill] sm:$0xff]  ;;  %v7156_v33 = vld [vmem:[#allocation49_spill] sm:$0xff] }
 0x3bf   : > { %3834 = vmatmul.msk.f32.gmra.mxu0 %vm2006_vm4, %v5995_v41  ;;  %v1715_v50 = vadd.f32 %v7146_v43, %v1566_v54  ;;  %v1567_v54 = vadd.f32 %v7152_v7, %v1422_v58 }
 0x3c1   : > { %v2442_v61 = vpop.f32.mrf.mxu3  ;;  %v1863_v31 = vadd.f32 %v6025_v24, %v1715_v50  ;;  %v6163_v24 = vld [vmem:[%s6640_s2] ss:$0 sm:$0xff] }
 0x3c2   : > { %v6143_v11 = vadd.f32 %v2442_v61, %v2255_v46  ;;  %v1126_v46 = vadd.f32 %v7151_v38, %v981_v53  ;;  %7154 = vst [vmem:[#allocation59_spill] sm:$0xff] %v6163_v24  ;;  %v1716_v61 = vadd.f32 %v7155_v35, %v1567_v54  ;;  %v7161_v35 = vld [vmem:[#allocation66_spill] sm:$0xff] }
 0x3c3   : > { %v2120_v0 = vpop.f32.mrf.mxu1  ;;  %3774 = vmatmul.msk.f32.gmra.mxu2 %vm2006_vm4, %v7147_v34 }
 0x3c4   : > { %v2258_v44 = vadd.f32 %v2257_v23, %v2120_v0  ;;  %v1275_v60 = vadd.f32 %v7153_v57, %v1126_v46  ;;  %v7157_v0 = vld [vmem:[#allocation77_spill] sm:$0xff]  ;;  %v1864_v58 = vadd.f32 %v6047_v22, %v1716_v61 }
 0x3c6   : > { %v2260_v2 = vpop.f32.mrf.mxu2  ;;  %3748 = vmatmul.msk.f32.gmra.mxu1 %vm2006_vm4, %v5620_v59  ;;  %3798 = vmatmul.msk.f32.gmra.mxu3 %vm2006_vm4, %v7150_v48  ;;  %v1896_v59 = vadd.f32 %v6163_v24, %v1863_v31  ;;  %v1423_v23 = vadd.f32 %v7157_v0, %v1275_v60  ;;  %v7158_v31 = vld [vmem:[#allocation20_spill] sm:$0xff]  ;;  %v1897_v54 = vadd.f32 %v6163_v24, %v1864_v58 }
 0x3c7   : > { %3835 = vmatmul.msk.f32.gmra.mxu0 %vm2006_vm4, %v6017_v21 }
 0x3c8   : > { %v6172_v53 = vmax.f32 %v1896_v59, 0.0  ;;  %v7160_v59 = vld [vmem:[#allocation87_spill] sm:$0xff] }
 0x3c9   : > { %v2445_v1 = vpop.f32.mrf.mxu3 }
 0x3ca   : > { %v6166_v50 = vadd.f32 %v2445_v1, %v2258_v44  ;;  %v7159_v44 = vld [vmem:[#allocation128_spill] sm:$0xff] }
 0x3cb   : > { %v2123_v43 = vpop.f32.mrf.mxu1  ;;  %3775 = vmatmul.msk.f32.gmra.mxu2 %vm2006_vm4, %v7156_v33  ;;  %v1568_v7 = vadd.f32 %v7159_v44, %v1423_v23 }
 0x3cc   : > { %v2261_v46 = vadd.f32 %v2260_v2, %v2123_v43  ;;  %v7162_v2 = vld [vmem:[#allocation85_spill] sm:$0xff] }
 0x3cd   : > { %v1717_v22 = vadd.f32 %v7160_v59, %v1568_v7  ;;  %v7163_v7 = vld [vmem:[#allocation97_spill] sm:$0xff] }
 0x3ce   : > { %v2263_v38 = vpop.f32.mrf.mxu2  ;;  %3749 = vmatmul.msk.f32.gmra.mxu1 %vm2006_vm4, %v5652_v15  ;;  %3799 = vmatmul.msk.f32.gmra.mxu3 %vm2006_vm4, %v7158_v31  ;;  %v6188_v15 = vmax.f32 %v1897_v54, 0.0 }
 0x3cf   : > { %3836 = vmatmul.msk.f32.gmra.mxu0 %vm2006_vm4, %v6172_v53  ;;  %v1865_v61 = vadd.f32 %v6059_v51, %v1717_v22 }
 0x3d1   : > { %v2448_v57 = vpop.f32.mrf.mxu3  ;;  %v1898_v23 = vadd.f32 %v6163_v24, %v1865_v61 }
 0x3d2   : > { %v6183_v60 = vadd.f32 %v2448_v57, %v2261_v46 }
 0x3d3   : > { %v2126_v1 = vpop.f32.mrf.mxu1  ;;  %3776 = vmatmul.msk.f32.gmra.mxu2 %vm2006_vm4, %v7161_v35  ;;  %v6202_v51 = vmax.f32 %v1898_v23, 0.0 }
 0x3d4   : > { %v2264_v43 = vadd.f32 %v2263_v38, %v2126_v1  ;;  %v7166_v1 = vld [vmem:[#allocation57_spill] sm:$0xff] }
 0x3d5   : > { %7164 = vst [vmem:[#allocation120_spill] sm:$0xff] %v6202_v51 }
 0x3d6   : > { %v2266_v0 = vpop.f32.mrf.mxu2  ;;  %3750 = vmatmul.msk.f32.gmra.mxu1 %vm2006_vm4, %v5684_v56  ;;  %3800 = vmatmul.msk.f32.gmra.mxu3 %vm2006_vm4, %v7162_v2  ;;  %v7165_v56 = vld [vmem:[#allocation50_spill] sm:$0xff] }
 0x3d7   : > { %3837 = vmatmul.msk.f32.gmra.mxu0 %vm2006_vm4, %v6188_v15 }
 0x3d9   : > { %v2451_v58 = vpop.f32.mrf.mxu3 }
 0x3da   : > { %v6198_v46 = vadd.f32 %v2451_v58, %v2264_v43  ;;  %v7167_v43 = vld [vmem:[#allocation16_spill] sm:$0xff] }
 0x3db   : > { %v2129_v44 = vpop.f32.mrf.mxu1  ;;  %3777 = vmatmul.msk.f32.gmra.mxu2 %vm2006_vm4, %v7163_v7 }
 0x3dc   : > { %v2267_v38 = vadd.f32 %v2266_v0, %v2129_v44  ;;  %v7168_v0 = vld [vmem:[#allocation51_spill] sm:$0xff] }
 0x3de   : > { %v2269_v54 = vpop.f32.mrf.mxu2  ;;  %3751 = vmatmul.msk.f32.gmra.mxu1 %vm2006_vm4, %v5713_v47  ;;  %3801 = vmatmul.msk.f32.gmra.mxu3 %vm2006_vm4, %v7165_v56 }
 0x3df   : > { %3838 = vmatmul.msk.f32.gmra.mxu0 %vm2006_vm4, %v6202_v51 }
 0x3e1   : > { %v2454_v57 = vpop.f32.mrf.mxu3 }
 0x3e2   : > { %v6210_v59 = vadd.f32 %v2454_v57, %v2267_v38  ;;  %v7169_v38 = vld [vmem:[#allocation2_spill] sm:$0xff] }
 0x3e3   : > { %v2132_v22 = vpop.f32.mrf.mxu1  ;;  %3778 = vmatmul.msk.f32.gmra.mxu2 %vm2006_vm4, %v7166_v1 }
 0x3e4   : > { %v2270_v47 = vadd.f32 %v2269_v54, %v2132_v22  ;;  %v7170_v22 = vld [vmem:[#allocation3_spill] sm:$0xff] }
 0x3e6   : > { %v2272_v61 = vpop.f32.mrf.mxu2  ;;  %3752 = vmatmul.msk.f32.gmra.mxu1 %vm2006_vm4, %v5740_v45  ;;  %3802 = vmatmul.msk.f32.gmra.mxu3 %vm2006_vm4, %v7167_v43 }
 0x3e9   : > { %v2457_v23 = vpop.f32.mrf.mxu3 }
 0x3ea   : > { %v6218_v58 = vadd.f32 %v2457_v23, %v2270_v47 }
 0x3eb   : > { %v2135_v51 = vpop.f32.mrf.mxu1  ;;  %3779 = vmatmul.msk.f32.gmra.mxu2 %vm2006_vm4, %v7168_v0 }
 0x3ec   : > { %v2273_v57 = vadd.f32 %v2272_v61, %v2135_v51  ;;  %v7171_v61 = vld [vmem:[#allocation52_spill] sm:$0xff] }
 0x3ee   : > { %v2275_v44 = vpop.f32.mrf.mxu2  ;;  %3753 = vmatmul.msk.f32.gmra.mxu1 %vm2006_vm4, %v5767_v13  ;;  %3803 = vmatmul.msk.f32.gmra.mxu3 %vm2006_vm4, %v7169_v38 }
 0x3f1   : > { %v2460_v45 = vpop.f32.mrf.mxu3 }
 0x3f2   : > { %v6226_v24 = vadd.f32 %v2460_v45, %v2273_v57 }
 0x3f3   : > { %v2138_v1 = vpop.f32.mrf.mxu1  ;;  %3780 = vmatmul.msk.f32.gmra.mxu2 %vm2006_vm4, %v5860_v29 }
 0x3f4   : > { %v2276_v47 = vadd.f32 %v2275_v44, %v2138_v1  ;;  %v7172_v1 = vld [vmem:[#allocation88_spill] sm:$0xff] }
 0x3f6   : > { %v2278_v54 = vpop.f32.mrf.mxu2  ;;  %3754 = vmatmul.msk.f32.gmra.mxu1 %vm2006_vm4, %v5794_v3  ;;  %3804 = vmatmul.msk.f32.gmra.mxu3 %vm2006_vm4, %v7170_v22 }
 0x3f9   : > { %v2463_v13 = vpop.f32.mrf.mxu3 }
 0x3fa   : > { %v6234_v23 = vadd.f32 %v2463_v13, %v2276_v47 }
 0x3fb   : > { %v2141_v0 = vpop.f32.mrf.mxu1  ;;  %3781 = vmatmul.msk.f32.gmra.mxu2 %vm2006_vm4, %v5889_v55 }
 0x3fc   : > { %v2279_v57 = vadd.f32 %v2278_v54, %v2141_v0  ;;  %v7173_v0 = vld [vmem:[#allocation100_spill] sm:$0xff] }
 0x3fe   : > { %3755 = vmatmul.msk.f32.gmra.mxu1 %vm2006_vm4, %v5821_v63  ;;  %v2641_v51 = vpop.f32.mrf.mxu2  ;;  %3805 = vmatmul.msk.f32.gmra.mxu3 %vm2006_vm4, %v7171_v61 }
 0x401   : > { %v2466_v3 = vpop.f32.mrf.mxu3 }
 0x402   : > { %v6242_v45 = vadd.f32 %v2466_v3, %v2279_v57 }
 0x403   : > { %v2517_v29 = vpop.f32.mrf.mxu1  ;;  %3782 = vmatmul.msk.f32.gmra.mxu2 %vm2006_vm4, %v5918_v25 }
 0x404   : > { %v2589_v44 = vadd.f32 %v2517_v29, %v7172_v1 }
 0x406   : > { %3756 = vmatmul.msk.f32.gmra.mxu1 %vm2006_vm4, %v5848_v5  ;;  %v2644_v47 = vpop.f32.mrf.mxu2  ;;  %3806 = vmatmul.msk.f32.gmra.mxu3 %vm2006_vm4, %v5892_v39  ;;  %v6251_v63 = vadd.f32 %v2641_v51, %v2589_v44  ;;  %v7174_v51 = vld [vmem:[#allocation14_spill] sm:$0xff] }
 0x40b   : > { %v2520_v13 = vpop.f32.mrf.mxu1  ;;  %3783 = vmatmul.msk.f32.gmra.mxu2 %vm2006_vm4, %v5953_v40 }
 0x40c   : > { %v2590_v54 = vadd.f32 %v2520_v13, %v7173_v0 }
 0x40e   : > { %3757 = vmatmul.msk.f32.gmra.mxu1 %vm2006_vm4, %v5877_v32  ;;  %v2647_v57 = vpop.f32.mrf.mxu2  ;;  %3807 = vmatmul.msk.f32.gmra.mxu3 %vm2006_vm4, %v5921_v52  ;;  %v6260_v5 = vadd.f32 %v2644_v47, %v2590_v54  ;;  %v7175_v47 = vld [vmem:[#allocation61_spill] sm:$0xff] }
 0x413   : > { %v2523_v29 = vpop.f32.mrf.mxu1  ;;  %3784 = vmatmul.msk.f32.gmra.mxu2 %vm2006_vm4, %v5982_v42 }
 0x414   : > { %v2591_v3 = vadd.f32 %v2523_v29, %v7174_v51 }
 0x416   : > { %3758 = vmatmul.msk.f32.gmra.mxu1 %vm2006_vm4, %v5906_v8  ;;  %v2650_v1 = vpop.f32.mrf.mxu2  ;;  %3808 = vmatmul.msk.f32.gmra.mxu3 %vm2006_vm4, %v5956_v18  ;;  %v6269_v32 = vadd.f32 %v2647_v57, %v2591_v3  ;;  %v7176_v57 = vld [vmem:[#allocation53_spill] sm:$0xff]  ;;  %v2616_v3 = vrot.slane %v6172_v53, 1 }
 0x41b   : > { %v2526_v44 = vpop.f32.mrf.mxu1  ;;  %3785 = vmatmul.msk.f32.gmra.mxu2 %vm2006_vm4, %v6005_v14 }
 0x41c   : > { %v2592_v13 = vadd.f32 %v2526_v44, %v7175_v47 }
 0x41e   : > { %3759 = vmatmul.msk.f32.gmra.mxu1 %vm2006_vm4, %v5935_v16  ;;  %v2653_v0 = vpop.f32.mrf.mxu2  ;;  %3809 = vmatmul.msk.f32.gmra.mxu3 %vm2006_vm4, %v5985_v62  ;;  %v6278_v8 = vadd.f32 %v2650_v1, %v2592_v13  ;;  %v7177_v1 = vrot.slane %v6017_v21, 1 }
 0x420   : > { %v6293_v44 = vsel %vm319_vm2, %v7177_v1, %v2616_v3 }
 0x423   : > { %v2529_v54 = vpop.f32.mrf.mxu1  ;;  %3786 = vmatmul.msk.f32.gmra.mxu2 %vm2006_vm4, %v6030_v36 }
 0x424   : > { %v2593_v29 = vadd.f32 %v2529_v54, %v7176_v57  ;;  %v6748_v54 = vrot.slane %v6188_v15, 1  ;;  %v2739_v57 = vrot.slane %v6172_v53, 2 }
 0x426   : > { %3760 = vmatmul.msk.f32.gmra.mxu1 %vm2006_vm4, %v5968_v17  ;;  %v2656_v51 = vpop.f32.mrf.mxu2  ;;  %3810 = vmatmul.msk.f32.gmra.mxu3 %vm2006_vm4, %v6008_v30  ;;  %v6287_v16 = vadd.f32 %v2653_v0, %v2593_v29  ;;  %v6309_v29 = vsel %vm319_vm2, %v2616_v3, %v6748_v54 }
 0x42b   : > { %v2532_v47 = vpop.f32.mrf.mxu1  ;;  %3787 = vmatmul.msk.f32.gmra.mxu2 %vm2006_vm4, %v6293_v44 }
 0x42c   : > { %v2594_v13 = vadd.f32 %v2532_v47, %v5997_v19  ;;  %v7178_v19 = vrot.slane %v6017_v21, 2 }
 0x42e   : > { %3761 = vmatmul.msk.f32.gmra.mxu1 %vm2006_vm4, %v5995_v41  ;;  %v2659_v17 = vpop.f32.mrf.mxu2  ;;  %3811 = vmatmul.msk.f32.gmra.mxu3 %vm2006_vm4, %v6035_v20  ;;  %v6302_v0 = vadd.f32 %v2656_v51, %v2594_v13  ;;  %v6317_v51 = vsel %vm723_vm3, %v7178_v19, %v2739_v57  ;;  %v6749_v13 = vrot.slane %v6188_v15, 2 }
 0x433   : > { %v2535_v1 = vpop.f32.mrf.mxu1  ;;  %3788 = vmatmul.msk.f32.gmra.mxu2 %vm2006_vm4, %v6309_v29 }
 0x434   : > { %v2595_v41 = vadd.f32 %v2535_v1, %v6019_v49  ;;  %v6332_v1 = vsel %vm723_vm3, %v2739_v57, %v6749_v13 }
 0x436   : > { %3762 = vmatmul.msk.f32.gmra.mxu1 %vm2006_vm4, %v6017_v21  ;;  %v2662_v47 = vpop.f32.mrf.mxu2  ;;  %3812 = vmatmul.msk.f32.gmra.mxu3 %vm2006_vm4, %v6317_v51  ;;  %v6323_v3 = vadd.f32 %v2659_v17, %v2595_v41 }
 0x43b   : > { %v2538_v54 = vpop.f32.mrf.mxu1  ;;  %3865 = vmatmul.msk.f32.vlgmr.msra.gmra.mxu2 %vm2006_vm4, %v5481_v4 }
 0x43c   : > { %v2596_v49 = vadd.f32 %v2538_v54, %v6043_v10 }
 0x43e   : > { %3763 = vmatmul.msk.f32.gmra.mxu1 %vm2006_vm4, %v6172_v53  ;;  %v2665_v21 = vpop.f32.mrf.mxu2  ;;  %3813 = vmatmul.msk.f32.gmra.mxu3 %vm2006_vm4, %v6332_v1  ;;  %v6338_v17 = vadd.f32 %v2662_v47, %v2596_v49 }
 0x443   : > { %v2541_v41 = vpop.f32.mrf.mxu1  ;;  %3866 = vmatmul.msk.f32.gmra.mxu2 %vm2006_vm4, %v5512_v26 }
 0x444   : > { %v2597_v4 = vadd.f32 %v2541_v41, %v6055_v28  ;;  %v7179_v28 = vld [vmem:[#allocation55_spill] sm:$0xff] }
 0x446   : > { %v2668_v10 = vpop.f32.mrf.mxu2  ;;  %3840 = vmatmul.msk.f32.vlgmr.msra.gmra.mxu1 %vm2006_vm4, %v5478_v6  ;;  %v6345_v54 = vadd.f32 %v2665_v21, %v2597_v4  ;;  %v7180_v21 = vld [vmem:[#allocation27_spill] sm:$0xff] }
 0x447   : > { %v7182_v4 = vld [vmem:[#allocation103_spill] sm:$0xff] }
 0x44b   : > { %v2544_v57 = vpop.f32.mrf.mxu1  ;;  %3867 = vmatmul.msk.f32.gmra.mxu2 %vm2006_vm4, %v5541_v9 }
 0x44c   : > { %v2598_v53 = vadd.f32 %v2544_v57, %v6067_v37  ;;  %v7181_v37 = vld [vmem:[#allocation74_spill] sm:$0xff]  ;;  %v7183_v57 = vld [vmem:[#allocation73_spill] sm:$0xff] }
 0x44e   : > { %v2671_v19 = vpop.f32.mrf.mxu2  ;;  %3841 = vmatmul.msk.f32.gmra.mxu1 %vm2006_vm4, %v5509_v12  ;;  %v6352_v47 = vadd.f32 %v2668_v10, %v2598_v53 }
 0x453   : > { %v2547_v26 = vpop.f32.mrf.mxu1  ;;  %3868 = vmatmul.msk.f32.gmra.mxu2 %vm2006_vm4, %v5572_v27 }
 0x454   : > { %v2599_v6 = vadd.f32 %v2547_v26, %v7179_v28  ;;  %v7184_v26 = vld [vmem:[#allocation43_spill] sm:$0xff] }
 0x455   : > { %v7185_v28 = vld [vmem:[#allocation11_spill] sm:$0xff] }
 0x456   : > { %v2674_v49 = vpop.f32.mrf.mxu2  ;;  %3842 = vmatmul.msk.f32.gmra.mxu1 %vm2006_vm4, %v7180_v21  ;;  %v6359_v41 = vadd.f32 %v2671_v19, %v2599_v6  ;;  %v7186_v6 = vld [vmem:[#allocation34_spill] sm:$0xff] }
 0x45b   : > { %v2550_v9 = vpop.f32.mrf.mxu1  ;;  %3869 = vmatmul.msk.f32.gmra.mxu2 %vm2006_vm4, %v7181_v37 }
 0x45c   : > { %v2600_v12 = vadd.f32 %v2550_v9, %v7182_v4  ;;  %v7187_v9 = vld [vmem:[#allocation54_spill] sm:$0xff] }
 0x45e   : > { %v2677_v10 = vpop.f32.mrf.mxu2  ;;  %3843 = vmatmul.msk.f32.gmra.mxu1 %vm2006_vm4, %v7183_v57  ;;  %v6366_v53 = vadd.f32 %v2674_v49, %v2600_v12  ;;  %v7188_v12 = vld [vmem:[#allocation40_spill] sm:$0xff] }
 0x463   : > { %v2553_v27 = vpop.f32.mrf.mxu1  ;;  %3870 = vmatmul.msk.f32.gmra.mxu2 %vm2006_vm4, %v7184_v26 }
 0x464   : > { %v2601_v21 = vadd.f32 %v2553_v27, %v7185_v28  ;;  %v7189_v27 = vld [vmem:[#allocation24_spill] sm:$0xff] }
 0x466   : > { %v2680_v19 = vpop.f32.mrf.mxu2  ;;  %3844 = vmatmul.msk.f32.gmra.mxu1 %vm2006_vm4, %v7186_v6  ;;  %v6373_v13 = vadd.f32 %v2677_v10, %v2601_v21  ;;  %v7190_v21 = vld [vmem:[#allocation82_spill] sm:$0xff] }
 0x46b   : > { %v2556_v37 = vpop.f32.mrf.mxu1  ;;  %3871 = vmatmul.msk.f32.gmra.mxu2 %vm2006_vm4, %v7150_v48 }
 0x46c   : > { %v2602_v4 = vadd.f32 %v2556_v37, %v7187_v9 }
 0x46e   : > { %v2683_v49 = vpop.f32.mrf.mxu2  ;;  %3845 = vmatmul.msk.f32.gmra.mxu1 %vm2006_vm4, %v7188_v12  ;;  %v6380_v57 = vadd.f32 %v2680_v19, %v2602_v4 }
 0x473   : > { %v2559_v26 = vpop.f32.mrf.mxu1  ;;  %3872 = vmatmul.msk.f32.gmra.mxu2 %vm2006_vm4, %v7158_v31 }
 0x474   : > { %v2603_v28 = vadd.f32 %v2559_v26, %v7189_v27 }
 0x476   : > { %v2686_v10 = vpop.f32.mrf.mxu2  ;;  %3846 = vmatmul.msk.f32.gmra.mxu1 %vm2006_vm4, %v7190_v21  ;;  %v6387_v6 = vadd.f32 %v2683_v49, %v2603_v28 }
 0x47b   : > { %v2562_v48 = vpop.f32.mrf.mxu1  ;;  %3873 = vmatmul.msk.f32.gmra.mxu2 %vm2006_vm4, %v7162_v2 }
 0x47c   : > { %v2604_v37 = vadd.f32 %v2562_v48, %v6143_v11  ;;  %v2764_v11 = vpop.f32.mrf.mxu3 }
 0x47e   : > { %v2689_v19 = vpop.f32.mrf.mxu2  ;;  %3847 = vmatmul.msk.f32.gmra.mxu1 %vm2006_vm4, %v7147_v34  ;;  %v6394_v9 = vadd.f32 %v2686_v10, %v2604_v37  ;;  %v7191_v37 = vld [vmem:[#allocation57_spill] sm:$0xff] }
 0x483   : > { %v2565_v31 = vpop.f32.mrf.mxu1  ;;  %3874 = vmatmul.msk.f32.gmra.mxu2 %vm2006_vm4, %v7165_v56 }
 0x484   : > { %v2605_v4 = vadd.f32 %v2565_v31, %v6166_v50  ;;  %v2884_v50 = vpop.f32.mrf.mxu0  ;;  %v2767_v28 = vpop.f32.mrf.mxu3 }
 0x486   : > { %v2692_v49 = vpop.f32.mrf.mxu2  ;;  %3848 = vmatmul.msk.f32.gmra.mxu1 %vm2006_vm4, %v7156_v33  ;;  %v6401_v12 = vadd.f32 %v2689_v19, %v2605_v4  ;;  %v7192_v4 = vld [vmem:[#allocation51_spill] sm:$0xff] }
 0x48b   : > { %v2568_v2 = vpop.f32.mrf.mxu1  ;;  %3875 = vmatmul.msk.f32.gmra.mxu2 %vm2006_vm4, %v7167_v43 }
 0x48c   : > { %v2606_v34 = vadd.f32 %v2568_v2, %v6183_v60  ;;  %v2887_v21 = vpop.f32.mrf.mxu0 }
 0x48e   : > { %v2695_v26 = vpop.f32.mrf.mxu2  ;;  %3849 = vmatmul.msk.f32.gmra.mxu1 %vm2006_vm4, %v7161_v35  ;;  %v6408_v56 = vadd.f32 %v2692_v49, %v2606_v34 }
 0x493   : > { %v2571_v27 = vpop.f32.mrf.mxu1  ;;  %3876 = vmatmul.msk.f32.gmra.mxu2 %vm2006_vm4, %v7169_v38 }
 0x494   : > { %v2607_v33 = vadd.f32 %v2571_v27, %v6198_v46  ;;  %v2770_v46 = vpop.f32.mrf.mxu3  ;;  %v7193_v27 = vld [vmem:[#allocation15_spill] sm:$0xff] }
 0x496   : > { %v2698_v10 = vpop.f32.mrf.mxu2  ;;  %3850 = vmatmul.msk.f32.gmra.mxu1 %vm2006_vm4, %v7163_v7  ;;  %v6415_v43 = vadd.f32 %v2695_v26, %v2607_v33 }
 0x49b   : > { %v2574_v60 = vpop.f32.mrf.mxu1  ;;  %3877 = vmatmul.msk.f32.gmra.mxu2 %vm2006_vm4, %v7170_v22 }
 0x49c   : > { %v2608_v35 = vadd.f32 %v2574_v60, %v6210_v59  ;;  %v2890_v59 = vpop.f32.mrf.mxu0  ;;  %v2773_v49 = vpop.f32.mrf.mxu3 }
 0x49e   : > { %v2701_v48 = vpop.f32.mrf.mxu2  ;;  %3851 = vmatmul.msk.f32.gmra.mxu1 %vm2006_vm4, %v7191_v37  ;;  %v6422_v38 = vadd.f32 %v2698_v10, %v2608_v35 }
 0x4a3   : > { %v2577_v19 = vpop.f32.mrf.mxu1  ;;  %3878 = vmatmul.msk.f32.gmra.mxu2 %vm2006_vm4, %v7171_v61 }
 0x4a4   : > { %v2609_v7 = vadd.f32 %v2577_v19, %v6218_v58  ;;  %v2893_v61 = vpop.f32.mrf.mxu0  ;;  %v6440_v10 = vpop.f32.mrf.mxu3 }
 0x4a6   : > { %v2704_v31 = vpop.f32.mrf.mxu2  ;;  %3852 = vmatmul.msk.f32.gmra.mxu1 %vm2006_vm4, %v7192_v4  ;;  %v6429_v22 = vadd.f32 %v2701_v48, %v2609_v7 }
 0x4ab   : > { %v2580_v2 = vpop.f32.mrf.mxu1  ;;  %3879 = vmatmul.msk.f32.gmra.mxu2 %vm2006_vm4, %v5892_v39 }
 0x4ac   : > { %v2610_v34 = vadd.f32 %v2580_v2, %v6226_v24  ;;  %v6448_v24 = vpop.f32.mrf.mxu0  ;;  %v6454_v19 = vpop.f32.mrf.mxu3 }
 0x4ae   : > { %v2707_v26 = vpop.f32.mrf.mxu2  ;;  %3853 = vmatmul.msk.f32.gmra.mxu1 %vm2006_vm4, %v7193_v27  ;;  %v6436_v58 = vadd.f32 %v2704_v31, %v2610_v34 }
 0x4b3   : > { %v2583_v33 = vpop.f32.mrf.mxu1  ;;  %3880 = vmatmul.msk.f32.gmra.mxu2 %vm2006_vm4, %v5921_v52  ;;  %v2836_v52 = vadd.f32 %v2764_v11, %v6251_v63 }
 0x4b4   : > { %v2611_v60 = vadd.f32 %v2583_v33, %v6234_v23  ;;  %v6467_v63 = vpop.f32.mrf.mxu0  ;;  %v6472_v4 = vpop.f32.mrf.mxu3 }
 0x4b5   : > { %v2956_v7 = vadd.f32 %v2884_v50, %v2836_v52  ;;  %v2839_v52 = vadd.f32 %v2773_v49, %v6278_v8 }
 0x4b6   : > { %v2710_v35 = vpop.f32.mrf.mxu2  ;;  %3854 = vmatmul.msk.f32.gmra.mxu1 %vm2006_vm4, %v5889_v55  ;;  %v6445_v39 = vadd.f32 %v2707_v26, %v2611_v60 }
 0x4bb   : > { %v2586_v48 = vpop.f32.mrf.mxu1  ;;  %3881 = vmatmul.msk.f32.gmra.mxu2 %vm2006_vm4, %v5956_v18 }
 0x4bc   : > { %v2612_v37 = vadd.f32 %v2586_v48, %v6242_v45  ;;  %v6465_v45 = vld [vmem:[%s6642_s4] ss:$0 sm:$0xff]  ;;  %v6487_v33 = vpop.f32.mrf.mxu0 }
 0x4be   : > { %3855 = vmatmul.msk.f32.gmra.mxu1 %vm2006_vm4, %v5918_v25  ;;  %v3131_v23 = vpop.f32.mrf.mxu2  ;;  %v6458_v55 = vadd.f32 %v2710_v35, %v2612_v37  ;;  %v2837_v25 = vadd.f32 %v2767_v28, %v6260_v5  ;;  %v2838_v28 = vadd.f32 %v2770_v46, %v6269_v32  ;;  %v7194_v32 = vld [vmem:[#allocation10_spill] sm:$0xff] }
 0x4bf   : > { %v7195_v46 = vld [vmem:[#allocation134_spill] sm:$0xff] }
 0x4c0   : > { %v2957_v34 = vadd.f32 %v2887_v21, %v2837_v25  ;;  %v6490_v21 = vpop.f32.mrf.mxu3  ;;  %v2958_v48 = vadd.f32 %v2890_v59, %v2838_v28  ;;  %v7199_v28 = vld [vmem:[#allocation91_spill] sm:$0xff] }
 0x4c3   : > { %v3008_v31 = vpop.f32.mrf.mxu1  ;;  %3882 = vmatmul.msk.f32.gmra.mxu2 %vm2006_vm4, %v5985_v62 }
 0x4c4   : > { %v3080_v18 = vadd.f32 %v3008_v31, %v2956_v7  ;;  %v6502_v31 = vpop.f32.mrf.mxu0 }
 0x4c6   : > { %v3203_v11 = vadd.f32 %v3131_v23, %v3080_v18  ;;  %3856 = vmatmul.msk.f32.gmra.mxu1 %vm2006_vm4, %v5953_v40  ;;  %v3134_v50 = vpop.f32.mrf.mxu2  ;;  %v7196_v18 = vld [vmem:[#allocation45_spill] sm:$0xff] }
 0x4c8   : > { %v3231_v62 = vadd.f32 %v6465_v45, %v3203_v11  ;;  %v2959_v11 = vadd.f32 %v2893_v61, %v2839_v52 }
 0x4ca   : > { %v3255_v2 = vmax.f32 %v3231_v62, 0.0  ;;  %v6507_v62 = vpop.f32.mrf.mxu3 }
 0x4cb   : > { %v3011_v5 = vpop.f32.mrf.mxu1  ;;  %3883 = vmatmul.msk.f32.gmra.mxu2 %vm2006_vm4, %v6008_v30 }
 0x4cc   : > { %3279 = vst.msk [vmem:[%s6478_s30] sm:$0xff] %vm2006_vm4, %v3255_v2  ;;  %v3081_v40 = vadd.f32 %v3011_v5, %v2957_v34  ;;  %v2840_v2 = vadd.f32 %v6440_v10, %v6287_v16  ;;  %v7198_v5 = vld [vmem:[#allocation92_spill] sm:$0xff] }
 0x4ce   : > { %v3204_v26 = vadd.f32 %v3134_v50, %v3081_v40  ;;  %3857 = vmatmul.msk.f32.gmra.mxu1 %vm2006_vm4, %v5982_v42  ;;  %v3137_v27 = vpop.f32.mrf.mxu2  ;;  %v1276_v42 = vadd.f32 %v7195_v46, %v7194_v32  ;;  %v7201_v46 = vld [vmem:[#allocation120_spill] sm:$0xff] }
 0x4d0   : > { %v3232_v60 = vadd.f32 %v6465_v45, %v3204_v26 }
 0x4d2   : > { %v3256_v35 = vmax.f32 %v3232_v60, 0.0  ;;  %v2960_v60 = vadd.f32 %v6448_v24, %v2840_v2 }
 0x4d3   : > { %v3014_v37 = vpop.f32.mrf.mxu1  ;;  %3884 = vmatmul.msk.f32.gmra.mxu2 %vm2006_vm4, %v6035_v20  ;;  %v1424_v20 = vadd.f32 %v7196_v18, %v1276_v42  ;;  %v3106_v42 = vrot.slane %v7201_v46, 2 }
 0x4d4   : > { %3280 = vst.msk [vmem:[%s6478_s30 + $0x8] sm:$0xff] %vm2006_vm4, %v3256_v35  ;;  %v3082_v30 = vadd.f32 %v3014_v37, %v2958_v48  ;;  %v2908_v35 = vpop.f32.mrf.mxu0  ;;  %v2841_v37 = vadd.f32 %v6454_v19, %v6302_v0 }
 0x4d6   : > { %v3205_v23 = vadd.f32 %v3137_v27, %v3082_v30  ;;  %3858 = vmatmul.msk.f32.gmra.mxu1 %vm2006_vm4, %v6005_v14  ;;  %v3140_v7 = vpop.f32.mrf.mxu2  ;;  %v7197_v14 = vld [vmem:[#allocation132_spill] sm:$0xff]  ;;  %v2791_v30 = vpop.f32.mrf.mxu3 }
 0x4d7   : > { %v1569_v49 = vadd.f32 %v7197_v14, %v1424_v20  ;;  %v2983_v14 = vrot.slane %v7201_v46, 1 }
 0x4d8   : > { %v3233_v59 = vadd.f32 %v6465_v45, %v3205_v23 }
 0x4d9   : > { %v1718_v40 = vadd.f32 %v7198_v5, %v1569_v49  ;;  %v2843_v5 = vadd.f32 %v6490_v21, %v6338_v17  ;;  %v2844_v17 = vadd.f32 %v6507_v62, %v6345_v54 }
 0x4da   : > { %v3257_v25 = vmax.f32 %v3233_v59, 0.0  ;;  %v7202_v59 = vrot.slane %v6188_v15, 2 }
 0x4db   : > { %v3017_v50 = vpop.f32.mrf.mxu1  ;;  %3885 = vmatmul.msk.f32.gmra.mxu2 %vm2006_vm4, %v6317_v51  ;;  %v1866_v26 = vadd.f32 %v7199_v28, %v1718_v40  ;;  %v2964_v46 = vadd.f32 %v2908_v35, %v2844_v17 }
 0x4dc   : > { %3281 = vst.msk [vmem:[%s6478_s30 + $0x10] sm:$0xff] %vm2006_vm4, %v3257_v25  ;;  %v3083_v8 = vadd.f32 %v3017_v50, %v2959_v11  ;;  %v3107_v18 = vsel %vm723_vm3, %v7202_v59, %v3106_v42  ;;  %v2911_v0 = vpop.f32.mrf.mxu0  ;;  %v2842_v25 = vadd.f32 %v6472_v4, %v6323_v3 }
 0x4de   : > { %v3206_v34 = vadd.f32 %v3140_v7, %v3083_v8  ;;  %3859 = vmatmul.msk.f32.gmra.mxu1 %vm2006_vm4, %v6030_v36  ;;  %v3143_v61 = vpop.f32.mrf.mxu2  ;;  %v7200_v36 = vld [vmem:[#allocation59_spill] sm:$0xff]  ;;  %v2961_v7 = vadd.f32 %v6467_v63, %v2841_v37  ;;  %v2794_v50 = vpop.f32.mrf.mxu3  ;;  %v2962_v2 = vadd.f32 %v6487_v33, %v2842_v25 }
 0x4df   : > { %v1899_v10 = vadd.f32 %v7200_v36, %v1866_v26  ;;  %v2846_v35 = vadd.f32 %v2794_v50, %v6359_v41 }
 0x4e0   : > { %v3234_v51 = vadd.f32 %v6465_v45, %v3206_v34 }
 0x4e2   : > { %v3258_v27 = vmax.f32 %v3234_v51, 0.0 }
 0x4e3   : > { %v3020_v48 = vpop.f32.mrf.mxu1  ;;  %3886 = vmatmul.msk.f32.gmra.mxu2 %vm2006_vm4, %v6332_v1  ;;  %v1928_v1 = vmax.f32 %v1899_v10, 0.0 }
 0x4e4   : > { %3282 = vst.msk [vmem:[%s6478_s30 + $0x18] sm:$0xff] %vm2006_vm4, %v3258_v27  ;;  %v3084_v16 = vadd.f32 %v3020_v48, %v2960_v60  ;;  %v2914_v51 = vpop.f32.mrf.mxu0  ;;  %v2963_v48 = vadd.f32 %v6502_v31, %v2843_v5 }
 0x4e5   : > { %v3108_v19 = vrot.slane %v1928_v1, 2  ;;  %v2985_v26 = vrot.slane %v1928_v1, 1  ;;  %v2845_v1 = vadd.f32 %v2791_v30, %v6352_v47 }
 0x4e6   : > { %v3207_v32 = vadd.f32 %v3143_v61, %v3084_v16  ;;  %3860 = vmatmul.msk.f32.gmra.mxu1 %vm2006_vm4, %v6293_v44  ;;  %v3146_v24 = vpop.f32.mrf.mxu2  ;;  %v2797_v27 = vpop.f32.mrf.mxu3 }
 0x4e7   : > { %v3109_v34 = vsel %vm723_vm3, %v3106_v42, %v3108_v19  ;;  %v2986_v36 = vsel %vm319_vm2, %v2983_v14, %v2985_v26  ;;  %v2965_v59 = vadd.f32 %v2911_v0, %v2845_v1 }
 0x4e8   : > { %v3235_v52 = vadd.f32 %v6465_v45, %v3207_v32 }
 0x4ea   : > { %v3259_v23 = vmax.f32 %v3235_v52, 0.0 }
 0x4eb   : > { %v3023_v20 = vpop.f32.mrf.mxu1  ;;  %3887 = vmatmul.msk.f32.gmra.mxu2 %vm2006_vm4, %v3107_v18 }
 0x4ec   : > { %3283 = vst.msk [vmem:[%s6478_s30 + $0x20] sm:$0xff] %vm2006_vm4, %v3259_v23  ;;  %v3085_v44 = vadd.f32 %v3023_v20, %v2961_v7  ;;  %v2917_v32 = vpop.f32.mrf.mxu0 }
 0x4ee   : > { %v3208_v11 = vadd.f32 %v3146_v24, %v3085_v44  ;;  %3861 = vmatmul.msk.f32.gmra.mxu1 %vm2006_vm4, %v6309_v29  ;;  %v3149_v63 = vpop.f32.mrf.mxu2  ;;  %v7203_v29 = vrot.slane %v6188_v15, 1  ;;  %v2800_v42 = vpop.f32.mrf.mxu3 }
 0x4ef   : > { %v2848_v5 = vadd.f32 %v2800_v42, %v6373_v13 }
 0x4f0   : > { %v3236_v8 = vadd.f32 %v6465_v45, %v3208_v11  ;;  %v2984_v4 = vsel %vm319_vm2, %v7203_v29, %v2983_v14 }
 0x4f2   : > { %v3260_v49 = vmax.f32 %v3236_v8, 0.0 }
 0x4f3   : > { %v3026_v61 = vpop.f32.mrf.mxu1  ;;  %3888 = vmatmul.msk.f32.gmra.mxu2 %vm2006_vm4, %v3109_v34 }
 0x4f4   : > { %3284 = vst.msk [vmem:[%s6478_s30 + $0x28] sm:$0xff] %vm2006_vm4, %v3260_v49  ;;  %v3086_v3 = vadd.f32 %v3026_v61, %v2962_v2  ;;  %v2920_v18 = vpop.f32.mrf.mxu0  ;;  %v2847_v49 = vadd.f32 %v2797_v27, %v6366_v53 }
 0x4f5   : > { %v2968_v27 = vadd.f32 %v2920_v18, %v2848_v5 }
 0x4f6   : > { %v3209_v40 = vadd.f32 %v3149_v63, %v3086_v3  ;;  %3862 = vmatmul.msk.f32.gmra.mxu1 %vm2006_vm4, %v2984_v4  ;;  %v3152_v33 = vpop.f32.mrf.mxu2  ;;  %v2803_v19 = vpop.f32.mrf.mxu3  ;;  %v2966_v63 = vadd.f32 %v2914_v51, %v2846_v35  ;;  %v2967_v3 = vadd.f32 %v2917_v32, %v2847_v49 }
 0x4f8   : > { %v3237_v28 = vadd.f32 %v6465_v45, %v3209_v40 }
 0x4fa   : > { %v3261_v60 = vmax.f32 %v3237_v28, 0.0 }
 0x4fb   : > { %v3029_v16 = vpop.f32.mrf.mxu1 }
 0x4fc   : > { %3285 = vst.msk [vmem:[%s6478_s30 + $0x30] sm:$0xff] %vm2006_vm4, %v3261_v60  ;;  %v3087_v15 = vadd.f32 %v3029_v16, %v2963_v48  ;;  %v2923_v0 = vpop.f32.mrf.mxu0  ;;  %v2849_v16 = vadd.f32 %v2803_v19, %v6380_v57 }
 0x4fe   : > { %v3210_v21 = vadd.f32 %v3152_v33, %v3087_v15  ;;  %3863 = vmatmul.msk.f32.gmra.mxu1 %vm2006_vm4, %v2986_v36  ;;  %v3155_v10 = vpop.f32.mrf.mxu2  ;;  %v2806_v61 = vpop.f32.mrf.mxu3 }
 0x500   : > { %v3238_v37 = vadd.f32 %v6465_v45, %v3210_v21 }
 0x502   : > { %v3262_v24 = vmax.f32 %v3238_v37, 0.0 }
 0x503   : > { %v3032_v31 = vpop.f32.mrf.mxu1 }
 0x504   : > { %3286 = vst.msk [vmem:[%s6478_s30 + $0x38] sm:$0xff] %vm2006_vm4, %v3262_v24  ;;  %v3088_v52 = vadd.f32 %v3032_v31, %v2964_v46  ;;  %v2926_v51 = vpop.f32.mrf.mxu0  ;;  %v2850_v46 = vadd.f32 %v2806_v61, %v6387_v6 }
 0x506   : > { %v3211_v23 = vadd.f32 %v3155_v10, %v3088_v52  ;;  %v3158_v7 = vpop.f32.mrf.mxu2  ;;  %v2809_v53 = vpop.f32.mrf.mxu3  ;;  %v2969_v10 = vadd.f32 %v2923_v0, %v2849_v16  ;;  %v2970_v1 = vadd.f32 %v2926_v51, %v2850_v46 }
 0x508   : > { %v3239_v54 = vadd.f32 %v6465_v45, %v3211_v23 }
 0x50a   : > { %v3263_v62 = vmax.f32 %v3239_v54, 0.0 }
 0x50b   : > { %v3035_v20 = vpop.f32.mrf.mxu1 }
 0x50c   : > { %3287 = vst.msk [vmem:[%s6478_s30 + $0x40] sm:$0xff] %vm2006_vm4, %v3263_v62  ;;  %v3089_v44 = vadd.f32 %v3035_v20, %v2965_v59  ;;  %v2929_v13 = vpop.f32.mrf.mxu0  ;;  %v2851_v62 = vadd.f32 %v2809_v53, %v6394_v9 }
 0x50e   : > { %v3212_v25 = vadd.f32 %v3158_v7, %v3089_v44  ;;  %v3161_v11 = vpop.f32.mrf.mxu2  ;;  %v2812_v32 = vpop.f32.mrf.mxu3  ;;  %v2971_v35 = vadd.f32 %v2929_v13, %v2851_v62 }
 0x510   : > { %v3240_v47 = vadd.f32 %v6465_v45, %v3212_v25 }
 0x512   : > { %v3264_v30 = vmax.f32 %v3240_v47, 0.0  ;;  %v2852_v47 = vadd.f32 %v2812_v32, %v6401_v12 }
 0x513   : > { %v3038_v8 = vpop.f32.mrf.mxu1 }
 0x514   : > { %3288 = vst.msk [vmem:[%s6478_s30 + $0x48] sm:$0xff] %vm2006_vm4, %v3264_v30  ;;  %v3090_v14 = vadd.f32 %v3038_v8, %v2966_v63  ;;  %v2932_v23 = vpop.f32.mrf.mxu0 }
 0x515   : > { %v2972_v0 = vadd.f32 %v2932_v23, %v2852_v47 }
 0x516   : > { %v3213_v2 = vadd.f32 %v3161_v11, %v3090_v14  ;;  %v3164_v34 = vpop.f32.mrf.mxu2  ;;  %v2815_v59 = vpop.f32.mrf.mxu3 }
 0x518   : > { %v3241_v41 = vadd.f32 %v6465_v45, %v3213_v2 }
 0x51a   : > { %v3265_v50 = vmax.f32 %v3241_v41, 0.0 }
 0x51b   : > { %v3041_v29 = vpop.f32.mrf.mxu1 }
 0x51c   : > { %3289 = vst.msk [vmem:[%s6478_s30 + $0x50] sm:$0xff] %vm2006_vm4, %v3265_v50  ;;  %v3091_v4 = vadd.f32 %v3041_v29, %v2967_v3  ;;  %v2935_v11 = vpop.f32.mrf.mxu0 }
 0x51e   : > { %v3214_v40 = vadd.f32 %v3164_v34, %v3091_v4  ;;  %v3167_v33 = vpop.f32.mrf.mxu2  ;;  %v2818_v8 = vpop.f32.mrf.mxu3  ;;  %v2853_v34 = vadd.f32 %v2815_v59, %v6408_v56 }
 0x520   : > { %v3242_v28 = vadd.f32 %v6465_v45, %v3214_v40  ;;  %v2973_v4 = vadd.f32 %v2935_v11, %v2853_v34 }
 0x522   : > { %v3266_v26 = vmax.f32 %v3242_v28, 0.0 }
 0x523   : > { %v3044_v60 = vpop.f32.mrf.mxu1 }
 0x524   : > { %3290 = vst.msk [vmem:[%s6478_s30 + $0x58] sm:$0xff] %vm2006_vm4, %v3266_v26  ;;  %v3092_v48 = vadd.f32 %v3044_v60, %v2968_v27  ;;  %v2938_v50 = vpop.f32.mrf.mxu0 }
 0x526   : > { %v3215_v15 = vadd.f32 %v3167_v33, %v3092_v48  ;;  %v3170_v36 = vpop.f32.mrf.mxu2  ;;  %v2821_v12 = vpop.f32.mrf.mxu3  ;;  %v2854_v33 = vadd.f32 %v2818_v8, %v6415_v43 }
 0x528   : > { %v3243_v17 = vadd.f32 %v6465_v45, %v3215_v15  ;;  %v2974_v27 = vadd.f32 %v2938_v50, %v2854_v33  ;;  %v2855_v15 = vadd.f32 %v2821_v12, %v6422_v38 }
 0x52a   : > { %v3267_v21 = vmax.f32 %v3243_v17, 0.0 }
 0x52b   : > { %v3047_v37 = vpop.f32.mrf.mxu1 }
 0x52c   : > { %3291 = vst.msk [vmem:[%s6478_s30 + $0x60] sm:$0xff] %vm2006_vm4, %v3267_v21  ;;  %v3093_v24 = vadd.f32 %v3047_v37, %v2969_v10  ;;  %v2941_v56 = vpop.f32.mrf.mxu0 }
 0x52d   : > { %v2975_v21 = vadd.f32 %v2941_v56, %v2855_v15 }
 0x52e   : > { %v3216_v31 = vadd.f32 %v3170_v36, %v3093_v24  ;;  %v3173_v42 = vpop.f32.mrf.mxu2  ;;  %v2824_v48 = vpop.f32.mrf.mxu3 }
 0x52f   : > { %v2856_v24 = vadd.f32 %v2824_v48, %v6429_v22 }
 0x530   : > { %v3244_v57 = vadd.f32 %v6465_v45, %v3216_v31 }
 0x532   : > { %v3268_v52 = vmax.f32 %v3244_v57, 0.0 }
 0x533   : > { %v3050_v7 = vpop.f32.mrf.mxu1 }
 0x534   : > { %3292 = vst.msk [vmem:[%s6478_s30 + $0x68] sm:$0xff] %vm2006_vm4, %v3268_v52  ;;  %v3094_v54 = vadd.f32 %v3050_v7, %v2970_v1  ;;  %v2944_v10 = vpop.f32.mrf.mxu0 }
 0x535   : > { %v2976_v52 = vadd.f32 %v2944_v10, %v2856_v24 }
 0x536   : > { %v3217_v18 = vadd.f32 %v3173_v42, %v3094_v54  ;;  %v3176_v20 = vpop.f32.mrf.mxu2  ;;  %v2827_v46 = vpop.f32.mrf.mxu3 }
 0x537   : > { %v2857_v54 = vadd.f32 %v2827_v46, %v6436_v58 }
 0x538   : > { %v3245_v6 = vadd.f32 %v6465_v45, %v3217_v18 }
 0x53a   : > { %v3269_v44 = vmax.f32 %v3245_v6, 0.0 }
 0x53b   : > { %v3053_v19 = vpop.f32.mrf.mxu1 }
 0x53c   : > { %3293 = vst.msk [vmem:[%s6478_s30 + $0x70] sm:$0xff] %vm2006_vm4, %v3269_v44  ;;  %v3095_v25 = vadd.f32 %v3053_v19, %v2971_v35  ;;  %v2947_v7 = vpop.f32.mrf.mxu0 }
 0x53d   : > { %v2977_v6 = vadd.f32 %v2947_v7, %v2857_v54 }
 0x53e   : > { %v3218_v30 = vadd.f32 %v3176_v20, %v3095_v25  ;;  %v3179_v63 = vpop.f32.mrf.mxu2  ;;  %v2830_v59 = vpop.f32.mrf.mxu3 }
 0x53f   : > { %v2858_v19 = vadd.f32 %v2830_v59, %v6445_v39 }
 0x540   : > { %v3246_v9 = vadd.f32 %v6465_v45, %v3218_v30 }
 0x542   : > { %v3270_v14 = vmax.f32 %v3246_v9, 0.0 }
 0x543   : > { %v3056_v49 = vpop.f32.mrf.mxu1 }
 0x544   : > { %3294 = vst.msk [vmem:[%s6478_s30 + $0x78] sm:$0xff] %vm2006_vm4, %v3270_v14  ;;  %v3096_v2 = vadd.f32 %v3056_v49, %v2972_v0  ;;  %v2950_v11 = vpop.f32.mrf.mxu0 }
 0x546   : > { %v3219_v61 = vadd.f32 %v3179_v63, %v3096_v2  ;;  %v3182_v41 = vpop.f32.mrf.mxu2  ;;  %v2833_v58 = vpop.f32.mrf.mxu3  ;;  %v2978_v63 = vadd.f32 %v2950_v11, %v2858_v19 }
 0x547   : > { %v2859_v0 = vadd.f32 %v2833_v58, %v6458_v55 }
 0x548   : > { %v3247_v3 = vadd.f32 %v6465_v45, %v3219_v61 }
 0x54a   : > { %v3271_v29 = vmax.f32 %v3247_v3, 0.0 }
 0x54b   : > { %v3059_v5 = vpop.f32.mrf.mxu1 }
 0x54c   : > { %3295 = vst.msk [vmem:[%s6478_s30 + $0x80] sm:$0xff] %vm2006_vm4, %v3271_v29  ;;  %v3097_v40 = vadd.f32 %v3059_v5, %v2973_v4  ;;  %v2953_v39 = vpop.f32.mrf.mxu0 }
 0x54d   : > { %v2979_v61 = vadd.f32 %v2953_v39, %v2859_v0 }
 0x54e   : > { %v3220_v51 = vadd.f32 %v3182_v41, %v3097_v40  ;;  %v3185_v28 = vpop.f32.mrf.mxu2 }
 0x550   : > { %v3248_v53 = vadd.f32 %v6465_v45, %v3220_v51 }
 0x552   : > { %v3272_v26 = vmax.f32 %v3248_v53, 0.0 }
 0x553   : > { %v3062_v60 = vpop.f32.mrf.mxu1 }
 0x554   : > { %3296 = vst.msk [vmem:[%s6478_s30 + $0x88] sm:$0xff] %vm2006_vm4, %v3272_v26  ;;  %v3098_v16 = vadd.f32 %v3062_v60, %v2974_v27 }
 0x556   : > { %v3221_v36 = vadd.f32 %v3185_v28, %v3098_v16  ;;  %v3188_v17 = vpop.f32.mrf.mxu2 }
 0x558   : > { %v3249_v43 = vadd.f32 %v6465_v45, %v3221_v36 }
 0x55a   : > { %v3273_v13 = vmax.f32 %v3249_v43, 0.0 }
 0x55b   : > { %v3065_v37 = vpop.f32.mrf.mxu1 }
 0x55c   : > { %3297 = vst.msk [vmem:[%s6478_s30 + $0x90] sm:$0xff] %vm2006_vm4, %v3273_v13  ;;  %v3099_v32 = vadd.f32 %v3065_v37, %v2975_v21 }
 0x55e   : > { %v3222_v31 = vadd.f32 %v3188_v17, %v3099_v32  ;;  %v3191_v42 = vpop.f32.mrf.mxu2 }
 0x560   : > { %v3250_v38 = vadd.f32 %v6465_v45, %v3222_v31 }
 0x562   : > { %v3274_v57 = vmax.f32 %v3250_v38, 0.0 }
 0x563   : > { %v3068_v1 = vpop.f32.mrf.mxu1 }
 0x564   : > { %3298 = vst.msk [vmem:[%s6478_s30 + $0x98] sm:$0xff] %vm2006_vm4, %v3274_v57  ;;  %v3100_v23 = vadd.f32 %v3068_v1, %v2976_v52 }
 0x566   : > { %v3223_v62 = vadd.f32 %v3191_v42, %v3100_v23  ;;  %v3194_v22 = vpop.f32.mrf.mxu2 }
 0x568   : > { %v3251_v18 = vadd.f32 %v6465_v45, %v3223_v62 }
 0x56a   : > { %v3275_v20 = vmax.f32 %v3251_v18, 0.0 }
 0x56b   : > { %v3071_v44 = vpop.f32.mrf.mxu1 }
 0x56c   : > { %3299 = vst.msk [vmem:[%s6478_s30 + $0xa0] sm:$0xff] %vm2006_vm4, %v3275_v20  ;;  %v3101_v35 = vadd.f32 %v3071_v44, %v2977_v6 }
 0x56e   : > { %v3224_v25 = vadd.f32 %v3194_v22, %v3101_v35  ;;  %v3197_v8 = vpop.f32.mrf.mxu2 }
 0x570   : > { %v3252_v47 = vadd.f32 %v6465_v45, %v3224_v25 }
 0x572   : > { %v3276_v30 = vmax.f32 %v3252_v47, 0.0 }
 0x573   : > { %v3074_v9 = vpop.f32.mrf.mxu1 }
 0x574   : > { %3300 = vst.msk [vmem:[%s6478_s30 + $0xa8] sm:$0xff] %vm2006_vm4, %v3276_v30  ;;  %v3102_v14 = vadd.f32 %v3074_v9, %v2978_v63 }
 0x576   : > { %v3225_v49 = vadd.f32 %v3197_v8, %v3102_v14  ;;  %v3200_v3 = vpop.f32.mrf.mxu2 }
 0x578   : > { %v3253_v2 = vadd.f32 %v6465_v45, %v3225_v49 }
 0x57a   : > { %v3277_v34 = vmax.f32 %v3253_v2, 0.0 }
 0x57b   : > { %v3077_v41 = vpop.f32.mrf.mxu1 }
 0x57c   : > { %3301 = vst.msk [vmem:[%s6478_s30 + $0xb0] sm:$0xff] %vm2006_vm4, %v3277_v34  ;;  %v3103_v50 = vadd.f32 %v3077_v41, %v2979_v61 }
 0x57e   : > { %v3226_v12 = vadd.f32 %v3200_v3, %v3103_v50 }
 0x580   : > { %v3254_v29 = vadd.f32 %v6465_v45, %v3226_v12 }
 0x582   : > { %v3278_v4 = vmax.f32 %v3254_v29, 0.0 }
 0x584   : > { %3302 = vst.msk [vmem:[%s6478_s30 + $0xb8] sm:$0xff] %vm2006_vm4, %v3278_v4 }
 0x585 PF: > { %s15_s20 = sadd.s32 1, %s3947_s20   ;;  %s7204_s18 = smov %s3943_s19 }
 0x586   : > { %p12_p6 = scmp.ge.s32.totalorder %s15_s20, 4   ;;  %s7205_s19 = smov %s7207_s21 }
 0x588   :  { %14 = sbr.rel (!%p12_p6) target bundleno = 2 (0x2), region = 86 }

</bundles_post_ra>
